<compile_context>
chip_gen: v7x
topology: tpu7x:2x2x1
jax: 0.10.0
libtpu: 0.0.40
codegen_flags: <defaults>
</compile_context>

<pallas_src>
import jax
import jax.numpy as jnp
from jax.experimental import pallas as pl
from jax.experimental.pallas import tpu as pltpu

D_IN = 28
D_IN_PAD = 32          # 28 padded to a sublane-friendly contraction dim
D_OUT = 2800
D_OUT_PAD = 2816       # 22 * 128 -> lane-dense output stores
D_H1, D_H2, D_H3 = 128, 256, 512


def decoder_kernel(alphas_ref,                     # SMEM f32[3]   (PReLU alphas)
                   x_ref,                          # VMEM (TB, 32) batch tile (compute dtype)
                   w1_ref, b1_ref,                 # (32, 128)  cd, (1, 128)  f32   resident
                   w2_ref, b2_ref,                 # (128, 256) cd, (1, 256)  f32   resident
                   w3_ref, b3_ref,                 # (256, 512) cd, (1, 512)  f32   resident
                   w4_ref, b4_ref,                 # (512, TN)  cd, (1, TN)   f32   resident / N-tiled
                   o_ref):                         # VMEM (TB, TN) f32
    # Hoist the SMEM alpha reads once (single sld + broadcast per alpha).
    a1 = alphas_ref[0]
    a2 = alphas_ref[1]
    a3 = alphas_ref[2]

    def prelu(v, a):
        # PReLU(x) = x if x >= 0 else a * x
        return jnp.where(v >= 0, v, a * v)

    cd = w2_ref.dtype  # matmul operand dtype (bf16 fast path or f32 exact path)

    h = jnp.dot(x_ref[...], w1_ref[...], preferred_element_type=jnp.float32)
    h = prelu(h + b1_ref[...], a1)

    h = jnp.dot(h.astype(cd), w2_ref[...], preferred_element_type=jnp.float32)
    h = prelu(h + b2_ref[...], a2)

    h = jnp.dot(h.astype(cd), w3_ref[...], preferred_element_type=jnp.float32)
    h = prelu(h + b3_ref[...], a3)

    h = jnp.dot(h.astype(cd), w4_ref[...], preferred_element_type=jnp.float32)
    o_ref[...] = (h + b4_ref[...]).astype(o_ref.dtype)


def _round_up(n, m):
    return ((n + m - 1) // m) * m


def _default_num_n_tiles():
    """2 N tiles only pays off on multi-TensorCore chips (v7x megacore)."""
    try:
        kind = jax.devices()[0].device_kind.lower()
    except Exception:
        return 1
    return 2 if ("v7" in kind or "7x" in kind) else 1


def prepare_params(params, compute_dtype=jnp.bfloat16):
    """One-time parameter prep: pad (28->32, 2800->2816) and cast matmul
    operands to the compute dtype.  Biases/alphas stay f32."""
    cd = compute_dtype
    return {
        "w1": jnp.pad(params["w1"], ((0, D_IN_PAD - D_IN), (0, 0))).astype(cd),
        "b1": params["b1"].astype(jnp.float32),
        "w2": params["w2"].astype(cd),
        "b2": params["b2"].astype(jnp.float32),
        "w3": params["w3"].astype(cd),
        "b3": params["b3"].astype(jnp.float32),
        "w4": jnp.pad(params["w4"], ((0, 0), (0, D_OUT_PAD - D_OUT))).astype(cd),
        "b4": jnp.pad(params["b4"], ((0, 0), (0, D_OUT_PAD - D_OUT))).astype(jnp.float32),
        "alphas": params["alphas"].astype(jnp.float32),
    }


def decoder_forward(x, prep, *, tb=512, num_n_tiles=None):
    """x: (B, 28) float32; prep: output of prepare_params().

    tb:           batch tile (multiple of 8; clamped for small batches).
    num_n_tiles:  layer-4 N tiles; None -> 1 on single-TC chips, 2 on v7x.
    """
    B, d_in = x.shape
    assert d_in == D_IN
    cd = prep["w1"].dtype

    if num_n_tiles is None:
        num_n_tiles = _default_num_n_tiles()
    assert D_OUT_PAD % (num_n_tiles * 128) == 0
    tn = D_OUT_PAD // num_n_tiles

    # Small batches only need sublane (8) alignment on the block row dim.
    tb = max(8, min(tb, _round_up(B, 8)))
    b_pad = _round_up(B, tb)
    n_b = b_pad // tb

    # Per-call input prep: zero-pad rows to b_pad, contraction 28 -> 32, cast.
    xp = jnp.pad(x, ((0, b_pad - B), (0, D_IN_PAD - D_IN))).astype(cd)

    # Grid-invariant operands: plain VMEM residents (no per-step double buffer).
    vmem = pl.BlockSpec(memory_space=pltpu.VMEM)
    smem = pl.BlockSpec(memory_space=pltpu.SMEM)

    # Advisory cost estimate so XLA can overlap the pad/slice with the kernel.
    itemsize = jnp.dtype(cd).itemsize
    w_bytes = sum(int(prep[k].size) * int(prep[k].dtype.itemsize)
                  for k in ("w1", "b1", "w2", "b2", "w3", "b3", "w4", "b4"))
    cost = pl.CostEstimate(
        flops=2 * b_pad * (D_IN_PAD * D_H1 + D_H1 * D_H2
                           + D_H2 * D_H3 + D_H3 * D_OUT_PAD),
        transcendentals=0,
        bytes_accessed=b_pad * D_IN_PAD * itemsize + w_bytes
                       + b_pad * D_OUT_PAD * 4,
    )

    if num_n_tiles == 1:
        # Single-TC path (v5e/v6e): 1-D grid over batch, w4/b4 fully resident.
        grid = (n_b,)
        in_specs = [
            smem,                                              # alphas
            pl.BlockSpec((tb, D_IN_PAD), lambda i: (i, 0)),    # x batch tile
            vmem, vmem,                                        # w1, b1
            vmem, vmem,                                        # w2, b2
            vmem, vmem,                                        # w3, b3
            vmem, vmem,                                        # w4, b4 (resident)
        ]
        out_specs = pl.BlockSpec((tb, D_OUT_PAD), lambda i: (i, 0))
        dim_sem = ("parallel",)
    else:
        # v7x megacore path: N tiles lead (sharded across the 2 TCs), batch is
        # the fastest-varying axis so each core's w4/b4 tile stays resident
        # across the whole batch sweep (fetched once per call, not per step).
        grid = (num_n_tiles, n_b)
        in_specs = [
            smem,                                              # alphas
            pl.BlockSpec((tb, D_IN_PAD), lambda j, i: (i, 0)),  # x batch tile
            vmem, vmem,                                        # w1, b1
            vmem, vmem,                                        # w2, b2
            vmem, vmem,                                        # w3, b3
            pl.BlockSpec((D_H3, tn), lambda j, i: (0, j)),     # w4 N tile
            pl.BlockSpec((1, tn), lambda j, i: (0, j)),        # b4 N tile
        ]
        out_specs = pl.BlockSpec((tb, tn), lambda j, i: (i, j))
        dim_sem = ("parallel", "parallel")

    out = pl.pallas_call(
        decoder_kernel,
        out_shape=jax.ShapeDtypeStruct((b_pad, D_OUT_PAD), jnp.float32),
        grid=grid,
        in_specs=in_specs,
        out_specs=out_specs,
        compiler_params=pltpu.CompilerParams(
            dimension_semantics=dim_sem,
            vmem_limit_bytes=48 * 1024 * 1024,   # fits v7x's 64 MiB physical VMEM
        ),
        cost_estimate=cost,
    )(prep["alphas"], xp,
      prep["w1"], prep["b1"], prep["w2"], prep["b2"],
      prep["w3"], prep["b3"], prep["w4"], prep["b4"])

    # Strip batch padding and the 2800 -> 2816 lane padding.
    return out[:B, :D_OUT]


def init_params(key):
    """Deterministic synthetic parameters matching the PyTorch module shapes.
    Weights stored as (in, out) == PyTorch weight.T ; biases as (1, out)."""
    dims = [(28, 128), (128, 256), (256, 512), (512, 2800)]
    params = {}
    for idx, (d_in, d_out) in enumerate(dims, start=1):
        key, kw, kb = jax.random.split(key, 3)
        bound = 1.0 / jnp.sqrt(jnp.float32(d_in))
        params[f"w{idx}"] = jax.random.uniform(
            kw, (d_in, d_out), jnp.float32, minval=-bound, maxval=bound)
        params[f"b{idx}"] = jax.random.uniform(
            kb, (1, d_out), jnp.float32, minval=-bound, maxval=bound)
    # nn.PReLU() default: single alpha = 0.25 per layer; 3 PReLU layers.
    params["alphas"] = jnp.full((3,), 0.25, dtype=jnp.float32)
    return params


def decoder_reference(x, params):
    """Pure-JAX f32 reference for correctness checking."""
    prelu = lambda v, a: jnp.where(v >= 0, v, a * v)
    h = prelu(x @ params["w1"] + params["b1"], params["alphas"][0])
    h = prelu(h @ params["w2"] + params["b2"], params["alphas"][1])
    h = prelu(h @ params["w3"] + params["b3"], params["alphas"][2])
    return h @ params["w4"] + params["b4"]


if __name__ == "__main__":
    key = jax.random.PRNGKey(0)
    key, kx = jax.random.split(key)

    B = 16  # small demo batch; the wrapper pads it to the batch tile internally
    x = jax.random.normal(kx, (B, D_IN), dtype=jnp.float32)
    params = init_params(key)
    ref = decoder_reference(x, params)

    # 1) Exact f32 path, single N tile (matches reference tightly).
    prep_f32 = prepare_params(params, compute_dtype=jnp.float32)
    out_f32 = jax.block_until_ready(decoder_forward(x, prep_f32, num_n_tiles=1))
    assert out_f32.shape == (B, D_OUT)
    assert jnp.allclose(out_f32, ref, atol=1e-4, rtol=1e-4), "f32 path mismatch"

    # 2) bf16 fast path with auto-detected per-generation grid layout.
    prep_bf16 = prepare_params(params, compute_dtype=jnp.bfloat16)
    out_bf16 = jax.block_until_ready(decoder_forward(x, prep_bf16))
    assert out_bf16.shape == (B, D_OUT)
    assert jnp.allclose(out_bf16, ref, atol=5e-2, rtol=5e-2), "bf16 path mismatch"

    # 3) bf16, forced v7x-style layout (2 N tiles, batch innermost) with a
    #    multi-tile batch sweep to exercise w4 residency across batch steps.
    key, kx2 = jax.random.split(key)
    x2 = jax.random.normal(kx2, (40, D_IN), dtype=jnp.float32)
    ref2 = decoder_reference(x2, params)
    out2 = jax.block_until_ready(
        decoder_forward(x2, prep_bf16, tb=8, num_n_tiles=2))
    assert out2.shape == (40, D_OUT)
    assert jnp.allclose(out2, ref2, atol=5e-2, rtol=5e-2), "tiled path mismatch"

    print("KERNEL_OK")
</pallas_src>

<mosaic_0001>
module attributes {stable_mosaic.version = 11 : i64} {
  func.func @decoder_kernel(%arg0: i32, %arg1: memref<3xf32, #tpu.memory_space<smem>>, %arg2: memref<16x32xf32, #tpu.memory_space<vmem>>, %arg3: memref<32x128xf32, #tpu.memory_space<vmem>>, %arg4: memref<1x128xf32, #tpu.memory_space<vmem>>, %arg5: memref<128x256xf32, #tpu.memory_space<vmem>>, %arg6: memref<1x256xf32, #tpu.memory_space<vmem>>, %arg7: memref<256x512xf32, #tpu.memory_space<vmem>>, %arg8: memref<1x512xf32, #tpu.memory_space<vmem>>, %arg9: memref<512x2816xf32, #tpu.memory_space<vmem>>, %arg10: memref<1x2816xf32, #tpu.memory_space<vmem>>, %arg11: memref<16x2816xf32, #tpu.memory_space<vmem>>) attributes {dimension_semantics = [#tpu.dimension_semantics<parallel>], iteration_bounds = array<i64: 1>, scalar_prefetch = 0 : i64, scratch_operands = 0 : i64, tpu.core_type = #tpu.core_type<tc>, window_params = [{transform_indices = @transform_0, window_bounds = array<i64: 3>}, {transform_indices = @transform_1, window_bounds = array<i64: 16, 32>}, {pipeline_mode = #tpu.pipeline_mode<synchronous>, transform_indices = @transform_2, window_bounds = array<i64: 32, 128>}, {pipeline_mode = #tpu.pipeline_mode<synchronous>, transform_indices = @transform_3, window_bounds = array<i64: 1, 128>}, {pipeline_mode = #tpu.pipeline_mode<synchronous>, transform_indices = @transform_4, window_bounds = array<i64: 128, 256>}, {pipeline_mode = #tpu.pipeline_mode<synchronous>, transform_indices = @transform_5, window_bounds = array<i64: 1, 256>}, {pipeline_mode = #tpu.pipeline_mode<synchronous>, transform_indices = @transform_6, window_bounds = array<i64: 256, 512>}, {pipeline_mode = #tpu.pipeline_mode<synchronous>, transform_indices = @transform_7, window_bounds = array<i64: 1, 512>}, {pipeline_mode = #tpu.pipeline_mode<synchronous>, transform_indices = @transform_8, window_bounds = array<i64: 512, 2816>}, {pipeline_mode = #tpu.pipeline_mode<synchronous>, transform_indices = @transform_9, window_bounds = array<i64: 1, 2816>}, {transform_indices = @transform_10, window_bounds = array<i64: 16, 2816>}]} {
    %c0 = arith.constant 0 : index
    %0 = memref.load %arg1[%c0] : memref<3xf32, #tpu.memory_space<smem>>
    %c1 = arith.constant 1 : index
    %1 = memref.load %arg1[%c1] : memref<3xf32, #tpu.memory_space<smem>>
    %c2 = arith.constant 2 : index
    %2 = memref.load %arg1[%c2] : memref<3xf32, #tpu.memory_space<smem>>
    %c0_0 = arith.constant 0 : index
    %c0_1 = arith.constant 0 : index
    %3 = vector.load %arg2[%c0_0, %c0_1] : memref<16x32xf32, #tpu.memory_space<vmem>>, vector<16x32xf32>
    %c0_2 = arith.constant 0 : index
    %c0_3 = arith.constant 0 : index
    %4 = vector.load %arg3[%c0_2, %c0_3] : memref<32x128xf32, #tpu.memory_space<vmem>>, vector<32x128xf32>
    %cst = arith.constant dense<0.000000e+00> : vector<16x128xf32>
    %5 = tpu.matmul %3, %4, %cst {dimension_numbers = #tpu.dot_dimension_numbers<[1], [0], [0], [1], [0, 0, 1, 1], [], []>} : vector<16x32xf32>, vector<32x128xf32>, vector<16x128xf32> -> vector<16x128xf32>
    %c0_4 = arith.constant 0 : index
    %c0_5 = arith.constant 0 : index
    %6 = vector.load %arg4[%c0_4, %c0_5] : memref<1x128xf32, #tpu.memory_space<vmem>>, vector<1x128xf32>
    %7 = vector.broadcast %6 : vector<1x128xf32> to vector<16x128xf32>
    %8 = arith.addf %5, %7 : vector<16x128xf32>
    %cst_6 = arith.constant 0.000000e+00 : f32
    %9 = vector.broadcast %cst_6 : f32 to vector<16x128xf32>
    %10 = arith.cmpf oge, %8, %9 : vector<16x128xf32>
    %11 = vector.broadcast %0 : f32 to vector<16x128xf32>
    %12 = arith.mulf %11, %8 : vector<16x128xf32>
    %13 = arith.select %10, %8, %12 : vector<16x128xi1>, vector<16x128xf32>
    %c0_7 = arith.constant 0 : index
    %c0_8 = arith.constant 0 : index
    %14 = vector.load %arg5[%c0_7, %c0_8] : memref<128x256xf32, #tpu.memory_space<vmem>>, vector<128x256xf32>
    %cst_9 = arith.constant dense<0.000000e+00> : vector<16x256xf32>
    %15 = tpu.matmul %13, %14, %cst_9 {dimension_numbers = #tpu.dot_dimension_numbers<[1], [0], [0], [1], [0, 0, 1, 1], [], []>} : vector<16x128xf32>, vector<128x256xf32>, vector<16x256xf32> -> vector<16x256xf32>
    %c0_10 = arith.constant 0 : index
    %c0_11 = arith.constant 0 : index
    %16 = vector.load %arg6[%c0_10, %c0_11] : memref<1x256xf32, #tpu.memory_space<vmem>>, vector<1x256xf32>
    %17 = vector.broadcast %16 : vector<1x256xf32> to vector<16x256xf32>
    %18 = arith.addf %15, %17 : vector<16x256xf32>
    %cst_12 = arith.constant 0.000000e+00 : f32
    %19 = vector.broadcast %cst_12 : f32 to vector<16x256xf32>
    %20 = arith.cmpf oge, %18, %19 : vector<16x256xf32>
    %21 = vector.broadcast %1 : f32 to vector<16x256xf32>
    %22 = arith.mulf %21, %18 : vector<16x256xf32>
    %23 = arith.select %20, %18, %22 : vector<16x256xi1>, vector<16x256xf32>
    %c0_13 = arith.constant 0 : index
    %c0_14 = arith.constant 0 : index
    %24 = vector.load %arg7[%c0_13, %c0_14] : memref<256x512xf32, #tpu.memory_space<vmem>>, vector<256x512xf32>
    %cst_15 = arith.constant dense<0.000000e+00> : vector<16x512xf32>
    %25 = tpu.matmul %23, %24, %cst_15 {dimension_numbers = #tpu.dot_dimension_numbers<[1], [0], [0], [1], [0, 0, 1, 1], [], []>} : vector<16x256xf32>, vector<256x512xf32>, vector<16x512xf32> -> vector<16x512xf32>
    %c0_16 = arith.constant 0 : index
    %c0_17 = arith.constant 0 : index
    %26 = vector.load %arg8[%c0_16, %c0_17] : memref<1x512xf32, #tpu.memory_space<vmem>>, vector<1x512xf32>
    %27 = vector.broadcast %26 : vector<1x512xf32> to vector<16x512xf32>
    %28 = arith.addf %25, %27 : vector<16x512xf32>
    %cst_18 = arith.constant 0.000000e+00 : f32
    %29 = vector.broadcast %cst_18 : f32 to vector<16x512xf32>
    %30 = arith.cmpf oge, %28, %29 : vector<16x512xf32>
    %31 = vector.broadcast %2 : f32 to vector<16x512xf32>
    %32 = arith.mulf %31, %28 : vector<16x512xf32>
    %33 = arith.select %30, %28, %32 : vector<16x512xi1>, vector<16x512xf32>
    %c0_19 = arith.constant 0 : index
    %c0_20 = arith.constant 0 : index
    %34 = vector.load %arg9[%c0_19, %c0_20] : memref<512x2816xf32, #tpu.memory_space<vmem>>, vector<512x2816xf32>
    %cst_21 = arith.constant dense<0.000000e+00> : vector<16x2816xf32>
    %35 = tpu.matmul %33, %34, %cst_21 {dimension_numbers = #tpu.dot_dimension_numbers<[1], [0], [0], [1], [0, 0, 1, 1], [], []>} : vector<16x512xf32>, vector<512x2816xf32>, vector<16x2816xf32> -> vector<16x2816xf32>
    %c0_22 = arith.constant 0 : index
    %c0_23 = arith.constant 0 : index
    %36 = vector.load %arg10[%c0_22, %c0_23] : memref<1x2816xf32, #tpu.memory_space<vmem>>, vector<1x2816xf32>
    %37 = vector.broadcast %36 : vector<1x2816xf32> to vector<16x2816xf32>
    %38 = arith.addf %35, %37 : vector<16x2816xf32>
    %c0_24 = arith.constant 0 : index
    %c0_25 = arith.constant 0 : index
    %39 = vector.load %arg11[%c0_24, %c0_25] : memref<16x2816xf32, #tpu.memory_space<vmem>>, vector<16x2816xf32>
    tpu.vector_store %arg11[%c0_24, %c0_25], %38 {strides = array<i32>} : memref<16x2816xf32, #tpu.memory_space<vmem>>, vector<16x2816xf32>,
    return
  }
  func.func @transform_0(%arg0: i32) -> i32 {
    %c0_i32 = arith.constant 0 : i32
    %c0_i32_0 = arith.constant 0 : i32
    return %c0_i32 : i32
  }
  func.func @transform_1(%arg0: i32) -> (i32, i32) {
    %c0_i32 = arith.constant 0 : i32
    %c0_i32_0 = arith.constant 0 : i32
    return %arg0, %c0_i32 : i32, i32
  }
  func.func @transform_2(%arg0: i32) -> (i32, i32) {
    %c0_i32 = arith.constant 0 : i32
    %c0_i32_0 = arith.constant 0 : i32
    %c0_i32_1 = arith.constant 0 : i32
    return %c0_i32, %c0_i32_0 : i32, i32
  }
  func.func @transform_3(%arg0: i32) -> (i32, i32) {
    %c0_i32 = arith.constant 0 : i32
    %c0_i32_0 = arith.constant 0 : i32
    %c0_i32_1 = arith.constant 0 : i32
    return %c0_i32, %c0_i32_0 : i32, i32
  }
  func.func @transform_4(%arg0: i32) -> (i32, i32) {
    %c0_i32 = arith.constant 0 : i32
    %c0_i32_0 = arith.constant 0 : i32
    %c0_i32_1 = arith.constant 0 : i32
    return %c0_i32, %c0_i32_0 : i32, i32
  }
  func.func @transform_5(%arg0: i32) -> (i32, i32) {
    %c0_i32 = arith.constant 0 : i32
    %c0_i32_0 = arith.constant 0 : i32
    %c0_i32_1 = arith.constant 0 : i32
    return %c0_i32, %c0_i32_0 : i32, i32
  }
  func.func @transform_6(%arg0: i32) -> (i32, i32) {
    %c0_i32 = arith.constant 0 : i32
    %c0_i32_0 = arith.constant 0 : i32
    %c0_i32_1 = arith.constant 0 : i32
    return %c0_i32, %c0_i32_0 : i32, i32
  }
  func.func @transform_7(%arg0: i32) -> (i32, i32) {
    %c0_i32 = arith.constant 0 : i32
    %c0_i32_0 = arith.constant 0 : i32
    %c0_i32_1 = arith.constant 0 : i32
    return %c0_i32, %c0_i32_0 : i32, i32
  }
  func.func @transform_8(%arg0: i32) -> (i32, i32) {
    %c0_i32 = arith.constant 0 : i32
    %c0_i32_0 = arith.constant 0 : i32
    %c0_i32_1 = arith.constant 0 : i32
    return %c0_i32, %c0_i32_0 : i32, i32
  }
  func.func @transform_9(%arg0: i32) -> (i32, i32) {
    %c0_i32 = arith.constant 0 : i32
    %c0_i32_0 = arith.constant 0 : i32
    %c0_i32_1 = arith.constant 0 : i32
    return %c0_i32, %c0_i32_0 : i32, i32
  }
  func.func @transform_10(%arg0: i32) -> (i32, i32) {
    %c0_i32 = arith.constant 0 : i32
    %c0_i32_0 = arith.constant 0 : i32
    return %arg0, %c0_i32 : i32, i32
  }
}

</mosaic_0001>

<bundles_post_ra>
// kernel: tpu_custom_call.1
= control target key start
LH: loop header
LB: loop body
LE: loop exit
PB: predicated region body
PF: predicated region fallthrough
CT: control target
= control target key end

     0   :  { %15 = vsyncpa [#allocation5], 0  ;;  %s6392_s0 = inlined_call_operand.hbm [shape: f32[3], index: 0, kind: input, shape index: {}]   ;;  %s6393_s1 = inlined_call_operand.hbm [shape: f32[16,32], index: 1, kind: input, shape index: {}]   ;;  %s6394_s2 = inlined_call_operand.hbm [shape: f32[32,128], index: 2, kind: input, shape index: {}]   ;;  %s6395_s3 = inlined_call_operand.hbm [shape: f32[1,128], index: 3, kind: input, shape index: {}]   ;;  %s6396_s4 = inlined_call_operand.hbm [shape: f32[128,256], index: 4, kind: input, shape index: {}]   ;;  %s6397_s5 = inlined_call_operand.hbm [shape: f32[1,256], index: 5, kind: input, shape index: {}]   ;;  %s6398_s6 = inlined_call_operand.hbm [shape: f32[256,512], index: 6, kind: input, shape index: {}]   ;;  %s6399_s7 = inlined_call_operand.hbm [shape: f32[1,512], index: 7, kind: input, shape index: {}]   ;;  %s6400_s8 = inlined_call_operand.hbm [shape: f32[512,2816], index: 8, kind: input, shape index: {}]   ;;  %s6401_s9 = inlined_call_operand.hbm [shape: f32[1,2816], index: 9, kind: input, shape index: {}]   ;;  %s6402_s10 = inlined_call_operand.hbm [shape: f32[16,2816], index: 10, kind: output, shape index: {}]  }
   0x1   :  { %16 = vsyncpa [#allocation3], 0 }
   0x2   :  { %17 = vsyncpa [#allocation8], 0 }
   0x3   :  { %18 = vsyncpa [#allocation11], 0 }
   0x4   :  { %19 = vsyncpa [#allocation14], 0 }
   0x5   :  { %20 = vsyncpa [#allocation17], 0 }
   0x6   :  { %21 = vsyncpa [#allocation4], 0  ;;  %s5964_s13 = smov [#allocation7]   ;;  %s5965_s15 = smov [#allocation10]  }
   0x7   :  { %s47_s14 = sshll.u32 %s5964_s13, 4  ;;  %s69_s16 = sshll.u32 %s5965_s15, 4  ;;  %s48_s14 = int_to_ptr.vmem [resolvable:$true] %s47_s14  ;;  %s6039_s16 = int_to_ptr.vmem [resolvable:$true] %s69_s16 }
   0x8   :  { %s5720_s19 = scalar_lea.hbm %s6394_s2, 512 }
   0x9   :  { %p5721_p0 = scmp.ne.s32.totalorder %s6394_s2, %s5720_s19  ;;  %p5724_p1 = scmp.lt.u32.totalorder %s5720_s19, %s6394_s2 }
   0xb   :  { %p5726_p2 = pnand %p5724_p1, %p5721_p0 }
   0xd   :  { %5729 = shalt.err (!%p5726_p2)
}
   0xe   :  { %s5730_s24 = scalar_lea.vmem %s48_s14, 512  ;;  %p5735_p4 = scmp.lt.s32.totalorder %s48_s14, %s48_s14 }
   0xf   :  { %p5731_p3 = scmp.ne.s32.totalorder %s48_s14, %s5730_s24  ;;  %p5736_p5 = scmp.lt.s32.totalorder %s5730_s24, %s5730_s24 }
  0x11   :  { %p5737_p6 = por %p5736_p5, %p5735_p4 }
  0x13   :  { %p5738_p7 = pnand %p5737_p6, %p5731_p3 }
  0x15   :  { %5741 = shalt.err (!%p5738_p7)
}
  0x16   :  { %s5966_s25 = smov 128   ;;  %s5967_s26 = smov 8  }
  0x17   :  { %53 = dma.hbm_to_vmem [thread:$0]  %s6394_s2, 512, %s48_s14, [#allocation8], %s5966_s25, %s5966_s25, %s5967_s26  }
  0x18   :  { %s5742_s11 = scalar_lea.hbm %s6396_s4, 4096 }
  0x19   :  { %p5743_p8 = scmp.ne.s32.totalorder %s6396_s4, %s5742_s11  ;;  %p5746_p9 = scmp.lt.u32.totalorder %s5742_s11, %s6396_s4 }
  0x1b   :  { %p5748_p10 = pnand %p5746_p9, %p5743_p8 }
  0x1d   :  { %5751 = shalt.err (!%p5748_p10)
}
  0x1e   :  { %s5752_s18 = scalar_lea.vmem %s6039_s16, 4096  ;;  %p5757_p12 = scmp.lt.s32.totalorder %s6039_s16, %s6039_s16 }
  0x1f   :  { %p5753_p11 = scmp.ne.s32.totalorder %s6039_s16, %s5752_s18  ;;  %p5758_p13 = scmp.lt.s32.totalorder %s5752_s18, %s5752_s18 }
  0x21   :  { %p5759_p0 = por %p5758_p13, %p5757_p12 }
  0x23   :  { %p5760_p1 = pnand %p5759_p0, %p5753_p11 }
  0x25   :  { %5763 = shalt.err (!%p5760_p1)
}
  0x26   :  { %s5968_s2 = smov 256   ;;  %s5969_s14 = smov 16  }
  0x27   :  { %75 = dma.hbm_to_vmem [thread:$0]  %s6396_s4, 4096, %s6039_s16, [#allocation11], %s5968_s2, %s5968_s2, %s5969_s14  }
  0x28   :  { %s5970_s21 = smov [#allocation13]   ;;  %s5764_s27 = scalar_lea.hbm %s6398_s6, 16384 }
  0x29   :  { %s91_s22 = sshll.u32 %s5970_s21, 4  ;;  %p5765_p2 = scmp.ne.s32.totalorder %s6398_s6, %s5764_s27  ;;  %s92_s22 = int_to_ptr.vmem [resolvable:$true] %s91_s22 }
  0x2a   :  { %p5768_p3 = scmp.lt.u32.totalorder %s5764_s27, %s6398_s6 }
  0x2c   :  { %p5770_p4 = pnand %p5768_p3, %p5765_p2 }
  0x2e   :  { %5773 = shalt.err (!%p5770_p4)
}
  0x2f   :  { %s5774_s12 = scalar_lea.vmem %s92_s22, 16384  ;;  %p5779_p6 = scmp.lt.s32.totalorder %s92_s22, %s92_s22 }
  0x30   :  { %p5775_p5 = scmp.ne.s32.totalorder %s92_s22, %s5774_s12  ;;  %p5780_p7 = scmp.lt.s32.totalorder %s5774_s12, %s5774_s12 }
  0x32   :  { %p5781_p8 = por %p5780_p7, %p5779_p6 }
  0x34   :  { %p5782_p9 = pnand %p5781_p8, %p5775_p5 }
  0x36   :  { %5785 = shalt.err (!%p5782_p9)
}
  0x37   :  { %s5971_s4 = smov 512   ;;  %s5972_s16 = smov 32  }
  0x38   :  { %97 = dma.hbm_to_vmem [thread:$0]  %s6398_s6, 16384, %s92_s22, [#allocation14], %s5971_s4, %s5971_s4, %s5972_s16  }
  0x39   :  { %s5973_s17 = smov [#allocation16]   ;;  %s5786_s19 = scalar_lea.hbm %s6400_s8, 180224 }
  0x3a   :  { %s113_s18 = sshll.u32 %s5973_s17, 4  ;;  %p5787_p10 = scmp.ne.s32.totalorder %s6400_s8, %s5786_s19  ;;  %s114_s18 = int_to_ptr.vmem [resolvable:$true] %s113_s18 }
  0x3b   :  { %p5790_p11 = scmp.lt.u32.totalorder %s5786_s19, %s6400_s8 }
  0x3d   :  { %p5792_p12 = pnand %p5790_p11, %p5787_p10 }
  0x3f   :  { %5795 = shalt.err (!%p5792_p12)
}
  0x40   :  { %s5796_s27 = scalar_lea.vmem %s114_s18, 180224  ;;  %p5801_p0 = scmp.lt.s32.totalorder %s114_s18, %s114_s18 }
  0x41   :  { %p5797_p13 = scmp.ne.s32.totalorder %s114_s18, %s5796_s27  ;;  %p5802_p1 = scmp.lt.s32.totalorder %s5796_s27, %s5796_s27 }
  0x43   :  { %p5803_p2 = por %p5802_p1, %p5801_p0 }
  0x45   :  { %p5804_p3 = pnand %p5803_p2, %p5797_p13 }
  0x47   :  { %5807 = shalt.err (!%p5804_p3)
}
  0x48   :  { %s5974_s6 = smov 2816   ;;  %s5975_s22 = smov 176  }
  0x49   :  { %119 = dma.hbm_to_vmem [thread:$0]  %s6400_s8, 180224, %s114_s18, [#allocation17], %s5974_s6, %s5974_s6, %s5975_s22  }
  0x4a   :  { %s5808_s12 = scalar_lea.hbm %s6392_s0, 16 }
  0x4b   :  { %p5809_p4 = scmp.ne.s32.totalorder %s6392_s0, %s5808_s12  ;;  %p5812_p5 = scmp.lt.u32.totalorder %s5808_s12, %s6392_s0 }
  0x4d   :  { %p5814_p6 = pnand %p5812_p5, %p5809_p4 }
  0x4f   :  { %5817 = shalt.err (!%p5814_p6)
}
  0x50   :  { %s5976_s17 = smov [#allocation2]   ;;  %s5977_s8 = smov [#allocation6]  }
  0x51   :  { %29 = dma.hbm_to_smem %s6392_s0, 16, %s5976_s17, [#allocation5]  }
  0x52   :  { %s35_s18 = sshll.u32 %s5977_s8, 4  ;;  %s5978_s19 = smov [#allocation9]   ;;  %s36_s18 = int_to_ptr.vmem [resolvable:$true] %s35_s18 }
  0x53   :  { %s60_s20 = sshll.u32 %s5978_s19, 4  ;;  %s5818_s24 = scalar_lea.hbm %s6393_s1, 256  ;;  %s61_s20 = int_to_ptr.vmem [resolvable:$true] %s60_s20 }
  0x54   :  { %p5819_p7 = scmp.ne.s32.totalorder %s6393_s1, %s5818_s24  ;;  %p5822_p8 = scmp.lt.u32.totalorder %s5818_s24, %s6393_s1 }
  0x56   :  { %p5824_p9 = pnand %p5822_p8, %p5819_p7 }
  0x58   :  { %5827 = shalt.err (!%p5824_p9)
}
  0x59   :  { %s5828_s0 = scalar_lea.vmem %s36_s18, 256  ;;  %p5833_p11 = scmp.lt.s32.totalorder %s36_s18, %s36_s18 }
  0x5a   :  { %p5829_p10 = scmp.ne.s32.totalorder %s36_s18, %s5828_s0  ;;  %p5834_p12 = scmp.lt.s32.totalorder %s5828_s0, %s5828_s0 }
  0x5c   :  { %p5835_p13 = por %p5834_p12, %p5833_p11 }
  0x5e   :  { %p5836_p0 = pnand %p5835_p13, %p5829_p10 }
  0x60   :  { %5839 = shalt.err (!%p5836_p0)
}
  0x61   :  { %41 = dma.hbm_to_vmem [thread:$0]  %s6393_s1, 256, %s36_s18, [#allocation3], %s5966_s25, %s5966_s25, %s5967_s26  }
  0x62   :  { %s5840_s13 = scalar_lea.hbm %s6395_s3, 16 }
  0x63   :  { %p5841_p1 = scmp.ne.s32.totalorder %s6395_s3, %s5840_s13  ;;  %p5844_p2 = scmp.lt.u32.totalorder %s5840_s13, %s6395_s3 }
  0x65   :  { %p5846_p3 = pnand %p5844_p2, %p5841_p1 }
  0x67   :  { %5849 = shalt.err (!%p5846_p3)
}
  0x68   :  { %s5850_s8 = scalar_lea.vmem %s61_s20, 16  ;;  %s5854_s19 = scalar_lea.vmem %s61_s20, 32 }
  0x69   :  { %p5851_p4 = scmp.ne.s32.totalorder %s61_s20, %s5850_s8  ;;  %p5855_p5 = scmp.lt.s32.totalorder %s61_s20, %s61_s20 }
  0x6a   :  { %p5856_p6 = scmp.lt.s32.totalorder %s5854_s19, %s5850_s8 }
  0x6c   :  { %p5857_p7 = por %p5856_p6, %p5855_p5 }
  0x6e   :  { %p5858_p8 = pnand %p5857_p7, %p5851_p4 }
  0x70   :  { %5861 = shalt.err (!%p5858_p8)
}
  0x71   :  { %63 = dma.hbm_to_vmem [thread:$0]  %s6395_s3, 16, %s61_s20, [#allocation8]  }
  0x72   :  { %s5979_s26 = smov [#allocation12]   ;;  %s5980_s21 = smov [#allocation15]  }
  0x73   :  { %s82_s18 = sshll.u32 %s5979_s26, 4  ;;  %s104_s23 = sshll.u32 %s5980_s21, 4  ;;  %s83_s18 = int_to_ptr.vmem [resolvable:$true] %s82_s18  ;;  %s105_s23 = int_to_ptr.vmem [resolvable:$true] %s104_s23 }
  0x74   :  { %s5862_s28 = scalar_lea.hbm %s6397_s5, 32 }
  0x75   :  { %p5863_p9 = scmp.ne.s32.totalorder %s6397_s5, %s5862_s28  ;;  %p5866_p10 = scmp.lt.u32.totalorder %s5862_s28, %s6397_s5 }
  0x77   :  { %p5868_p11 = pnand %p5866_p10, %p5863_p9 }
  0x79   :  { %5871 = shalt.err (!%p5868_p11)
}
  0x7a   :  { %s5872_s3 = scalar_lea.vmem %s83_s18, 32  ;;  %p5877_p13 = scmp.lt.s32.totalorder %s83_s18, %s83_s18 }
  0x7b   :  { %p5873_p12 = scmp.ne.s32.totalorder %s83_s18, %s5872_s3  ;;  %p5878_p0 = scmp.lt.s32.totalorder %s5872_s3, %s5872_s3 }
  0x7d   :  { %p5879_p1 = por %p5878_p0, %p5877_p13 }
  0x7f   :  { %p5880_p2 = pnand %p5879_p1, %p5873_p12 }
  0x81   :  { %5883 = shalt.err (!%p5880_p2)
}
  0x82   :  { %85 = dma.hbm_to_vmem [thread:$0]  %s6397_s5, 32, %s83_s18, [#allocation11]  }
  0x83   :  { %s5884_s13 = scalar_lea.hbm %s6399_s7, 64 }
  0x84   :  { %p5885_p3 = scmp.ne.s32.totalorder %s6399_s7, %s5884_s13  ;;  %p5888_p4 = scmp.lt.u32.totalorder %s5884_s13, %s6399_s7 }
  0x86   :  { %p5890_p5 = pnand %p5888_p4, %p5885_p3 }
  0x88   :  { %5893 = shalt.err (!%p5890_p5)
}
  0x89   :  { %s5894_s8 = scalar_lea.vmem %s105_s23, 64  ;;  %p5899_p7 = scmp.lt.s32.totalorder %s105_s23, %s105_s23 }
  0x8a   :  { %p5895_p6 = scmp.ne.s32.totalorder %s105_s23, %s5894_s8  ;;  %p5900_p8 = scmp.lt.s32.totalorder %s5894_s8, %s5894_s8 }
  0x8c   :  { %p5901_p9 = por %p5900_p8, %p5899_p7 }
  0x8e   :  { %p5902_p10 = pnand %p5901_p9, %p5895_p6 }
  0x90   :  { %5905 = shalt.err (!%p5902_p10)
}
  0x91   :  { %107 = dma.hbm_to_vmem [thread:$0]  %s6399_s7, 64, %s105_s23, [#allocation14]  }
  0x92   :  { %s5981_s1 = smov [#allocation18]   ;;  %s5906_s21 = scalar_lea.hbm %s6401_s9, 352 }
  0x93   :  { %s126_s25 = sshll.u32 %s5981_s1, 4  ;;  %p5907_p11 = scmp.ne.s32.totalorder %s6401_s9, %s5906_s21  ;;  %s127_s25 = int_to_ptr.vmem [resolvable:$true] %s126_s25 }
  0x94   :  { %p5910_p12 = scmp.lt.u32.totalorder %s5906_s21, %s6401_s9 }
  0x96   :  { %p5912_p13 = pnand %p5910_p12, %p5907_p11 }
  0x98   :  { %5915 = shalt.err (!%p5912_p13)
}
  0x99   :  { %s5916_s30 = scalar_lea.vmem %s127_s25, 352  ;;  %p5921_p1 = scmp.lt.s32.totalorder %s127_s25, %s127_s25 }
  0x9a   :  { %p5917_p0 = scmp.ne.s32.totalorder %s127_s25, %s5916_s30  ;;  %p5922_p2 = scmp.lt.s32.totalorder %s5916_s30, %s5916_s30 }
  0x9c   :  { %p5923_p3 = por %p5922_p2, %p5921_p1 }
  0x9e   :  { %p5924_p4 = pnand %p5923_p3, %p5917_p0 }
  0xa0   :  { %5927 = shalt.err (!%p5924_p4)
}
  0xa1   :  { %129 = dma.hbm_to_vmem [thread:$0]  %s6401_s9, 352, %s127_s25, [#allocation17]  }
  0xa2   :  { %5950 = dma.done.wait [#allocation5], 16  }
  0xa3   :  { %5951 = vsyncadd [#allocation5], 4294967280 }
  0xa4   :  { %5952 = dma.done.wait [#allocation3], 256  }
  0xa5   :  { %5953 = vsyncadd [#allocation3], 4294967040 }
  0xa6   :  { %5954 = dma.done.wait [#allocation8], 528  }
  0xa7   :  { %5955 = vsyncadd [#allocation8], 4294966768 }
  0xa8   :  { %5956 = dma.done.wait [#allocation11], 4128  }
  0xa9   :  { %5957 = vsyncadd [#allocation11], 4294963168 }
  0xaa   :  { %5958 = dma.done.wait [#allocation14], 16448  }
  0xab   :  { %5959 = vsyncadd [#allocation14], 4294950848 }
  0xac   :  { %5960 = dma.done.wait [#allocation17], 180576  }
  0xad   :  { %5961 = vsyncadd [#allocation17], 4294786720 }
  0xae   :  { %160 = sfence }
  0xaf   :  { %v166_v0 = vld [vmem:[#allocation7] sm:$0xff]  ;;  %v167_v1 = vld [vmem:[#allocation7 + $0x8] sm:$0xff]  ;;  %v168_v2 = vld [vmem:[#allocation7 + $0x10] sm:$0xff]  ;;  %vm177_vm0 = vcmask 261120   ;;  %v5982_v56 = vmov 0.0   ;;  %s161_s9 = sld [smem:[#allocation2]] }
  0xb0   :  { %v4035_v3 = vpack.c.bf16 %v167_v1, %v166_v0  ;;  %v169_v4 = vld [vmem:[#allocation7 + $0x18] sm:$0xff]  ;;  %v164_v5 = vld [vmem:[#allocation6] sm:$0xff]  ;;  %v266_v9 = vld [vmem:[#allocation10] sm:$0xff]  ;;  %374 = vmatprep.mubr.f32.mxu1 %v5982_v56  ;;  %s4013_s0 = sld [smem:[#allocation2 + $0x1]]  ;;  %s4014_s11 = sld [smem:[#allocation2 + $0x2]] }
  0xb1   :  { %v4039_v6 = vpack.c.bf16 %v169_v4, %v168_v2  ;;  %4032 = vmatprep.mubr.msk.f32.mxu0 %vm177_vm0, %v164_v5  ;;  %v267_v7 = vld [vmem:[#allocation10 + $0x8] sm:$0xff]  ;;  %v269_v8 = vld [vmem:[#allocation10 + $0x18] sm:$0xff]  ;;  %v268_v11 = vld [vmem:[#allocation10 + $0x10] sm:$0xff]  ;;  %s5983_s3 = smov [#allocation19]  }
  0xb2   :  { %4036 = vmatprep.subr.bf16.mxu0 %v4035_v3  ;;  %v4043_v10 = vpack.c.bf16 %v269_v8, %v267_v7  ;;  %v271_v12 = vld [vmem:[#allocation10 + $0x28] sm:$0xff]  ;;  %v273_v13 = vld [vmem:[#allocation10 + $0x38] sm:$0xff]  ;;  %v4045_v14 = vpack.c.bf16 %v268_v11, %v266_v9  ;;  %v270_v16 = vld [vmem:[#allocation10 + $0x20] sm:$0xff]  ;;  %s3996_s20 = sshll.u32 %s5983_s3, 4  ;;  %s3997_s20 = int_to_ptr.vmem [resolvable:$true] %s3996_s20 }
  0xb3   :  { %4038 = vmatpush3.bf16.msra.mxu0 %v4035_v3  ;;  %v4047_v15 = vpack.c.bf16 %v273_v13, %v271_v12  ;;  %v272_v17 = vld [vmem:[#allocation10 + $0x30] sm:$0xff]  ;;  %v275_v18 = vld [vmem:[#allocation10 + $0x48] sm:$0xff]  ;;  %v277_v19 = vld [vmem:[#allocation10 + $0x58] sm:$0xff]  ;;  %s5928_s12 = scalar_lea.vmem %s3997_s20, 5632  ;;  %p5933_p6 = scmp.lt.s32.totalorder %s3997_s20, %s3997_s20 }
  0xb4   :  { %4040 = vmatprep.subr.bf16.mxu0 %v4039_v6  ;;  %4044 = vmatprep.subr.bf16.mxu1 %v4043_v10  ;;  %v4049_v20 = vpack.c.bf16 %v272_v17, %v270_v16  ;;  %v4051_v21 = vpack.c.bf16 %v277_v19, %v275_v18  ;;  %v274_v22 = vld [vmem:[#allocation10 + $0x40] sm:$0xff]  ;;  %v276_v23 = vld [vmem:[#allocation10 + $0x50] sm:$0xff]  ;;  %v279_v25 = vld [vmem:[#allocation10 + $0x68] sm:$0xff]  ;;  %p5929_p5 = scmp.ne.s32.totalorder %s3997_s20, %s5928_s12  ;;  %p5934_p7 = scmp.lt.s32.totalorder %s5928_s12, %s5928_s12 }
  0xb5   :  { %4046 = vmatpush1.bf16.msra.mxu1 %v4045_v14  ;;  %v165_v24 = vld [vmem:[#allocation6 + $0x8] sm:$0xff]  ;;  %v4053_v27 = vpack.c.bf16 %v276_v23, %v274_v22  ;;  %v278_v29 = vld [vmem:[#allocation10 + $0x60] sm:$0xff]  ;;  %v283_v31 = vld [vmem:[#allocation10 + $0x88] sm:$0xff]  ;;  %v261_v62 = vstv %s161_s9 }
  0xb6   :  { %4048 = vmatprep.subr.bf16.mxu1 %v4047_v15  ;;  %v281_v26 = vld [vmem:[#allocation10 + $0x78] sm:$0xff]  ;;  %v280_v30 = vld [vmem:[#allocation10 + $0x70] sm:$0xff]  ;;  %v282_v35 = vld [vmem:[#allocation10 + $0x80] sm:$0xff]  ;;  %p5935_p8 = por %p5934_p7, %p5933_p6 }
  0xb7   :  { %4042 = vmatpush3.bf16.msra.mxu0 %v4039_v6  ;;  %v4055_v28 = vpack.c.bf16 %v281_v26, %v279_v25  ;;  %v285_v32 = vld [vmem:[#allocation10 + $0x98] sm:$0xff]  ;;  %v4057_v33 = vpack.c.bf16 %v280_v30, %v278_v29  ;;  %v284_v36 = vld [vmem:[#allocation10 + $0x90] sm:$0xff]  ;;  %v287_v37 = vld [vmem:[#allocation10 + $0xa8] sm:$0xff] }
  0xb8   :  { %v4059_v34 = vpack.c.bf16 %v285_v32, %v283_v31  ;;  %v289_v38 = vld [vmem:[#allocation10 + $0xb8] sm:$0xff]  ;;  %v4061_v39 = vpack.c.bf16 %v284_v36, %v282_v35  ;;  %v286_v41 = vld [vmem:[#allocation10 + $0xa0] sm:$0xff]  ;;  %v288_v42 = vld [vmem:[#allocation10 + $0xb0] sm:$0xff]  ;;  %p5936_p9 = pnand %p5935_p8, %p5929_p5 }
  0xb9   :  { %4050 = vmatpush1.bf16.msra.mxu1 %v4049_v20  ;;  %v4063_v40 = vpack.c.bf16 %v289_v38, %v287_v37  ;;  %v291_v43 = vld [vmem:[#allocation10 + $0xc8] sm:$0xff]  ;;  %v293_v44 = vld [vmem:[#allocation10 + $0xd8] sm:$0xff]  ;;  %v4065_v45 = vpack.c.bf16 %v288_v42, %v286_v41  ;;  %v290_v47 = vld [vmem:[#allocation10 + $0xc0] sm:$0xff] }
  0xba   :  { %4033 = vmatmul.mubr.msk.f32.vlgmr.msra.gmra.mrb[0].mxu0 %vm177_vm0, %v165_v24  ;;  %4052 = vmatprep.subr.bf16.mxu1 %v4051_v21  ;;  %v4067_v46 = vpack.c.bf16 %v293_v44, %v291_v43  ;;  %v292_v48 = vld [vmem:[#allocation10 + $0xd0] sm:$0xff]  ;;  %v295_v50 = vld [vmem:[#allocation10 + $0xe8] sm:$0xff]  ;;  %v297_v51 = vld [vmem:[#allocation10 + $0xf8] sm:$0xff] }
  0xbb   :  { %v4069_v49 = vpack.c.bf16 %v292_v48, %v290_v47  ;;  %v4071_v52 = vpack.c.bf16 %v297_v51, %v295_v50  ;;  %v294_v53 = vld [vmem:[#allocation10 + $0xe0] sm:$0xff]  ;;  %v296_v54 = vld [vmem:[#allocation10 + $0xf0] sm:$0xff]  ;;  %v4015_v60 = vld [vmem:[#allocation9] ss:$0 sm:$0xff] }
  0xbc   :  { %v4073_v55 = vpack.c.bf16 %v296_v54, %v294_v53  ;;  %v401_v57 = vld [vmem:[#allocation13 + $0x8] sm:$0xff]  ;;  %v400_v0 = vld [vmem:[#allocation13] sm:$0xff] }
  0xbd   :  { %4054 = vmatpush1.bf16.msra.mxu1 %v4053_v27  ;;  %v405_v58 = vld [vmem:[#allocation13 + $0x28] sm:$0xff]  ;;  %v404_v1 = vld [vmem:[#allocation13 + $0x20] sm:$0xff] }
  0xbe   :  { %4056 = vmatprep.subr.bf16.mxu1 %v4055_v28  ;;  %v4075_v59 = vpack.c.bf16 %v405_v58, %v401_v57  ;;  %v409_v4 = vld [vmem:[#allocation13 + $0x48] sm:$0xff]  ;;  %v4077_v7 = vpack.c.bf16 %v404_v1, %v400_v0  ;;  %v408_v9 = vld [vmem:[#allocation13 + $0x40] sm:$0xff] }
  0xbf   :  { %v413_v5 = vld [vmem:[#allocation13 + $0x68] sm:$0xff]  ;;  %v412_v10 = vld [vmem:[#allocation13 + $0x60] sm:$0xff] }
  0xc0   :  { %v4079_v8 = vpack.c.bf16 %v413_v5, %v409_v4  ;;  %v417_v13 = vld [vmem:[#allocation13 + $0x88] sm:$0xff]  ;;  %v4081_v15 = vpack.c.bf16 %v412_v10, %v408_v9  ;;  %v416_v17 = vld [vmem:[#allocation13 + $0x80] sm:$0xff] }
  0xc1   :  { %4058 = vmatpush1.bf16.msra.mxu1 %v4057_v33  ;;  %v421_v14 = vld [vmem:[#allocation13 + $0xa8] sm:$0xff]  ;;  %v420_v18 = vld [vmem:[#allocation13 + $0xa0] sm:$0xff] }
  0xc2   :  { %4060 = vmatprep.subr.bf16.mxu1 %v4059_v34  ;;  %v4083_v16 = vpack.c.bf16 %v421_v14, %v417_v13  ;;  %v425_v20 = vld [vmem:[#allocation13 + $0xc8] sm:$0xff]  ;;  %v4085_v22 = vpack.c.bf16 %v420_v18, %v416_v17  ;;  %v424_v24 = vld [vmem:[#allocation13 + $0xc0] sm:$0xff] }
  0xc3   :  { %v429_v21 = vld [vmem:[#allocation13 + $0xe8] sm:$0xff]  ;;  %v428_v25 = vld [vmem:[#allocation13 + $0xe0] sm:$0xff] }
  0xc4   :  { %v4087_v23 = vpack.c.bf16 %v429_v21, %v425_v20  ;;  %v433_v26 = vld [vmem:[#allocation13 + $0x108] sm:$0xff]  ;;  %v4089_v28 = vpack.c.bf16 %v428_v25, %v424_v24  ;;  %v432_v30 = vld [vmem:[#allocation13 + $0x100] sm:$0xff] }
  0xc5   :  { %4062 = vmatpush1.bf16.msra.mxu1 %v4061_v39  ;;  %v437_v27 = vld [vmem:[#allocation13 + $0x128] sm:$0xff]  ;;  %v436_v31 = vld [vmem:[#allocation13 + $0x120] sm:$0xff] }
  0xc6   :  { %4064 = vmatprep.subr.bf16.mxu1 %v4063_v40  ;;  %v4091_v29 = vpack.c.bf16 %v437_v27, %v433_v26  ;;  %v441_v32 = vld [vmem:[#allocation13 + $0x148] sm:$0xff]  ;;  %v4093_v34 = vpack.c.bf16 %v436_v31, %v432_v30  ;;  %v440_v36 = vld [vmem:[#allocation13 + $0x140] sm:$0xff] }
  0xc7   :  { %v445_v33 = vld [vmem:[#allocation13 + $0x168] sm:$0xff]  ;;  %v444_v37 = vld [vmem:[#allocation13 + $0x160] sm:$0xff] }
  0xc8   :  { %v4095_v35 = vpack.c.bf16 %v445_v33, %v441_v32  ;;  %v449_v38 = vld [vmem:[#allocation13 + $0x188] sm:$0xff]  ;;  %v4097_v40 = vpack.c.bf16 %v444_v37, %v440_v36  ;;  %v448_v42 = vld [vmem:[#allocation13 + $0x180] sm:$0xff]  ;;  %v407_v36 = vld [vmem:[#allocation13 + $0x38] sm:$0xff] }
  0xc9   :  { %4066 = vmatpush1.bf16.msra.mxu1 %v4065_v45  ;;  %v453_v39 = vld [vmem:[#allocation13 + $0x1a8] sm:$0xff]  ;;  %v452_v43 = vld [vmem:[#allocation13 + $0x1a0] sm:$0xff] }
  0xca   :  { %4068 = vmatprep.subr.bf16.mxu1 %v4067_v46  ;;  %v4099_v41 = vpack.c.bf16 %v453_v39, %v449_v38  ;;  %v457_v44 = vld [vmem:[#allocation13 + $0x1c8] sm:$0xff]  ;;  %v4101_v46 = vpack.c.bf16 %v452_v43, %v448_v42  ;;  %v456_v48 = vld [vmem:[#allocation13 + $0x1c0] sm:$0xff]  ;;  %v751_v42 = vld [vmem:[#allocation16 + $0xb0] sm:$0xff] }
  0xcb   :  { %v461_v45 = vld [vmem:[#allocation13 + $0x1e8] sm:$0xff]  ;;  %v464_v54 = vld [vmem:[#allocation13 + $0x200] sm:$0xff] }
  0xcc   :  { %v4103_v47 = vpack.c.bf16 %v461_v45, %v457_v44  ;;  %v465_v50 = vld [vmem:[#allocation13 + $0x208] sm:$0xff]  ;;  %v492_v9 = vld [vmem:[#allocation13 + $0x2e0] sm:$0xff] }
  0xcd   :  { %4070 = vmatpush1.bf16.msra.mxu1 %v4069_v49  ;;  %v460_v49 = vld [vmem:[#allocation13 + $0x1e0] sm:$0xff]  ;;  %v469_v51 = vld [vmem:[#allocation13 + $0x228] sm:$0xff] }
  0xce   :  { %4072 = vmatprep.subr.bf16.mxu1 %v4071_v52  ;;  %v4105_v52 = vpack.c.bf16 %v460_v49, %v456_v48  ;;  %v4107_v53 = vpack.c.bf16 %v469_v51, %v465_v50  ;;  %v477_v57 = vld [vmem:[#allocation13 + $0x268] sm:$0xff]  ;;  %v496_v14 = vld [vmem:[#allocation13 + $0x300] sm:$0xff]  ;;  %v795_v48 = vld [vmem:[#allocation16 + $0x210] sm:$0xff] }
  0xcf   :  { %v489_v4 = vld [vmem:[#allocation13 + $0x2c8] sm:$0xff]  ;;  %v504_v20 = vld [vmem:[#allocation13 + $0x340] sm:$0xff] }
  0xd0   :  { %v493_v5 = vld [vmem:[#allocation13 + $0x2e8] sm:$0xff]  ;;  %v508_v21 = vld [vmem:[#allocation13 + $0x360] sm:$0xff] }
  0xd1   :  { %4074 = vmatpush1.bf16.msra.mxu1 %v4073_v55  ;;  %v468_v55 = vld [vmem:[#allocation13 + $0x220] sm:$0xff]  ;;  %v497_v10 = vld [vmem:[#allocation13 + $0x308] sm:$0xff]  ;;  %v4129_v24 = vpack.c.bf16 %v508_v21, %v504_v20  ;;  %v1059_v20 = vld [vmem:[#allocation16 + $0xa50] sm:$0xff] }
  0xd2   :  { %4076 = vmatprep.subr.bf16.mxu1 %v4075_v59  ;;  %v4109_v58 = vpack.c.bf16 %v468_v55, %v464_v54  ;;  %v509_v17 = vld [vmem:[#allocation13 + $0x368] sm:$0xff]  ;;  %v512_v26 = vld [vmem:[#allocation13 + $0x380] sm:$0xff]  ;;  %v839_v54 = vld [vmem:[#allocation16 + $0x370] sm:$0xff] }
  0xd3   :  { %v516_v27 = vld [vmem:[#allocation13 + $0x3a0] sm:$0xff]  ;;  %v525_v30 = vld [vmem:[#allocation13 + $0x3e8] sm:$0xff] }
  0xd4   :  { %v520_v32 = vld [vmem:[#allocation13 + $0x3c0] sm:$0xff]  ;;  %v730_v38 = vld [vmem:[#allocation16 + $0x8] sm:$0xff] }
  0xd5   :  { %v524_v33 = vld [vmem:[#allocation13 + $0x3e0] sm:$0xff]  ;;  %v774_v44 = vld [vmem:[#allocation16 + $0x168] sm:$0xff] }
  0xd6   :  { %v752_v39 = vld [vmem:[#allocation16 + $0xb8] sm:$0xff]  ;;  %v818_v50 = vld [vmem:[#allocation16 + $0x2c8] sm:$0xff] }
  0xd7   :  { %v796_v45 = vld [vmem:[#allocation16 + $0x218] sm:$0xff]  ;;  %v1082_v21 = vld [vmem:[#allocation16 + $0xb08] sm:$0xff] }
  0xd8   :  { %v840_v51 = vld [vmem:[#allocation16 + $0x378] sm:$0xff] }
 0x18d   :  { %v4034_v61 = vpop.f32.mrb[0].mxu0 }
 0x18e   :  { %v250_v63 = vpop.f32.mrb[1].mxu0  ;;  %v256_v2 = vadd.f32 %v4034_v61, %v4015_v60  ;;  %v476_v61 = vld [vmem:[#allocation13 + $0x260] sm:$0xff] }
 0x18f   :  { %v251_v3 = vadd.f32 %v4015_v60, %v250_v63  ;;  %v472_v60 = vld [vmem:[#allocation13 + $0x240] sm:$0xff]  ;;  %v485_v63 = vld [vmem:[#allocation13 + $0x2a8] sm:$0xff] }
 0x190   :  { %v263_v11 = vmul.f32 %v261_v62, %v256_v2  ;;  %vm260_vm2 = vcmp.ge.f32.partialorder %v256_v2, 0.0  ;;  %v4113_v0 = vpack.c.bf16 %v476_v61, %v472_v60  ;;  %v883_v60 = vld [vmem:[#allocation16 + $0x4d0] sm:$0xff]  ;;  %v906_v61 = vld [vmem:[#allocation16 + $0x588] sm:$0xff] }
 0x191   :  { %v262_v6 = vmul.f32 %v261_v62, %v251_v3  ;;  %vm259_vm1 = vcmp.ge.f32.partialorder %v251_v3, 0.0  ;;  %v481_v62 = vld [vmem:[#allocation13 + $0x288] sm:$0xff] }
 0x192   :  { %v265_v19 = vsel %vm260_vm2, %v256_v2, %v263_v11  ;;  %v4115_v1 = vpack.c.bf16 %v485_v63, %v481_v62  ;;  %v480_v2 = vld [vmem:[#allocation13 + $0x280] sm:$0xff]  ;;  %v501_v11 = vld [vmem:[#allocation13 + $0x328] sm:$0xff] }
 0x193   :  { %v264_v12 = vsel %vm259_vm1, %v251_v3, %v262_v6  ;;  %v484_v3 = vld [vmem:[#allocation13 + $0x2a0] sm:$0xff]  ;;  %v4123_v13 = vpack.c.bf16 %v501_v11, %v497_v10 }
 0x194   :  { %375 = vmatmul.mubr.f32.vlgmr.msra.gmra.mrb[0].mxu1 %v264_v12  ;;  %v4117_v6 = vpack.c.bf16 %v484_v3, %v480_v2  ;;  %v928_v62 = vld [vmem:[#allocation16 + $0x638] sm:$0xff]  ;;  %v927_v2 = vld [vmem:[#allocation16 + $0x630] sm:$0xff]  ;;  %v950_v3 = vld [vmem:[#allocation16 + $0x6e8] sm:$0xff] }
 0x195   :  { %380 = vmatprep.mubr.f32.mxu1 %v5982_v56  ;;  %4078 = vmatpush1.bf16.msra.mxu1 %v4077_v7  ;;  %v473_v56 = vld [vmem:[#allocation13 + $0x248] sm:$0xff]  ;;  %v4119_v7 = vpack.c.bf16 %v493_v5, %v489_v4  ;;  %v972_v4 = vld [vmem:[#allocation16 + $0x798] sm:$0xff] }
 0x196   :  { %4080 = vmatprep.subr.bf16.mxu1 %v4079_v8  ;;  %v4111_v59 = vpack.c.bf16 %v477_v57, %v473_v56  ;;  %v488_v8 = vld [vmem:[#allocation13 + $0x2c0] sm:$0xff]  ;;  %v862_v56 = vld [vmem:[#allocation16 + $0x428] sm:$0xff] }
 0x197   :  { %v4121_v12 = vpack.c.bf16 %v492_v9, %v488_v8  ;;  %v884_v57 = vld [vmem:[#allocation16 + $0x4d8] sm:$0xff]  ;;  %v971_v8 = vld [vmem:[#allocation16 + $0x790] sm:$0xff]  ;;  %v994_v9 = vld [vmem:[#allocation16 + $0x848] sm:$0xff] }
 0x198   :  { %381 = vmatmul.mubr.f32.gmra.mrb[2].mxu1 %v265_v19  ;;  %v1016_v10 = vld [vmem:[#allocation16 + $0x8f8] sm:$0xff] }
 0x199   :  { %4082 = vmatpush1.bf16.msra.mxu1 %v4081_v15  ;;  %v500_v15 = vld [vmem:[#allocation13 + $0x320] sm:$0xff] }
 0x19a   :  { %4084 = vmatprep.subr.bf16.mxu1 %v4083_v16  ;;  %v505_v16 = vld [vmem:[#allocation13 + $0x348] sm:$0xff]  ;;  %v4125_v18 = vpack.c.bf16 %v500_v15, %v496_v14  ;;  %v1015_v14 = vld [vmem:[#allocation16 + $0x8f0] sm:$0xff] }
 0x19b   :  { %v4127_v19 = vpack.c.bf16 %v509_v17, %v505_v16  ;;  %v1038_v15 = vld [vmem:[#allocation16 + $0x9a8] sm:$0xff]  ;;  %v1060_v16 = vld [vmem:[#allocation16 + $0xa58] sm:$0xff] }
 0x19d   :  { %4086 = vmatpush1.bf16.msra.mxu1 %v4085_v22  ;;  %v513_v22 = vld [vmem:[#allocation13 + $0x388] sm:$0xff] }
 0x19e   :  { %4088 = vmatprep.subr.bf16.mxu1 %v4087_v23  ;;  %v517_v23 = vld [vmem:[#allocation13 + $0x3a8] sm:$0xff] }
 0x19f   :  { %v4131_v25 = vpack.c.bf16 %v517_v23, %v513_v22  ;;  %v1104_v22 = vld [vmem:[#allocation16 + $0xbb8] sm:$0xff] }
 0x1a1   :  { %4090 = vmatpush1.bf16.msra.mxu1 %v4089_v28  ;;  %v4133_v28 = vpack.c.bf16 %v516_v27, %v512_v26  ;;  %v1103_v26 = vld [vmem:[#allocation16 + $0xbb0] sm:$0xff]  ;;  %v1126_v27 = vld [vmem:[#allocation16 + $0xc68] sm:$0xff] }
 0x1a2   :  { %4092 = vmatprep.subr.bf16.mxu1 %v4091_v29  ;;  %v521_v29 = vld [vmem:[#allocation13 + $0x3c8] sm:$0xff] }
 0x1a3   :  { %v4135_v31 = vpack.c.bf16 %v525_v30, %v521_v29 }
 0x1a5   :  { %4094 = vmatpush1.bf16.msra.mxu1 %v4093_v34  ;;  %v4137_v34 = vpack.c.bf16 %v524_v33, %v520_v32  ;;  %v1147_v32 = vld [vmem:[#allocation16 + $0xd10] sm:$0xff]  ;;  %v1170_v33 = vld [vmem:[#allocation16 + $0xdc8] sm:$0xff] }
 0x1a6   :  { %4096 = vmatprep.subr.bf16.mxu1 %v4095_v35  ;;  %v403_v35 = vld [vmem:[#allocation13 + $0x18] sm:$0xff] }
 0x1a7   :  { %v4139_v37 = vpack.c.bf16 %v407_v36, %v403_v35  ;;  %v300_v36 = vlaneseq }
 0x1a9   :  { %4098 = vmatpush1.bf16.msra.mxu1 %v4097_v40  ;;  %v4203_v40 = vpack.c.bf16 %v752_v39, %v730_v38  ;;  %v1169_v38 = vld [vmem:[#allocation16 + $0xdc0] sm:$0xff]  ;;  %v1191_v39 = vld [vmem:[#allocation16 + $0xe70] sm:$0xff] }
 0x1aa   :  { %4100 = vmatprep.subr.bf16.mxu1 %v4099_v41  ;;  %v729_v41 = vld [vmem:[#allocation16] sm:$0xff] }
 0x1ab   :  { %v4205_v43 = vpack.c.bf16 %v751_v42, %v729_v41  ;;  %4204 = vmatprep.subr.bf16.mxu0 %v4203_v40  ;;  %v1214_v40 = vld [vmem:[#allocation16 + $0xf28] sm:$0xff]  ;;  %v1236_v41 = vld [vmem:[#allocation16 + $0xfd8] sm:$0xff]  ;;  %v4245_v42 = vpack.c.bf16 %v1191_v39, %v1169_v38 }
 0x1ac   :  { %v426_v39 = vld [vmem:[#allocation13 + $0xd0] sm:$0xff] }
 0x1ad   :  { %4102 = vmatpush1.bf16.msra.mxu1 %v4101_v46  ;;  %4206 = vmatpush1.bf16.msra.mxu0 %v4205_v43  ;;  %v4207_v46 = vpack.c.bf16 %v796_v45, %v774_v44  ;;  %v6177_v43 = vshrl.u32 %v300_v36, 7  ;;  %v4247_v44 = vpack.c.bf16 %v1236_v41, %v1214_v40  ;;  %v1213_v45 = vld [vmem:[#allocation16 + $0xf20] sm:$0xff]  ;;  %v431_v36 = vld [vmem:[#allocation13 + $0xf8] sm:$0xff]  ;;  %v430_v40 = vld [vmem:[#allocation13 + $0xf0] sm:$0xff] }
 0x1ae   :  { %4104 = vmatprep.subr.bf16.mxu1 %v4103_v47  ;;  %v773_v47 = vld [vmem:[#allocation16 + $0x160] sm:$0xff]  ;;  %v435_v41 = vld [vmem:[#allocation13 + $0x118] sm:$0xff] }
 0x1af   :  { %v4209_v49 = vpack.c.bf16 %v795_v48, %v773_v47  ;;  %4208 = vmatprep.subr.bf16.mxu0 %v4207_v46  ;;  %v1235_v46 = vld [vmem:[#allocation16 + $0xfd0] sm:$0xff]  ;;  %v1258_v47 = vld [vmem:[#allocation16 + $0x1088] sm:$0xff]  ;;  %v1280_v48 = vld [vmem:[#allocation16 + $0x1138] sm:$0xff] }
 0x1b1   :  { %4106 = vmatpush1.bf16.msra.mxu1 %v4105_v52  ;;  %v4211_v52 = vpack.c.bf16 %v840_v51, %v818_v50  ;;  %4210 = vmatpush1.bf16.msra.mxu0 %v4209_v49  ;;  %v4249_v49 = vpack.c.bf16 %v1235_v46, %v1213_v45  ;;  %v6180_v50 = vsub.s32 0, %v6177_v43  ;;  %v4251_v51 = vpack.c.bf16 %v1280_v48, %v1258_v47  ;;  %v434_v46 = vld [vmem:[#allocation13 + $0x110] sm:$0xff]  ;;  %v443_v48 = vld [vmem:[#allocation13 + $0x158] sm:$0xff] }
 0x1b2   :  { %4108 = vmatprep.subr.bf16.mxu1 %v4107_v53  ;;  %v817_v53 = vld [vmem:[#allocation16 + $0x2c0] sm:$0xff]  ;;  %v438_v47 = vld [vmem:[#allocation13 + $0x130] sm:$0xff] }
 0x1b3   :  { %v4213_v55 = vpack.c.bf16 %v839_v54, %v817_v53  ;;  %4212 = vmatprep.subr.bf16.mxu0 %v4211_v52  ;;  %v1257_v52 = vld [vmem:[#allocation16 + $0x1080] sm:$0xff]  ;;  %v1279_v53 = vld [vmem:[#allocation16 + $0x1130] sm:$0xff]  ;;  %v298_v54 = vld [vmem:[#allocation12] sm:$0x3] }
 0x1b5   :  { %4110 = vmatpush1.bf16.msra.mxu1 %v4109_v58  ;;  %v4215_v58 = vpack.c.bf16 %v884_v57, %v862_v56  ;;  %4214 = vmatpush1.bf16.msra.mxu0 %v4213_v55  ;;  %v6183_v55 = vsub.s32 1, %v6177_v43  ;;  %v1302_v56 = vld [vmem:[#allocation16 + $0x11e8] sm:$0xff]  ;;  %v1324_v57 = vld [vmem:[#allocation16 + $0x1298] sm:$0xff] }
 0x1b6   :  { %4112 = vmatprep.subr.bf16.mxu1 %v4111_v59  ;;  %v861_v59 = vld [vmem:[#allocation16 + $0x420] sm:$0xff] }
 0x1b7   :  { %v4217_v63 = vpack.c.bf16 %v883_v60, %v861_v59  ;;  %4216 = vmatprep.subr.bf16.mxu0 %v4215_v58  ;;  %v4253_v58 = vpack.c.bf16 %v1279_v53, %v1257_v52  ;;  %v303_v59 = vrot.slane %v298_v54, %v6180_v50  ;;  %v4255_v60 = vpack.c.bf16 %v1324_v57, %v1302_v56  ;;  %v442_v53 = vld [vmem:[#allocation13 + $0x150] sm:$0xff]  ;;  %v451_v56 = vld [vmem:[#allocation13 + $0x198] sm:$0xff] }
 0x1b8   :  { %v455_v57 = vld [vmem:[#allocation13 + $0x1b8] sm:$0xff] }
 0x1b9   :  { %4114 = vmatpush1.bf16.msra.mxu1 %v4113_v0  ;;  %v4219_v0 = vpack.c.bf16 %v928_v62, %v906_v61  ;;  %4218 = vmatpush1.bf16.msra.mxu0 %v4217_v63  ;;  %v1301_v61 = vld [vmem:[#allocation16 + $0x11e0] sm:$0xff]  ;;  %v1323_v62 = vld [vmem:[#allocation16 + $0x1290] sm:$0xff]  ;;  %v307_v63 = vrot.slane %v298_v54, %v6183_v55 }
 0x1ba   :  { %4116 = vmatprep.subr.bf16.mxu1 %v4115_v1  ;;  %v905_v1 = vld [vmem:[#allocation16 + $0x580] sm:$0xff]  ;;  %v446_v54 = vld [vmem:[#allocation13 + $0x170] sm:$0xff] }
 0x1bb   :  { %v4221_v5 = vpack.c.bf16 %v927_v2, %v905_v1  ;;  %4220 = vmatprep.subr.bf16.mxu0 %v4219_v0  ;;  %v1346_v0 = vld [vmem:[#allocation16 + $0x1348] sm:$0xff]  ;;  %v1368_v1 = vld [vmem:[#allocation16 + $0x13f8] sm:$0xff] }
 0x1bd   :  { %4118 = vmatpush1.bf16.msra.mxu1 %v4117_v6  ;;  %v4223_v6 = vpack.c.bf16 %v972_v4, %v950_v3  ;;  %4222 = vmatpush1.bf16.msra.mxu0 %v4221_v5  ;;  %v391_v3 = vstv %s4013_s0  ;;  %v4257_v4 = vpack.c.bf16 %v1323_v62, %v1301_v61  ;;  %v454_v61 = vld [vmem:[#allocation13 + $0x1b0] sm:$0xff]  ;;  %v459_v62 = vld [vmem:[#allocation13 + $0x1d8] sm:$0xff] }
 0x1be   :  { %4120 = vmatprep.subr.bf16.mxu1 %v4119_v7  ;;  %v949_v7 = vld [vmem:[#allocation16 + $0x6e0] sm:$0xff] }
 0x1bf   :  { %v4225_v11 = vpack.c.bf16 %v971_v8, %v949_v7  ;;  %4224 = vmatprep.subr.bf16.mxu0 %v4223_v6  ;;  %v4259_v7 = vpack.c.bf16 %v1368_v1, %v1346_v0 }
 0x1c1   :  { %4122 = vmatpush1.bf16.msra.mxu1 %v4121_v12  ;;  %v4227_v12 = vpack.c.bf16 %v1016_v10, %v994_v9  ;;  %4226 = vmatpush1.bf16.msra.mxu0 %v4225_v11  ;;  %v402_v9 = vld [vmem:[#allocation13 + $0x10] sm:$0xff] }
 0x1c2   :  { %4124 = vmatprep.subr.bf16.mxu1 %v4123_v13  ;;  %v993_v13 = vld [vmem:[#allocation16 + $0x840] sm:$0xff]  ;;  %v406_v10 = vld [vmem:[#allocation13 + $0x30] sm:$0xff] }
 0x1c3   :  { %v4229_v17 = vpack.c.bf16 %v1015_v14, %v993_v13  ;;  %4228 = vmatprep.subr.bf16.mxu0 %v4227_v12  ;;  %v411_v12 = vld [vmem:[#allocation13 + $0x58] sm:$0xff] }
 0x1c4   :  { %v415_v13 = vld [vmem:[#allocation13 + $0x78] sm:$0xff] }
 0x1c5   :  { %4126 = vmatpush1.bf16.msra.mxu1 %v4125_v18  ;;  %v4231_v18 = vpack.c.bf16 %v1060_v16, %v1038_v15  ;;  %4230 = vmatpush1.bf16.msra.mxu0 %v4229_v17 }
 0x1c6   :  { %4128 = vmatprep.subr.bf16.mxu1 %v4127_v19  ;;  %v1037_v19 = vld [vmem:[#allocation16 + $0x9a0] sm:$0xff] }
 0x1c7   :  { %v4233_v23 = vpack.c.bf16 %v1059_v20, %v1037_v19  ;;  %4232 = vmatprep.subr.bf16.mxu0 %v4231_v18  ;;  %v4141_v18 = vpack.c.bf16 %v406_v10, %v402_v9  ;;  %v470_v9 = vld [vmem:[#allocation13 + $0x230] sm:$0xff]  ;;  %v475_v10 = vld [vmem:[#allocation13 + $0x258] sm:$0xff] }
 0x1c9   :  { %4130 = vmatpush1.bf16.msra.mxu1 %v4129_v24  ;;  %v4235_v24 = vpack.c.bf16 %v1104_v22, %v1082_v21  ;;  %4234 = vmatpush1.bf16.msra.mxu0 %v4233_v23  ;;  %v4143_v21 = vpack.c.bf16 %v415_v13, %v411_v12  ;;  %v410_v22 = vld [vmem:[#allocation13 + $0x50] sm:$0xff] }
 0x1ca   :  { %4132 = vmatprep.subr.bf16.mxu1 %v4131_v25  ;;  %v1081_v25 = vld [vmem:[#allocation16 + $0xb00] sm:$0xff]  ;;  %v414_v23 = vld [vmem:[#allocation13 + $0x70] sm:$0xff] }
 0x1cb   :  { %v4237_v29 = vpack.c.bf16 %v1103_v26, %v1081_v25  ;;  %4236 = vmatprep.subr.bf16.mxu0 %v4235_v24  ;;  %v419_v26 = vld [vmem:[#allocation13 + $0x98] sm:$0xff] }
 0x1cd   :  { %4134 = vmatpush1.bf16.msra.mxu1 %v4133_v28  ;;  %v1148_v28 = vld [vmem:[#allocation16 + $0xd18] sm:$0xff]  ;;  %4238 = vmatpush1.bf16.msra.mxu0 %v4237_v29  ;;  %v4145_v29 = vpack.c.bf16 %v414_v23, %v410_v22 }
 0x1ce   :  { %4136 = vmatprep.subr.bf16.mxu1 %v4135_v31  ;;  %v4239_v30 = vpack.c.bf16 %v1148_v28, %v1126_v27  ;;  %v1125_v31 = vld [vmem:[#allocation16 + $0xc60] sm:$0xff]  ;;  %v423_v27 = vld [vmem:[#allocation13 + $0xb8] sm:$0xff] }
 0x1cf   :  { %v4241_v35 = vpack.c.bf16 %v1147_v32, %v1125_v31  ;;  %v4147_v31 = vpack.c.bf16 %v423_v27, %v419_v26  ;;  %v418_v32 = vld [vmem:[#allocation13 + $0x90] sm:$0xff]  ;;  %v491_v22 = vld [vmem:[#allocation13 + $0x2d8] sm:$0xff] }
 0x1d0   :  { %4240 = vmatprep.subr.bf16.mxu0 %v4239_v30  ;;  %v495_v23 = vld [vmem:[#allocation13 + $0x2f8] sm:$0xff]  ;;  %v490_v27 = vld [vmem:[#allocation13 + $0x2d0] sm:$0xff] }
 0x1d1   :  { %4138 = vmatpush1.bf16.msra.mxu1 %v4137_v34  ;;  %v1192_v34 = vld [vmem:[#allocation16 + $0xe78] sm:$0xff]  ;;  %4242 = vmatpush1.bf16.msra.mxu0 %v4241_v35  ;;  %v4183_v26 = vpack.c.bf16 %v495_v23, %v491_v22  ;;  %v974_v23 = vld [vmem:[#allocation16 + $0x7a8] sm:$0xff] }
 0x1d2   :  { %4140 = vmatprep.subr.bf16.mxu1 %v4139_v37  ;;  %v4243_v37 = vpack.c.bf16 %v1192_v34, %v1170_v33  ;;  %v422_v33 = vld [vmem:[#allocation13 + $0xb0] sm:$0xff]  ;;  %v427_v35 = vld [vmem:[#allocation13 + $0xd8] sm:$0xff] }
 0x1d3   :  { %v4151_v38 = vpack.c.bf16 %v431_v36, %v427_v35  ;;  %v498_v35 = vld [vmem:[#allocation13 + $0x310] sm:$0xff]  ;;  %v952_v22 = vld [vmem:[#allocation16 + $0x6f8] sm:$0xff] }
 0x1d4   :  { %4244 = vmatprep.subr.bf16.mxu0 %v4243_v37  ;;  %v4149_v37 = vpack.c.bf16 %v422_v33, %v418_v32  ;;  %v502_v36 = vld [vmem:[#allocation13 + $0x330] sm:$0xff] }
 0x1d5   :  { %4246 = vmatpush1.bf16.msra.mxu0 %v4245_v42  ;;  %v439_v42 = vld [vmem:[#allocation13 + $0x138] sm:$0xff] }
 0x1d6   :  { %4248 = vmatprep.subr.bf16.mxu0 %v4247_v44  ;;  %v4153_v44 = vpack.c.bf16 %v430_v40, %v426_v39  ;;  %v4155_v45 = vpack.c.bf16 %v439_v42, %v435_v41  ;;  %v4189_v39 = vpack.c.bf16 %v502_v36, %v498_v35  ;;  %v506_v41 = vld [vmem:[#allocation13 + $0x350] sm:$0xff] }
 0x1d7   :  { %v510_v42 = vld [vmem:[#allocation13 + $0x370] sm:$0xff] }
 0x1d8   :  { %v995_v36 = vld [vmem:[#allocation16 + $0x850] sm:$0xff] }
 0x1d9   :  { %4250 = vmatpush1.bf16.msra.mxu0 %v4249_v49  ;;  %v447_v49 = vld [vmem:[#allocation13 + $0x178] sm:$0xff] }
 0x1da   :  { %4252 = vmatprep.subr.bf16.mxu0 %v4251_v51  ;;  %v4157_v51 = vpack.c.bf16 %v438_v47, %v434_v46  ;;  %v4159_v52 = vpack.c.bf16 %v447_v49, %v443_v48  ;;  %v4193_v46 = vpack.c.bf16 %v510_v42, %v506_v41  ;;  %v514_v48 = vld [vmem:[#allocation13 + $0x390] sm:$0xff]  ;;  %v1412_v42 = vld [vmem:[#allocation16 + $0x1558] sm:$0xff] }
 0x1db   :  { %v518_v49 = vld [vmem:[#allocation13 + $0x3b0] sm:$0xff] }
 0x1dc   :  { %v1390_v41 = vld [vmem:[#allocation16 + $0x14a8] sm:$0xff] }
 0x1dd   :  { %4254 = vmatpush1.bf16.msra.mxu0 %v4253_v58  ;;  %v4161_v58 = vpack.c.bf16 %v446_v54, %v442_v53  ;;  %v4197_v53 = vpack.c.bf16 %v518_v49, %v514_v48  ;;  %v1039_v49 = vld [vmem:[#allocation16 + $0x9b0] sm:$0xff] }
 0x1de   :  { %4256 = vmatprep.subr.bf16.mxu0 %v4255_v60  ;;  %v450_v60 = vld [vmem:[#allocation13 + $0x190] sm:$0xff] }
 0x1df   :  { %v4165_v0 = vpack.c.bf16 %v454_v61, %v450_v60 }
 0x1e1   :  { %4258 = vmatpush1.bf16.msra.mxu0 %v4257_v4  ;;  %v467_v4 = vld [vmem:[#allocation13 + $0x218] sm:$0xff] }
 0x1e2   :  { %4260 = vmatprep.subr.bf16.mxu0 %v4259_v7 }
 0x267   :  { %v376_v2 = vpop.f32.mrb[0].mxu1 }
 0x268   :  { %v377_v5 = vadd.f32 %v376_v2, %v303_v59  ;;  %v378_v6 = vpop.f32.mrb[1].mxu1  ;;  %v458_v2 = vld [vmem:[#allocation13 + $0x1d0] sm:$0xff] }
 0x269   :  { %v379_v8 = vadd.f32 %v378_v6, %v307_v63 }
 0x26a   :  { %v392_v11 = vmul.f32 %v391_v3, %v377_v5  ;;  %vm387_vm3 = vcmp.ge.f32.partialorder %v377_v5, 0.0 }
 0x26b   :  { %v393_v14 = vmul.f32 %v391_v3, %v379_v8  ;;  %v382_v15 = vpop.f32.mrb[2].mxu1  ;;  %vm388_vm4 = vcmp.ge.f32.partialorder %v379_v8, 0.0 }
 0x26c   :  { %v383_v16 = vadd.f32 %v382_v15, %v303_v59  ;;  %v384_v17 = vpop.f32.mrb[3].mxu1  ;;  %v6187_v24 = vsel %vm387_vm3, %v377_v5, %v392_v11  ;;  %v4163_v59 = vpack.c.bf16 %v455_v57, %v451_v56  ;;  %v471_v5 = vld [vmem:[#allocation13 + $0x238] sm:$0xff]  ;;  %v478_v15 = vld [vmem:[#allocation13 + $0x270] sm:$0xff] }
 0x26d   :  { %v385_v19 = vadd.f32 %v384_v17, %v307_v63  ;;  %v397_v20 = vsel %vm388_vm4, %v379_v8, %v393_v14  ;;  %v463_v63 = vld [vmem:[#allocation13 + $0x1f8] sm:$0xff]  ;;  %v4171_v7 = vpack.c.bf16 %v471_v5, %v467_v4  ;;  %v466_v8 = vld [vmem:[#allocation13 + $0x210] sm:$0xff]  ;;  %v797_v5 = vld [vmem:[#allocation16 + $0x220] sm:$0xff] }
 0x26e   :  { %v394_v25 = vmul.f32 %v391_v3, %v383_v16  ;;  %614 = vmatprep.mubr.f32.mxu1 %v397_v20  ;;  %vm389_vm6 = vcmp.ge.f32.partialorder %v383_v16, 0.0  ;;  %v4167_v1 = vpack.c.bf16 %v463_v63, %v459_v62  ;;  %v479_v11 = vld [vmem:[#allocation13 + $0x278] sm:$0xff]  ;;  %v4173_v12 = vpack.c.bf16 %v470_v9, %v466_v8  ;;  %v474_v14 = vld [vmem:[#allocation13 + $0x250] sm:$0xff]  ;;  %v753_v63 = vld [vmem:[#allocation16 + $0xc0] sm:$0xff] }
 0x26f   :  { %v395_v28 = vmul.f32 %v391_v3, %v385_v19  ;;  %615 = vmatmul.mubr.f32.vlgmr.msra.gmra.mrb[4].mxu1 %v6187_v24  ;;  %vm390_vm5 = vcmp.ge.f32.partialorder %v385_v19, 0.0  ;;  %v462_v3 = vld [vmem:[#allocation13 + $0x1f0] sm:$0xff]  ;;  %v4175_v13 = vpack.c.bf16 %v479_v11, %v475_v10  ;;  %v487_v17 = vld [vmem:[#allocation13 + $0x2b8] sm:$0xff]  ;;  %v841_v11 = vld [vmem:[#allocation16 + $0x380] sm:$0xff] }
 0x270   :  { %4142 = vmatpush1.bf16.msra.mxu1 %v4141_v18  ;;  %v6193_v34 = vsel %vm389_vm6, %v383_v16, %v394_v25  ;;  %v4169_v6 = vpack.c.bf16 %v462_v3, %v458_v2  ;;  %v483_v16 = vld [vmem:[#allocation13 + $0x298] sm:$0xff]  ;;  %v4177_v18 = vpack.c.bf16 %v478_v15, %v474_v14  ;;  %v522_v56 = vld [vmem:[#allocation13 + $0x3d0] sm:$0xff] }
 0x271   :  { %v6190_v30 = vsel %vm390_vm5, %v385_v19, %v395_v28  ;;  %4144 = vmatprep.subr.bf16.mxu1 %v4143_v21  ;;  %v4179_v19 = vpack.c.bf16 %v487_v17, %v483_v16  ;;  %v486_v21 = vld [vmem:[#allocation13 + $0x2b0] sm:$0xff]  ;;  %v885_v17 = vld [vmem:[#allocation16 + $0x4e0] sm:$0xff] }
 0x272   :  { %620 = vmatprep.mubr.f32.mxu1 %v6190_v30  ;;  %v494_v28 = vld [vmem:[#allocation13 + $0x2f0] sm:$0xff] }
 0x273   :  { %621 = vmatmul.mubr.f32.gmra.mrb[6].mxu1 %v6193_v34  ;;  %v4185_v32 = vpack.c.bf16 %v494_v28, %v490_v27  ;;  %v526_v57 = vld [vmem:[#allocation13 + $0x3f0] sm:$0xff]  ;;  %v973_v27 = vld [vmem:[#allocation16 + $0x7a0] sm:$0xff]  ;;  %v996_v28 = vld [vmem:[#allocation16 + $0x858] sm:$0xff] }
 0x274   :  { %4146 = vmatpush1.bf16.msra.mxu1 %v4145_v29  ;;  %691 = vmatprep.mubr.f32.mxu1 %v397_v20  ;;  %v482_v20 = vld [vmem:[#allocation13 + $0x290] sm:$0xff]  ;;  %v499_v29 = vld [vmem:[#allocation13 + $0x318] sm:$0xff]  ;;  %v4201_v60 = vpack.c.bf16 %v526_v57, %v522_v56 }
 0x275   :  { %4148 = vmatprep.subr.bf16.mxu1 %v4147_v31  ;;  %v4181_v25 = vpack.c.bf16 %v486_v21, %v482_v20  ;;  %v503_v31 = vld [vmem:[#allocation13 + $0x338] sm:$0xff]  ;;  %v929_v21 = vld [vmem:[#allocation16 + $0x640] sm:$0xff]  ;;  %v1434_v56 = vld [vmem:[#allocation16 + $0x1608] sm:$0xff] }
 0x276   :  { %v4187_v33 = vpack.c.bf16 %v503_v31, %v499_v29  ;;  %v731_v62 = vld [vmem:[#allocation16 + $0x10] sm:$0xff]  ;;  %v1018_v29 = vld [vmem:[#allocation16 + $0x908] sm:$0xff]  ;;  %v1456_v57 = vld [vmem:[#allocation16 + $0x16b8] sm:$0xff] }
 0x277   :  { %v4333_v2 = vpack.c.bf16 %v753_v63, %v731_v62  ;;  %v775_v4 = vld [vmem:[#allocation16 + $0x170] sm:$0xff]  ;;  %v4355_v35 = vpack.c.bf16 %v1018_v29, %v996_v28  ;;  %v1105_v62 = vld [vmem:[#allocation16 + $0xbc0] sm:$0xff]  ;;  %v1128_v63 = vld [vmem:[#allocation16 + $0xc78] sm:$0xff] }
 0x278   :  { %4150 = vmatpush1.bf16.msra.mxu1 %v4149_v37  ;;  %v507_v37 = vld [vmem:[#allocation13 + $0x358] sm:$0xff]  ;;  %v4337_v8 = vpack.c.bf16 %v797_v5, %v775_v4  ;;  %v1149_v4 = vld [vmem:[#allocation16 + $0xd20] sm:$0xff]  ;;  %v1370_v28 = vld [vmem:[#allocation16 + $0x1408] sm:$0xff] }
 0x279   :  { %4152 = vmatprep.subr.bf16.mxu1 %v4151_v38  ;;  %v511_v38 = vld [vmem:[#allocation13 + $0x378] sm:$0xff] }
 0x27a   :  { %v4191_v40 = vpack.c.bf16 %v511_v38, %v507_v37  ;;  %v819_v10 = vld [vmem:[#allocation16 + $0x2d0] sm:$0xff]  ;;  %v1017_v37 = vld [vmem:[#allocation16 + $0x900] sm:$0xff]  ;;  %v1172_v5 = vld [vmem:[#allocation16 + $0xdd8] sm:$0xff] }
 0x27b   :  { %v4341_v14 = vpack.c.bf16 %v841_v11, %v819_v10  ;;  %v863_v16 = vld [vmem:[#allocation16 + $0x430] sm:$0xff]  ;;  %v1193_v10 = vld [vmem:[#allocation16 + $0xe80] sm:$0xff]  ;;  %v1216_v11 = vld [vmem:[#allocation16 + $0xf38] sm:$0xff] }
 0x27c   :  { %4154 = vmatpush1.bf16.msra.mxu1 %v4153_v44  ;;  %v515_v44 = vld [vmem:[#allocation13 + $0x398] sm:$0xff] }
 0x27d   :  { %4156 = vmatprep.subr.bf16.mxu1 %v4155_v45  ;;  %v519_v45 = vld [vmem:[#allocation13 + $0x3b8] sm:$0xff] }
 0x27e   :  { %v4195_v47 = vpack.c.bf16 %v519_v45, %v515_v44  ;;  %v907_v20 = vld [vmem:[#allocation16 + $0x590] sm:$0xff]  ;;  %v4357_v44 = vpack.c.bf16 %v1017_v37, %v995_v36  ;;  %v4263_v45 = vpack.c.bf16 %v1412_v42, %v1390_v41  ;;  %v1414_v36 = vld [vmem:[#allocation16 + $0x1568] sm:$0xff]  ;;  %v1436_v41 = vld [vmem:[#allocation16 + $0x1618] sm:$0xff] }
 0x27f   :  { %v1458_v42 = vld [vmem:[#allocation16 + $0x16c8] sm:$0xff] }
 0x280   :  { %4158 = vmatpush1.bf16.msra.mxu1 %v4157_v51  ;;  %v523_v51 = vld [vmem:[#allocation13 + $0x3d8] sm:$0xff] }
 0x281   :  { %4160 = vmatprep.subr.bf16.mxu1 %v4159_v52  ;;  %v527_v52 = vld [vmem:[#allocation13 + $0x3f8] sm:$0xff] }
 0x282   :  { %v4199_v54 = vpack.c.bf16 %v527_v52, %v523_v51  ;;  %v1061_v51 = vld [vmem:[#allocation16 + $0xa60] sm:$0xff] }
 0x284   :  { %4162 = vmatpush1.bf16.msra.mxu1 %v4161_v58  ;;  %v732_v58 = vld [vmem:[#allocation16 + $0x18] sm:$0xff] }
 0x285   :  { %4164 = vmatprep.subr.bf16.mxu1 %v4163_v59  ;;  %v754_v59 = vld [vmem:[#allocation16 + $0xc8] sm:$0xff] }
 0x286   :  { %v4331_v61 = vpack.c.bf16 %v754_v59, %v732_v58  ;;  %v4361_v58 = vpack.c.bf16 %v1061_v51, %v1039_v49  ;;  %v4267_v59 = vpack.c.bf16 %v1456_v57, %v1434_v56  ;;  %v6205_v51 = vstv %s4014_s11  ;;  %v1455_v56 = vld [vmem:[#allocation16 + $0x16b0] sm:$0xff] }
 0x288   :  { %4166 = vmatpush1.bf16.msra.mxu1 %v4165_v0  ;;  %v776_v0 = vld [vmem:[#allocation16 + $0x178] sm:$0xff] }
 0x289   :  { %4168 = vmatprep.subr.bf16.mxu1 %v4167_v1  ;;  %v798_v1 = vld [vmem:[#allocation16 + $0x228] sm:$0xff] }
 0x28a   :  { %v4335_v3 = vpack.c.bf16 %v798_v1, %v776_v0  ;;  %v1150_v0 = vld [vmem:[#allocation16 + $0xd28] sm:$0xff] }
 0x28c   :  { %4170 = vmatpush1.bf16.msra.mxu1 %v4169_v6  ;;  %v820_v6 = vld [vmem:[#allocation16 + $0x2d8] sm:$0xff] }
 0x28d   :  { %4172 = vmatprep.subr.bf16.mxu1 %v4171_v7  ;;  %v842_v7 = vld [vmem:[#allocation16 + $0x388] sm:$0xff] }
 0x28e   :  { %v4339_v9 = vpack.c.bf16 %v842_v7, %v820_v6  ;;  %v1194_v6 = vld [vmem:[#allocation16 + $0xe88] sm:$0xff] }
 0x290   :  { %4174 = vmatpush1.bf16.msra.mxu1 %v4173_v12  ;;  %v864_v12 = vld [vmem:[#allocation16 + $0x438] sm:$0xff] }
 0x291   :  { %4176 = vmatprep.subr.bf16.mxu1 %v4175_v13  ;;  %v886_v13 = vld [vmem:[#allocation16 + $0x4e8] sm:$0xff] }
 0x292   :  { %v4343_v15 = vpack.c.bf16 %v886_v13, %v864_v12  ;;  %v1238_v12 = vld [vmem:[#allocation16 + $0xfe8] sm:$0xff] }
 0x294   :  { %4178 = vmatpush1.bf16.msra.mxu1 %v4177_v18  ;;  %v908_v18 = vld [vmem:[#allocation16 + $0x598] sm:$0xff] }
 0x295   :  { %4180 = vmatprep.subr.bf16.mxu1 %v4179_v19 }
 0x298   :  { %4182 = vmatpush1.bf16.msra.mxu1 %v4181_v25  ;;  %v4349_v25 = vpack.c.bf16 %v929_v21, %v907_v20  ;;  %v1281_v20 = vld [vmem:[#allocation16 + $0x1140] sm:$0xff]  ;;  %v1304_v21 = vld [vmem:[#allocation16 + $0x11f8] sm:$0xff] }
 0x299   :  { %4184 = vmatprep.subr.bf16.mxu1 %v4183_v26  ;;  %v951_v26 = vld [vmem:[#allocation16 + $0x6f0] sm:$0xff] }
 0x29a   :  { %v4353_v31 = vpack.c.bf16 %v973_v27, %v951_v26  ;;  %v1325_v26 = vld [vmem:[#allocation16 + $0x12a0] sm:$0xff]  ;;  %v1348_v27 = vld [vmem:[#allocation16 + $0x1358] sm:$0xff] }
 0x29c   :  { %4186 = vmatpush1.bf16.msra.mxu1 %v4185_v32  ;;  %v1345_v32 = vld [vmem:[#allocation16 + $0x1340] sm:$0xff] }
 0x29d   :  { %4188 = vmatprep.subr.bf16.mxu1 %v4187_v33  ;;  %v1367_v33 = vld [vmem:[#allocation16 + $0x13f0] sm:$0xff] }
 0x29e   :  { %v4261_v38 = vpack.c.bf16 %v1367_v33, %v1345_v32  ;;  %v1347_v32 = vld [vmem:[#allocation16 + $0x1350] sm:$0xff]  ;;  %v1369_v33 = vld [vmem:[#allocation16 + $0x1400] sm:$0xff] }
 0x29f   :  { %v4389_v37 = vpack.c.bf16 %v1369_v33, %v1347_v32  ;;  %v1588_v32 = vld [vmem:[#allocation16 + $0x1ad8] sm:$0xff] }
 0x2a0   :  { %4190 = vmatpush1.bf16.msra.mxu1 %v4189_v39  ;;  %v1040_v39 = vld [vmem:[#allocation16 + $0x9b8] sm:$0xff]  ;;  %4262 = vmatpush1.bf16.msra.mxu0 %v4261_v38 }
 0x2a1   :  { %4192 = vmatprep.subr.bf16.mxu1 %v4191_v40  ;;  %v1062_v40 = vld [vmem:[#allocation16 + $0xa68] sm:$0xff]  ;;  %4264 = vmatprep.subr.bf16.mxu0 %v4263_v45  ;;  %v4395_v45 = vpack.c.bf16 %v1458_v42, %v1436_v41  ;;  %v1568_v33 = vld [vmem:[#allocation16 + $0x1a38] sm:$0xff]  ;;  %v1567_v42 = vld [vmem:[#allocation16 + $0x1a30] sm:$0xff] }
 0x2a2   :  { %v4359_v48 = vpack.c.bf16 %v1062_v40, %v1040_v39  ;;  %v1391_v39 = vld [vmem:[#allocation16 + $0x14b0] sm:$0xff]  ;;  %v1413_v40 = vld [vmem:[#allocation16 + $0x1560] sm:$0xff] }
 0x2a4   :  { %4194 = vmatpush1.bf16.msra.mxu1 %v4193_v46  ;;  %v1389_v46 = vld [vmem:[#allocation16 + $0x14a0] sm:$0xff] }
 0x2a5   :  { %4196 = vmatprep.subr.bf16.mxu1 %v4195_v47  ;;  %v1411_v47 = vld [vmem:[#allocation16 + $0x1550] sm:$0xff] }
 0x2a6   :  { %v4265_v52 = vpack.c.bf16 %v1411_v47, %v1389_v46  ;;  %v6199_v46 = vld [vmem:[#allocation15] sm:$0xf] }
 0x2a7   :  { %v533_v47 = vrot.slane %v6199_v46, %v6180_v50 }
 0x2a8   :  { %4198 = vmatpush1.bf16.msra.mxu1 %v4197_v53  ;;  %v1084_v53 = vld [vmem:[#allocation16 + $0xb18] sm:$0xff]  ;;  %4266 = vmatpush1.bf16.msra.mxu0 %v4265_v52 }
 0x2a9   :  { %4200 = vmatprep.subr.bf16.mxu1 %v4199_v54  ;;  %v1106_v54 = vld [vmem:[#allocation16 + $0xbc8] sm:$0xff]  ;;  %4268 = vmatprep.subr.bf16.mxu0 %v4267_v59  ;;  %v1457_v59 = vld [vmem:[#allocation16 + $0x16c0] sm:$0xff] }
 0x2ac   :  { %4202 = vmatpush1.bf16.msra.mxu1 %v4201_v60  ;;  %v4363_v60 = vpack.c.bf16 %v1106_v54, %v1084_v53  ;;  %v1433_v54 = vld [vmem:[#allocation16 + $0x1600] sm:$0xff] }
 0x2ad   :  { %4332 = vmatprep.subr.bf16.mxu1 %v4331_v61  ;;  %v1083_v61 = vld [vmem:[#allocation16 + $0xb10] sm:$0xff] }
 0x2ae   :  { %v4365_v1 = vpack.c.bf16 %v1105_v62, %v1083_v61  ;;  %v1500_v62 = vld [vmem:[#allocation16 + $0x1818] sm:$0xff] }
 0x2af   :  { %692 = vmatmul.mubr.f32.vlgmr.msra.gmra.mrb[8].mxu1 %v6187_v24  ;;  %v930_v24 = vld [vmem:[#allocation16 + $0x648] sm:$0xff] }
 0x2b0   :  { %697 = vmatprep.mubr.f32.mxu1 %v6190_v30  ;;  %4334 = vmatpush1.bf16.msra.mxu1 %v4333_v2  ;;  %v4345_v30 = vpack.c.bf16 %v885_v17, %v863_v16  ;;  %v4347_v19 = vpack.c.bf16 %v930_v24, %v908_v18  ;;  %v4367_v2 = vpack.c.bf16 %v1150_v0, %v1128_v63  ;;  %v1237_v16 = vld [vmem:[#allocation16 + $0xfe0] sm:$0xff]  ;;  %v1260_v17 = vld [vmem:[#allocation16 + $0x1098] sm:$0xff]  ;;  %v1282_v18 = vld [vmem:[#allocation16 + $0x1148] sm:$0xff] }
 0x2b1   :  { %4336 = vmatprep.subr.bf16.mxu1 %v4335_v3  ;;  %v1127_v3 = vld [vmem:[#allocation16 + $0xc70] sm:$0xff]  ;;  %v1480_v63 = vld [vmem:[#allocation16 + $0x1778] sm:$0xff]  ;;  %v1502_v0 = vld [vmem:[#allocation16 + $0x1828] sm:$0xff] }
 0x2b2   :  { %v4369_v7 = vpack.c.bf16 %v1149_v4, %v1127_v3 }
 0x2b3   :  { %698 = vmatmul.mubr.f32.gmra.mrb[10].mxu1 %v6193_v34  ;;  %v4351_v34 = vpack.c.bf16 %v974_v23, %v952_v22  ;;  %v1326_v22 = vld [vmem:[#allocation16 + $0x12a8] sm:$0xff] }
 0x2b4   :  { %4338 = vmatpush1.bf16.msra.mxu1 %v4337_v8  ;;  %v4371_v8 = vpack.c.bf16 %v1194_v6, %v1172_v5  ;;  %v4269_v5 = vpack.c.bf16 %v1455_v56, %v1433_v54  ;;  %v1609_v54 = vld [vmem:[#allocation16 + $0x1b80] sm:$0xff]  ;;  %v1631_v56 = vld [vmem:[#allocation16 + $0x1c30] sm:$0xff] }
 0x2b5   :  { %4340 = vmatprep.subr.bf16.mxu1 %v4339_v9  ;;  %v1171_v9 = vld [vmem:[#allocation16 + $0xdd0] sm:$0xff] }
 0x2b6   :  { %v4373_v13 = vpack.c.bf16 %v1193_v10, %v1171_v9 }
 0x2b8   :  { %4342 = vmatpush1.bf16.msra.mxu1 %v4341_v14  ;;  %v4375_v14 = vpack.c.bf16 %v1238_v12, %v1216_v11  ;;  %v4399_v12 = vpack.c.bf16 %v1502_v0, %v1480_v63  ;;  %v1656_v63 = vld [vmem:[#allocation16 + $0x1cf8] sm:$0xff]  ;;  %v1678_v0 = vld [vmem:[#allocation16 + $0x1da8] sm:$0xff] }
 0x2b9   :  { %4344 = vmatprep.subr.bf16.mxu1 %v4343_v15  ;;  %v1215_v15 = vld [vmem:[#allocation16 + $0xf30] sm:$0xff] }
 0x2ba   :  { %v4377_v24 = vpack.c.bf16 %v1237_v16, %v1215_v15  ;;  %v1522_v15 = vld [vmem:[#allocation16 + $0x18c8] sm:$0xff] }
 0x2bc   :  { %4346 = vmatpush1.bf16.msra.mxu1 %v4345_v30  ;;  %v4379_v30 = vpack.c.bf16 %v1282_v18, %v1260_v17  ;;  %v1544_v18 = vld [vmem:[#allocation16 + $0x1978] sm:$0xff] }
 0x2bd   :  { %4348 = vmatprep.subr.bf16.mxu1 %v4347_v19  ;;  %v1259_v19 = vld [vmem:[#allocation16 + $0x1090] sm:$0xff] }
 0x2be   :  { %v4381_v23 = vpack.c.bf16 %v1281_v20, %v1259_v19 }
 0x2c0   :  { %4350 = vmatpush1.bf16.msra.mxu1 %v4349_v25  ;;  %v4383_v25 = vpack.c.bf16 %v1326_v22, %v1304_v21  ;;  %v1521_v22 = vld [vmem:[#allocation16 + $0x18c0] sm:$0xff] }
 0x2c1   :  { %4352 = vmatprep.subr.bf16.mxu1 %v4351_v34  ;;  %v1303_v34 = vld [vmem:[#allocation16 + $0x11f0] sm:$0xff] }
 0x2c2   :  { %v4385_v29 = vpack.c.bf16 %v1325_v26, %v1303_v34  ;;  %v4275_v34 = vpack.c.bf16 %v1544_v18, %v1522_v15  ;;  %v1719_v18 = vld [vmem:[#allocation16 + $0x1ef0] sm:$0xff] }
 0x2c4   :  { %4354 = vmatpush1.bf16.msra.mxu1 %v4353_v31  ;;  %v4387_v31 = vpack.c.bf16 %v1370_v28, %v1348_v27  ;;  %v1523_v27 = vld [vmem:[#allocation16 + $0x18d0] sm:$0xff]  ;;  %v1545_v28 = vld [vmem:[#allocation16 + $0x1980] sm:$0xff] }
 0x2c5   :  { %4356 = vmatprep.subr.bf16.mxu1 %v4355_v35  ;;  %v1392_v35 = vld [vmem:[#allocation16 + $0x14b8] sm:$0xff] }
 0x2c6   :  { %v4391_v38 = vpack.c.bf16 %v1414_v36, %v1392_v35  ;;  %v1590_v35 = vld [vmem:[#allocation16 + $0x1ae8] sm:$0xff] }
 0x2c7   :  { %v4407_v41 = vpack.c.bf16 %v1590_v35, %v1568_v33  ;;  %v1743_v35 = vld [vmem:[#allocation16 + $0x1fb0] sm:$0xff] }
 0x2c8   :  { %4358 = vmatpush1.bf16.msra.mxu1 %v4357_v44  ;;  %v4393_v44 = vpack.c.bf16 %v1413_v40, %v1391_v39  ;;  %v1587_v39 = vld [vmem:[#allocation16 + $0x1ad0] sm:$0xff] }
 0x2c9   :  { %4360 = vmatprep.subr.bf16.mxu1 %v4359_v48  ;;  %v537_v48 = vrot.slane %v6199_v46, %v6183_v55 }
 0x2cc   :  { %4362 = vmatpush1.bf16.msra.mxu1 %v4361_v58  ;;  %v1435_v58 = vld [vmem:[#allocation16 + $0x1610] sm:$0xff] }
 0x2cd   :  { %4364 = vmatprep.subr.bf16.mxu1 %v4363_v60  ;;  %v1478_v60 = vld [vmem:[#allocation16 + $0x1768] sm:$0xff]  ;;  %v4397_v6 = vpack.c.bf16 %v1457_v59, %v1435_v58  ;;  %v1611_v59 = vld [vmem:[#allocation16 + $0x1b90] sm:$0xff] }
 0x2ce   :  { %v4271_v11 = vpack.c.bf16 %v1500_v62, %v1478_v60  ;;  %v1633_v60 = vld [vmem:[#allocation16 + $0x1c40] sm:$0xff]  ;;  %v1676_v62 = vld [vmem:[#allocation16 + $0x1d98] sm:$0xff] }
 0x2d0   :  { %4366 = vmatpush1.bf16.msra.mxu1 %v4365_v1 }
 0x2d1   :  { %4368 = vmatprep.subr.bf16.mxu1 %v4367_v2 }
 0x2d4   :  { %4370 = vmatpush1.bf16.msra.mxu1 %v4369_v7  ;;  %v1477_v7 = vld [vmem:[#allocation16 + $0x1760] sm:$0xff] }
 0x2d5   :  { %4372 = vmatprep.subr.bf16.mxu1 %v4371_v8  ;;  %v1499_v8 = vld [vmem:[#allocation16 + $0x1810] sm:$0xff] }
 0x2d6   :  { %v4273_v20 = vpack.c.bf16 %v1499_v8, %v1477_v7  ;;  %v1655_v7 = vld [vmem:[#allocation16 + $0x1cf0] sm:$0xff]  ;;  %v1677_v8 = vld [vmem:[#allocation16 + $0x1da0] sm:$0xff] }
 0x2d7   :  { %v4417_v15 = vpack.c.bf16 %v1677_v8, %v1655_v7  ;;  %v1873_v8 = vld [vmem:[#allocation16 + $0x23c0] sm:$0xff] }
 0x2d8   :  { %4374 = vmatpush1.bf16.msra.mxu1 %v4373_v13  ;;  %v1479_v13 = vld [vmem:[#allocation16 + $0x1770] sm:$0xff] }
 0x2d9   :  { %4376 = vmatprep.subr.bf16.mxu1 %v4375_v14  ;;  %v1501_v14 = vld [vmem:[#allocation16 + $0x1820] sm:$0xff] }
 0x2da   :  { %v4401_v21 = vpack.c.bf16 %v1501_v14, %v1479_v13  ;;  %v1722_v13 = vld [vmem:[#allocation16 + $0x1f08] sm:$0xff] }
 0x2dc   :  { %4378 = vmatpush1.bf16.msra.mxu1 %v4377_v24  ;;  %v1524_v24 = vld [vmem:[#allocation16 + $0x18d8] sm:$0xff] }
 0x2dd   :  { %4380 = vmatprep.subr.bf16.mxu1 %v4379_v30  ;;  %v1546_v30 = vld [vmem:[#allocation16 + $0x1988] sm:$0xff] }
 0x2de   :  { %v4403_v26 = vpack.c.bf16 %v1546_v30, %v1524_v24 }
 0x2e0   :  { %4382 = vmatpush1.bf16.msra.mxu1 %v4381_v23  ;;  %v1543_v23 = vld [vmem:[#allocation16 + $0x1970] sm:$0xff] }
 0x2e1   :  { %4384 = vmatprep.subr.bf16.mxu1 %v4383_v25  ;;  %v4277_v36 = vpack.c.bf16 %v1543_v23, %v1521_v22  ;;  %v1764_v22 = vld [vmem:[#allocation16 + $0x2058] sm:$0xff] }
 0x2e2   :  { %v1744_v23 = vld [vmem:[#allocation16 + $0x1fb8] sm:$0xff] }
 0x2e4   :  { %4386 = vmatpush1.bf16.msra.mxu1 %v4385_v29  ;;  %v1566_v29 = vld [vmem:[#allocation16 + $0x1a28] sm:$0xff] }
 0x2e5   :  { %4388 = vmatprep.subr.bf16.mxu1 %v4387_v31  ;;  %v4279_v40 = vpack.c.bf16 %v1588_v32, %v1566_v29  ;;  %v1763_v29 = vld [vmem:[#allocation16 + $0x2050] sm:$0xff] }
 0x2e8   :  { %4390 = vmatpush1.bf16.msra.mxu1 %v4389_v37  ;;  %v4405_v37 = vpack.c.bf16 %v1545_v28, %v1523_v27  ;;  %v1741_v28 = vld [vmem:[#allocation16 + $0x1fa0] sm:$0xff] }
 0x2e9   :  { %4392 = vmatprep.subr.bf16.mxu1 %v4391_v38  ;;  %v1565_v38 = vld [vmem:[#allocation16 + $0x1a20] sm:$0xff] }
 0x2ec   :  { %4394 = vmatpush1.bf16.msra.mxu1 %v4393_v44  ;;  %v1589_v44 = vld [vmem:[#allocation16 + $0x1ae0] sm:$0xff] }
 0x2ed   :  { %4396 = vmatprep.subr.bf16.mxu1 %v4395_v45  ;;  %v1610_v45 = vld [vmem:[#allocation16 + $0x1b88] sm:$0xff] }
 0x342   :  { %v616_v49 = vpop.f32.mrb[4].mxu1 }
 0x343   :  { %v617_v52 = vadd.f32 %v616_v49, %v533_v47  ;;  %v618_v53 = vpop.f32.mrb[5].mxu1  ;;  %v1634_v49 = vld [vmem:[#allocation16 + $0x1c48] sm:$0xff] }
 0x344   :  { %v619_v57 = vadd.f32 %v618_v53, %v537_v48  ;;  %v4409_v53 = vpack.c.bf16 %v1589_v44, %v1567_v42  ;;  %v1785_v44 = vld [vmem:[#allocation16 + $0x2100] sm:$0xff] }
 0x345   :  { %v713_v61 = vmul.f32 %v6205_v51, %v617_v52  ;;  %vm704_vm7 = vcmp.ge.f32.partialorder %v617_v52, 0.0 }
 0x346   :  { %vm705_vm8 = vcmp.ge.f32.partialorder %v619_v57, 0.0  ;;  %v714_v1 = vmul.f32 %v6205_v51, %v619_v57  ;;  %v622_v2 = vpop.f32.mrb[6].mxu1 }
 0x347   :  { %v623_v3 = vadd.f32 %v622_v2, %v533_v47  ;;  %v624_v4 = vpop.f32.mrb[7].mxu1  ;;  %v6212_v16 = vsel %vm704_vm7, %v617_v52, %v713_v61  ;;  %v1632_v47 = vld [vmem:[#allocation16 + $0x1c38] sm:$0xff]  ;;  %v4281_v52 = vpack.c.bf16 %v1587_v39, %v1565_v38  ;;  %v1654_v61 = vld [vmem:[#allocation16 + $0x1ce8] sm:$0xff]  ;;  %v4413_v2 = vpack.c.bf16 %v1633_v60, %v1611_v59  ;;  %v1829_v60 = vld [vmem:[#allocation16 + $0x2260] sm:$0xff] }
 0x348   :  { %v6209_v9 = vsel %vm705_vm8, %v619_v57, %v714_v1  ;;  %v625_v10 = vadd.f32 %v624_v4, %v537_v48  ;;  %v1612_v48 = vld [vmem:[#allocation16 + $0x1b98] sm:$0xff]  ;;  %v4283_v57 = vpack.c.bf16 %v1632_v47, %v1610_v45  ;;  %v4285_v1 = vpack.c.bf16 %v1631_v56, %v1609_v54  ;;  %v1675_v4 = vld [vmem:[#allocation16 + $0x1d90] sm:$0xff] }
 0x349   :  { %v717_v17 = vmul.f32 %v6205_v51, %v623_v3  ;;  %2317 = vmatprep.mubr.f32.mxu0 %v6209_v9  ;;  %2471 = vmatprep.mubr.f32.mxu1 %v6209_v9  ;;  %vm708_vm9 = vcmp.ge.f32.partialorder %v623_v3, 0.0  ;;  %v4411_v58 = vpack.c.bf16 %v1634_v49, %v1612_v48  ;;  %v1808_v38 = vld [vmem:[#allocation16 + $0x21b8] sm:$0xff]  ;;  %v1807_v45 = vld [vmem:[#allocation16 + $0x21b0] sm:$0xff] }
 0x34a   :  { %vm709_vm10 = vcmp.ge.f32.partialorder %v625_v10, 0.0  ;;  %v718_v19 = vmul.f32 %v6205_v51, %v625_v10  ;;  %2318 = vmatmul.mubr.f32.vlgmr.msra.gmra.mrb[2].mxu0 %v6212_v16  ;;  %2472 = vmatmul.mubr.f32.vlgmr.msra.gmra.mrb[12].mxu1 %v6212_v16  ;;  %v1788_v39 = vld [vmem:[#allocation16 + $0x2118] sm:$0xff]  ;;  %v1787_v49 = vld [vmem:[#allocation16 + $0x2110] sm:$0xff] }
 0x34b   :  { %4270 = vmatpush1.bf16.msra.mxu0 %v4269_v5  ;;  %4398 = vmatpush1.bf16.msra.mxu1 %v4397_v6  ;;  %v6223_v31 = vsel %vm708_vm9, %v623_v3, %v717_v17  ;;  %v1653_v3 = vld [vmem:[#allocation16 + $0x1ce0] sm:$0xff]  ;;  %v4287_v5 = vpack.c.bf16 %v1676_v62, %v1654_v61  ;;  %v4415_v6 = vpack.c.bf16 %v1678_v0, %v1656_v63  ;;  %v1852_v54 = vld [vmem:[#allocation16 + $0x2318] sm:$0xff]  ;;  %v1851_v61 = vld [vmem:[#allocation16 + $0x2310] sm:$0xff] }
 0x34c   :  { %v6220_v25 = vsel %vm709_vm10, %v625_v10, %v718_v19  ;;  %4272 = vmatprep.subr.bf16.mxu0 %v4271_v11  ;;  %4400 = vmatprep.subr.bf16.mxu1 %v4399_v12  ;;  %v1698_v10 = vld [vmem:[#allocation16 + $0x1e48] sm:$0xff]  ;;  %v1720_v11 = vld [vmem:[#allocation16 + $0x1ef8] sm:$0xff]  ;;  %v4289_v14 = vpack.c.bf16 %v1675_v4, %v1653_v3  ;;  %v1697_v17 = vld [vmem:[#allocation16 + $0x1e40] sm:$0xff] }
 0x34d   :  { %2323 = vmatprep.mubr.f32.mxu0 %v6220_v25  ;;  %2477 = vmatprep.mubr.f32.mxu1 %v6220_v25  ;;  %v1700_v12 = vld [vmem:[#allocation16 + $0x1e58] sm:$0xff]  ;;  %v4291_v24 = vpack.c.bf16 %v1720_v11, %v1698_v10  ;;  %v1699_v19 = vld [vmem:[#allocation16 + $0x1e50] sm:$0xff] }
 0x34e   :  { %2324 = vmatmul.mubr.f32.gmra.mrb[4].mxu0 %v6223_v31  ;;  %2478 = vmatmul.mubr.f32.gmra.mrb[14].mxu1 %v6223_v31  ;;  %v4419_v30 = vpack.c.bf16 %v1722_v13, %v1700_v12  ;;  %v1832_v56 = vld [vmem:[#allocation16 + $0x2278] sm:$0xff]  ;;  %v1831_v0 = vld [vmem:[#allocation16 + $0x2270] sm:$0xff] }
 0x34f   :  { %4274 = vmatpush1.bf16.msra.mxu0 %v4273_v20  ;;  %4402 = vmatpush1.bf16.msra.mxu1 %v4401_v21  ;;  %v1721_v20 = vld [vmem:[#allocation16 + $0x1f00] sm:$0xff]  ;;  %v1742_v21 = vld [vmem:[#allocation16 + $0x1fa8] sm:$0xff]  ;;  %v1896_v3 = vld [vmem:[#allocation16 + $0x2478] sm:$0xff] }
 0x350   :  { %4276 = vmatprep.subr.bf16.mxu0 %v4275_v34  ;;  %4404 = vmatprep.subr.bf16.mxu1 %v4403_v26  ;;  %v1766_v34 = vld [vmem:[#allocation16 + $0x2068] sm:$0xff]  ;;  %v4293_v26 = vpack.c.bf16 %v1719_v18, %v1697_v17  ;;  %v4421_v27 = vpack.c.bf16 %v1721_v20, %v1699_v19  ;;  %v4295_v32 = vpack.c.bf16 %v1764_v22, %v1742_v21  ;;  %v1876_v4 = vld [vmem:[#allocation16 + $0x23d8] sm:$0xff]  ;;  %v1895_v10 = vld [vmem:[#allocation16 + $0x2470] sm:$0xff] }
 0x351   :  { %v4423_v33 = vpack.c.bf16 %v1766_v34, %v1744_v23  ;;  %v1875_v13 = vld [vmem:[#allocation16 + $0x23d0] sm:$0xff]  ;;  %v1940_v17 = vld [vmem:[#allocation16 + $0x25d8] sm:$0xff]  ;;  %v1917_v20 = vld [vmem:[#allocation16 + $0x2520] sm:$0xff] }
 0x352   :  { %v1920_v18 = vld [vmem:[#allocation16 + $0x2538] sm:$0xff]  ;;  %v1939_v21 = vld [vmem:[#allocation16 + $0x25d0] sm:$0xff] }
 0x353   :  { %4278 = vmatpush1.bf16.msra.mxu0 %v4277_v36  ;;  %4406 = vmatpush1.bf16.msra.mxu1 %v4405_v37  ;;  %v1765_v36 = vld [vmem:[#allocation16 + $0x2060] sm:$0xff]  ;;  %v1786_v37 = vld [vmem:[#allocation16 + $0x2108] sm:$0xff]  ;;  %v1919_v34 = vld [vmem:[#allocation16 + $0x2530] sm:$0xff] }
 0x354   :  { %4280 = vmatprep.subr.bf16.mxu0 %v4279_v40  ;;  %4408 = vmatprep.subr.bf16.mxu1 %v4407_v41  ;;  %v1810_v40 = vld [vmem:[#allocation16 + $0x21c8] sm:$0xff]  ;;  %v4297_v41 = vpack.c.bf16 %v1763_v29, %v1741_v28  ;;  %v4425_v42 = vpack.c.bf16 %v1765_v36, %v1743_v35  ;;  %v4299_v47 = vpack.c.bf16 %v1808_v38, %v1786_v37  ;;  %v1984_v28 = vld [vmem:[#allocation16 + $0x2738] sm:$0xff]  ;;  %v1961_v36 = vld [vmem:[#allocation16 + $0x2680] sm:$0xff] }
 0x355   :  { %v4427_v48 = vpack.c.bf16 %v1810_v40, %v1788_v39  ;;  %v1964_v29 = vld [vmem:[#allocation16 + $0x2698] sm:$0xff]  ;;  %v1983_v37 = vld [vmem:[#allocation16 + $0x2730] sm:$0xff] }
 0x356   :  { %v1963_v40 = vld [vmem:[#allocation16 + $0x2690] sm:$0xff] }
 0x357   :  { %4282 = vmatpush1.bf16.msra.mxu0 %v4281_v52  ;;  %4410 = vmatpush1.bf16.msra.mxu1 %v4409_v53  ;;  %v1809_v52 = vld [vmem:[#allocation16 + $0x21c0] sm:$0xff]  ;;  %v1830_v53 = vld [vmem:[#allocation16 + $0x2268] sm:$0xff] }
 0x358   :  { %4284 = vmatprep.subr.bf16.mxu0 %v4283_v57  ;;  %4412 = vmatprep.subr.bf16.mxu1 %v4411_v58  ;;  %v1854_v57 = vld [vmem:[#allocation16 + $0x2328] sm:$0xff]  ;;  %v4301_v58 = vpack.c.bf16 %v1807_v45, %v1785_v44  ;;  %v4429_v59 = vpack.c.bf16 %v1809_v52, %v1787_v49  ;;  %v4303_v62 = vpack.c.bf16 %v1852_v54, %v1830_v53  ;;  %v2028_v44 = vld [vmem:[#allocation16 + $0x2898] sm:$0xff]  ;;  %v2005_v52 = vld [vmem:[#allocation16 + $0x27e0] sm:$0xff] }
 0x359   :  { %v4431_v63 = vpack.c.bf16 %v1854_v57, %v1832_v56  ;;  %v2008_v45 = vld [vmem:[#allocation16 + $0x27f8] sm:$0xff]  ;;  %v2027_v53 = vld [vmem:[#allocation16 + $0x2890] sm:$0xff] }
 0x35a   :  { %v2007_v57 = vld [vmem:[#allocation16 + $0x27f0] sm:$0xff] }
 0x35b   :  { %4286 = vmatpush1.bf16.msra.mxu0 %v4285_v1  ;;  %4414 = vmatpush1.bf16.msra.mxu1 %v4413_v2  ;;  %v1853_v1 = vld [vmem:[#allocation16 + $0x2320] sm:$0xff]  ;;  %v1874_v2 = vld [vmem:[#allocation16 + $0x23c8] sm:$0xff] }
 0x35c   :  { %4288 = vmatprep.subr.bf16.mxu0 %v4287_v5  ;;  %4416 = vmatprep.subr.bf16.mxu1 %v4415_v6  ;;  %v1898_v5 = vld [vmem:[#allocation16 + $0x2488] sm:$0xff]  ;;  %v4305_v6 = vpack.c.bf16 %v1851_v61, %v1829_v60  ;;  %v4433_v7 = vpack.c.bf16 %v1853_v1, %v1831_v0  ;;  %v4307_v11 = vpack.c.bf16 %v1896_v3, %v1874_v2  ;;  %v2072_v60 = vld [vmem:[#allocation16 + $0x29f8] sm:$0xff]  ;;  %v6230_v1 = vsub.s32 2, %v6177_v43  ;;  %v2049_v2 = vld [vmem:[#allocation16 + $0x2940] sm:$0xff] }
 0x35d   :  { %v4435_v12 = vpack.c.bf16 %v1898_v5, %v1876_v4  ;;  %v2052_v61 = vld [vmem:[#allocation16 + $0x2958] sm:$0xff]  ;;  %v2071_v3 = vld [vmem:[#allocation16 + $0x29f0] sm:$0xff] }
 0x35f   :  { %4290 = vmatpush1.bf16.msra.mxu0 %v4289_v14  ;;  %4418 = vmatpush1.bf16.msra.mxu1 %v4417_v15  ;;  %v1897_v14 = vld [vmem:[#allocation16 + $0x2480] sm:$0xff]  ;;  %v1918_v15 = vld [vmem:[#allocation16 + $0x2528] sm:$0xff] }
 0x360   :  { %4292 = vmatprep.subr.bf16.mxu0 %v4291_v24  ;;  %4420 = vmatprep.subr.bf16.mxu1 %v4419_v30  ;;  %v1942_v24 = vld [vmem:[#allocation16 + $0x25e8] sm:$0xff]  ;;  %v4309_v30 = vpack.c.bf16 %v1895_v10, %v1873_v8  ;;  %v4437_v19 = vpack.c.bf16 %v1897_v14, %v1875_v13  ;;  %v4311_v22 = vpack.c.bf16 %v1940_v17, %v1918_v15  ;;  %v2073_v8 = vld [vmem:[#allocation16 + $0x2a00] sm:$0xff] }
 0x361   :  { %v4439_v23 = vpack.c.bf16 %v1942_v24, %v1920_v18  ;;  %v2094_v10 = vld [vmem:[#allocation16 + $0x2aa8] sm:$0xff]  ;;  %v541_v14 = vrot.slane %v6199_v46, %v6230_v1  ;;  %v4325_v15 = vpack.c.bf16 %v2071_v3, %v2049_v2  ;;  %v2093_v18 = vld [vmem:[#allocation16 + $0x2aa0] sm:$0xff]  ;;  %v2115_v24 = vld [vmem:[#allocation16 + $0x2b50] sm:$0xff] }
 0x362   :  { %v2118_v13 = vld [vmem:[#allocation16 + $0x2b68] sm:$0xff]  ;;  %v779_v3 = vld [vmem:[#allocation16 + $0x190] sm:$0xff] }
 0x363   :  { %4294 = vmatpush1.bf16.msra.mxu0 %v4293_v26  ;;  %4422 = vmatpush1.bf16.msra.mxu1 %v4421_v27  ;;  %v1941_v26 = vld [vmem:[#allocation16 + $0x25e0] sm:$0xff]  ;;  %v1962_v27 = vld [vmem:[#allocation16 + $0x2688] sm:$0xff] }
 0x364   :  { %4296 = vmatprep.subr.bf16.mxu0 %v4295_v32  ;;  %4424 = vmatprep.subr.bf16.mxu1 %v4423_v33  ;;  %v1986_v32 = vld [vmem:[#allocation16 + $0x2748] sm:$0xff]  ;;  %v4313_v33 = vpack.c.bf16 %v1939_v21, %v1917_v20  ;;  %v4441_v35 = vpack.c.bf16 %v1941_v26, %v1919_v34  ;;  %v4315_v38 = vpack.c.bf16 %v1984_v28, %v1962_v27  ;;  %v2095_v21 = vld [vmem:[#allocation16 + $0x2ab0] sm:$0xff]  ;;  %v756_v34 = vld [vmem:[#allocation16 + $0xd8] sm:$0xff] }
 0x365   :  { %v4443_v39 = vpack.c.bf16 %v1986_v32, %v1964_v29  ;;  %v736_v26 = vld [vmem:[#allocation16 + $0x38] sm:$0xff]  ;;  %v758_v27 = vld [vmem:[#allocation16 + $0xe8] sm:$0xff] }
 0x367   :  { %4298 = vmatpush1.bf16.msra.mxu0 %v4297_v41  ;;  %4426 = vmatpush1.bf16.msra.mxu1 %v4425_v42  ;;  %v1985_v41 = vld [vmem:[#allocation16 + $0x2740] sm:$0xff]  ;;  %v2006_v42 = vld [vmem:[#allocation16 + $0x27e8] sm:$0xff] }
 0x368   :  { %4300 = vmatprep.subr.bf16.mxu0 %v4299_v47  ;;  %4428 = vmatprep.subr.bf16.mxu1 %v4427_v48  ;;  %v2030_v47 = vld [vmem:[#allocation16 + $0x28a8] sm:$0xff]  ;;  %v4317_v48 = vpack.c.bf16 %v1983_v37, %v1961_v36  ;;  %v4445_v49 = vpack.c.bf16 %v1985_v41, %v1963_v40  ;;  %v4319_v54 = vpack.c.bf16 %v2028_v44, %v2006_v42  ;;  %v733_v36 = vld [vmem:[#allocation16 + $0x20] sm:$0xff]  ;;  %v755_v37 = vld [vmem:[#allocation16 + $0xd0] sm:$0xff] }
 0x369   :  { %v4447_v56 = vpack.c.bf16 %v2030_v47, %v2008_v45  ;;  %v4587_v40 = vpack.c.bf16 %v758_v27, %v736_v26  ;;  %v757_v41 = vld [vmem:[#allocation16 + $0xe0] sm:$0xff]  ;;  %v778_v42 = vld [vmem:[#allocation16 + $0x188] sm:$0xff]  ;;  %v800_v44 = vld [vmem:[#allocation16 + $0x238] sm:$0xff] }
 0x36a   :  { %v780_v47 = vld [vmem:[#allocation16 + $0x198] sm:$0xff] }
 0x36b   :  { %4302 = vmatpush1.bf16.msra.mxu0 %v4301_v58  ;;  %4430 = vmatpush1.bf16.msra.mxu1 %v4429_v59  ;;  %v2029_v58 = vld [vmem:[#allocation16 + $0x28a0] sm:$0xff]  ;;  %v2050_v59 = vld [vmem:[#allocation16 + $0x2948] sm:$0xff] }
 0x36c   :  { %4304 = vmatprep.subr.bf16.mxu0 %v4303_v62  ;;  %4432 = vmatprep.subr.bf16.mxu1 %v4431_v63  ;;  %v2074_v62 = vld [vmem:[#allocation16 + $0x2a08] sm:$0xff]  ;;  %v4321_v63 = vpack.c.bf16 %v2027_v53, %v2005_v52  ;;  %v4449_v0 = vpack.c.bf16 %v2029_v58, %v2007_v57  ;;  %v4323_v4 = vpack.c.bf16 %v2072_v60, %v2050_v59 }
 0x36d   :  { %v4451_v5 = vpack.c.bf16 %v2074_v62, %v2052_v61  ;;  %v4461_v53 = vpack.c.bf16 %v755_v37, %v733_v36  ;;  %v4463_v58 = vpack.c.bf16 %v800_v44, %v778_v42  ;;  %v777_v62 = vld [vmem:[#allocation16 + $0x180] sm:$0xff]  ;;  %v910_v36 = vld [vmem:[#allocation16 + $0x5a8] sm:$0xff]  ;;  %v932_v37 = vld [vmem:[#allocation16 + $0x658] sm:$0xff] }
 0x36e   :  { %v909_v42 = vld [vmem:[#allocation16 + $0x5a0] sm:$0xff]  ;;  %v931_v44 = vld [vmem:[#allocation16 + $0x650] sm:$0xff] }
 0x36f   :  { %4306 = vmatpush1.bf16.msra.mxu0 %v4305_v6  ;;  %4434 = vmatpush1.bf16.msra.mxu1 %v4433_v7  ;;  %v6233_v6 = vsub.s32 3, %v6177_v43  ;;  %v2051_v7 = vld [vmem:[#allocation16 + $0x2950] sm:$0xff] }
 0x370   :  { %4308 = vmatprep.subr.bf16.mxu0 %v4307_v11  ;;  %4436 = vmatprep.subr.bf16.mxu1 %v4435_v12  ;;  %v2116_v11 = vld [vmem:[#allocation16 + $0x2b58] sm:$0xff]  ;;  %v4453_v17 = vpack.c.bf16 %v2073_v8, %v2051_v7 }
 0x371   :  { %v2096_v12 = vld [vmem:[#allocation16 + $0x2ab8] sm:$0xff] }
 0x372   :  { %v4455_v20 = vpack.c.bf16 %v2118_v13, %v2096_v12  ;;  %v844_v8 = vld [vmem:[#allocation16 + $0x398] sm:$0xff] }
 0x373   :  { %4310 = vmatpush1.bf16.msra.mxu0 %v4309_v30  ;;  %4438 = vmatpush1.bf16.msra.mxu1 %v4437_v19  ;;  %v545_v30 = vrot.slane %v6199_v46, %v6233_v6  ;;  %v4327_v19 = vpack.c.bf16 %v2116_v11, %v2094_v10  ;;  %v824_v10 = vld [vmem:[#allocation16 + $0x2f8] sm:$0xff]  ;;  %v846_v11 = vld [vmem:[#allocation16 + $0x3a8] sm:$0xff] }
 0x374   :  { %4312 = vmatprep.subr.bf16.mxu0 %v4311_v22  ;;  %4440 = vmatprep.subr.bf16.mxu1 %v4439_v23  ;;  %v2117_v22 = vld [vmem:[#allocation16 + $0x2b60] sm:$0xff]  ;;  %v734_v23 = vld [vmem:[#allocation16 + $0x28] sm:$0xff] }
 0x375   :  { %v4459_v46 = vpack.c.bf16 %v756_v34, %v734_v23  ;;  %v890_v23 = vld [vmem:[#allocation16 + $0x508] sm:$0xff] }
 0x377   :  { %4314 = vmatpush1.bf16.msra.mxu0 %v4313_v33  ;;  %4442 = vmatpush1.bf16.msra.mxu1 %v4441_v35  ;;  %v4329_v33 = vpack.c.bf16 %v2115_v24, %v2093_v18  ;;  %v4457_v35 = vpack.c.bf16 %v2117_v22, %v2095_v21  ;;  %v823_v18 = vld [vmem:[#allocation16 + $0x2f0] sm:$0xff]  ;;  %v888_v21 = vld [vmem:[#allocation16 + $0x4f8] sm:$0xff] }
 0x378   :  { %4316 = vmatprep.subr.bf16.mxu0 %v4315_v38  ;;  %4444 = vmatprep.subr.bf16.mxu1 %v4443_v39  ;;  %v735_v38 = vld [vmem:[#allocation16 + $0x30] sm:$0xff]  ;;  %v868_v22 = vld [vmem:[#allocation16 + $0x458] sm:$0xff] }
 0x379   :  { %v4589_v57 = vpack.c.bf16 %v757_v41, %v735_v38  ;;  %v912_v38 = vld [vmem:[#allocation16 + $0x5b8] sm:$0xff]  ;;  %v4475_v41 = vpack.c.bf16 %v932_v37, %v910_v36  ;;  %v1110_v36 = vld [vmem:[#allocation16 + $0xbe8] sm:$0xff] }
 0x37b   :  { %4318 = vmatpush1.bf16.msra.mxu0 %v4317_v48  ;;  %4446 = vmatpush1.bf16.msra.mxu1 %v4445_v49  ;;  %v802_v48 = vld [vmem:[#allocation16 + $0x248] sm:$0xff] }
 0x37c   :  { %4320 = vmatprep.subr.bf16.mxu0 %v4319_v54  ;;  %4448 = vmatprep.subr.bf16.mxu1 %v4447_v56  ;;  %v4591_v61 = vpack.c.bf16 %v802_v48, %v780_v47  ;;  %v933_v48 = vld [vmem:[#allocation16 + $0x660] sm:$0xff] }
 0x37f   :  { %4322 = vmatpush1.bf16.msra.mxu0 %v4321_v63  ;;  %4450 = vmatpush1.bf16.msra.mxu1 %v4449_v0  ;;  %v799_v63 = vld [vmem:[#allocation16 + $0x230] sm:$0xff] }
 0x380   :  { %4324 = vmatprep.subr.bf16.mxu0 %v4323_v4  ;;  %4452 = vmatprep.subr.bf16.mxu1 %v4451_v5  ;;  %v801_v4 = vld [vmem:[#allocation16 + $0x240] sm:$0xff]  ;;  %v822_v5 = vld [vmem:[#allocation16 + $0x2e8] sm:$0xff]  ;;  %v4465_v12 = vpack.c.bf16 %v799_v63, %v777_v62  ;;  %v955_v62 = vld [vmem:[#allocation16 + $0x710] sm:$0xff] }
 0x381   :  { %v4467_v24 = vpack.c.bf16 %v844_v8, %v822_v5  ;;  %v1000_v5 = vld [vmem:[#allocation16 + $0x878] sm:$0xff] }
 0x382   :  { %v693_v28 = vpop.f32.mrb[8].mxu1 }
 0x383   :  { %v694_v29 = vadd.f32 %v693_v28, %v541_v14  ;;  %v695_v32 = vpop.f32.mrb[9].mxu1  ;;  %4326 = vmatpush1.bf16.msra.mxu0 %v4325_v15  ;;  %4454 = vmatpush1.bf16.msra.mxu1 %v4453_v17  ;;  %v821_v15 = vld [vmem:[#allocation16 + $0x2e0] sm:$0xff]  ;;  %v843_v17 = vld [vmem:[#allocation16 + $0x390] sm:$0xff] }
 0x384   :  { %v696_v39 = vadd.f32 %v695_v32, %v545_v30  ;;  %4328 = vmatprep.subr.bf16.mxu0 %v4327_v19  ;;  %4456 = vmatprep.subr.bf16.mxu1 %v4455_v20  ;;  %v845_v19 = vld [vmem:[#allocation16 + $0x3a0] sm:$0xff]  ;;  %v866_v20 = vld [vmem:[#allocation16 + $0x448] sm:$0xff]  ;;  %v4469_v34 = vpack.c.bf16 %v843_v17, %v821_v15  ;;  %v867_v32 = vld [vmem:[#allocation16 + $0x450] sm:$0xff] }
 0x385   :  { %v715_v45 = vmul.f32 %v6205_v51, %v694_v29  ;;  %vm706_vm11 = vcmp.ge.f32.partialorder %v694_v29, 0.0  ;;  %v4597_v26 = vpack.c.bf16 %v845_v19, %v823_v18  ;;  %v4471_v27 = vpack.c.bf16 %v888_v21, %v866_v20  ;;  %v865_v28 = vld [vmem:[#allocation16 + $0x440] sm:$0xff]  ;;  %v999_v15 = vld [vmem:[#allocation16 + $0x870] sm:$0xff]  ;;  %v1044_v19 = vld [vmem:[#allocation16 + $0x9d8] sm:$0xff] }
 0x386   :  { %vm707_vm12 = vcmp.ge.f32.partialorder %v696_v39, 0.0  ;;  %v716_v49 = vmul.f32 %v6205_v51, %v696_v39  ;;  %v699_v52 = vpop.f32.mrb[10].mxu1  ;;  %v1021_v18 = vld [vmem:[#allocation16 + $0x920] sm:$0xff]  ;;  %v1066_v20 = vld [vmem:[#allocation16 + $0xa88] sm:$0xff] }
 0x387   :  { %v700_v54 = vadd.f32 %v699_v52, %v541_v14  ;;  %v701_v56 = vpop.f32.mrb[11].mxu1  ;;  %4330 = vmatpush1.bf16.msra.mxu0 %v4329_v33  ;;  %4458 = vmatpush1.bf16.msra.mxu1 %v4457_v35  ;;  %v6244_v0 = vsel %vm706_vm11, %v694_v29, %v715_v45  ;;  %v4593_v14 = vpack.c.bf16 %v801_v4, %v779_v3  ;;  %v887_v29 = vld [vmem:[#allocation16 + $0x4f0] sm:$0xff]  ;;  %v889_v35 = vld [vmem:[#allocation16 + $0x500] sm:$0xff]  ;;  %v976_v52 = vld [vmem:[#allocation16 + $0x7b8] sm:$0xff] }
 0x388   :  { %v6241_v59 = vsel %vm707_vm12, %v696_v39, %v716_v49  ;;  %v702_v60 = vadd.f32 %v701_v56, %v545_v30  ;;  %4460 = vmatprep.subr.bf16.mxu0 %v4459_v46  ;;  %4588 = vmatprep.subr.bf16.mxu1 %v4587_v40  ;;  %v4595_v30 = vpack.c.bf16 %v846_v11, %v824_v10  ;;  %v934_v39 = vld [vmem:[#allocation16 + $0x668] sm:$0xff]  ;;  %v911_v45 = vld [vmem:[#allocation16 + $0x5b0] sm:$0xff]  ;;  %v1020_v4 = vld [vmem:[#allocation16 + $0x918] sm:$0xff] }
 0x389   :  { %v719_v2 = vmul.f32 %v6205_v51, %v700_v54  ;;  %2394 = vmatprep.mubr.f32.mxu0 %v6241_v59  ;;  %2548 = vmatprep.mubr.f32.mxu1 %v6241_v59  ;;  %vm710_vm13 = vcmp.ge.f32.partialorder %v700_v54, 0.0  ;;  %v4599_v33 = vpack.c.bf16 %v890_v23, %v868_v22  ;;  %v4473_v46 = vpack.c.bf16 %v887_v29, %v865_v28  ;;  %v954_v49 = vld [vmem:[#allocation16 + $0x708] sm:$0xff]  ;;  %v1065_v29 = vld [vmem:[#allocation16 + $0xa80] sm:$0xff] }
 0x38a   :  { %vm711_vm14 = vcmp.ge.f32.partialorder %v702_v60, 0.0  ;;  %v720_v7 = vmul.f32 %v6205_v51, %v702_v60  ;;  %2395 = vmatmul.mubr.f32.vlgmr.msra.gmra.mrb[2].mxu0 %v6244_v0  ;;  %2549 = vmatmul.mubr.f32.vlgmr.msra.gmra.mrb[12].mxu1 %v6244_v0  ;;  %v4601_v40 = vpack.c.bf16 %v889_v35, %v867_v32  ;;  %v4603_v47 = vpack.c.bf16 %v934_v39, %v912_v38  ;;  %v998_v3 = vld [vmem:[#allocation16 + $0x868] sm:$0xff]  ;;  %v1088_v35 = vld [vmem:[#allocation16 + $0xb38] sm:$0xff] }
 0x38b   :  { %4462 = vmatpush1.bf16.msra.mxu0 %v4461_v53  ;;  %4590 = vmatpush1.bf16.msra.mxu1 %v4589_v57  ;;  %v6255_v51 = vsel %vm710_vm13, %v700_v54, %v719_v2  ;;  %v956_v53 = vld [vmem:[#allocation16 + $0x718] sm:$0xff]  ;;  %v978_v54 = vld [vmem:[#allocation16 + $0x7c8] sm:$0xff]  ;;  %v4477_v56 = vpack.c.bf16 %v931_v44, %v909_v42  ;;  %v4605_v57 = vpack.c.bf16 %v933_v48, %v911_v45  ;;  %v977_v2 = vld [vmem:[#allocation16 + $0x7c0] sm:$0xff] }
 0x38c   :  { %v6252_v13 = vsel %vm711_vm14, %v702_v60, %v720_v7  ;;  %4464 = vmatprep.subr.bf16.mxu0 %v4463_v58  ;;  %4592 = vmatprep.subr.bf16.mxu1 %v4591_v61  ;;  %v4479_v58 = vpack.c.bf16 %v976_v52, %v954_v49  ;;  %v953_v60 = vld [vmem:[#allocation16 + $0x700] sm:$0xff]  ;;  %v975_v61 = vld [vmem:[#allocation16 + $0x7b0] sm:$0xff]  ;;  %v4607_v63 = vpack.c.bf16 %v978_v54, %v956_v53  ;;  %v1022_v7 = vld [vmem:[#allocation16 + $0x928] sm:$0xff] }
 0x38d   :  { %2400 = vmatprep.mubr.f32.mxu0 %v6252_v13  ;;  %2554 = vmatprep.mubr.f32.mxu1 %v6252_v13  ;;  %v4481_v8 = vpack.c.bf16 %v975_v61, %v953_v60  ;;  %v4609_v10 = vpack.c.bf16 %v977_v2, %v955_v62  ;;  %v4483_v11 = vpack.c.bf16 %v1020_v4, %v998_v3  ;;  %v1086_v32 = vld [vmem:[#allocation16 + $0xb28] sm:$0xff]  ;;  %v1109_v44 = vld [vmem:[#allocation16 + $0xbe0] sm:$0xff]  ;;  %v1132_v48 = vld [vmem:[#allocation16 + $0xc98] sm:$0xff] }
 0x38e   :  { %2401 = vmatmul.mubr.f32.gmra.mrb[4].mxu0 %v6255_v51  ;;  %2555 = vmatmul.mubr.f32.gmra.mrb[14].mxu1 %v6255_v51  ;;  %v4611_v17 = vpack.c.bf16 %v1022_v7, %v1000_v5  ;;  %v4613_v22 = vpack.c.bf16 %v1021_v18, %v999_v15  ;;  %v4615_v28 = vpack.c.bf16 %v1066_v20, %v1044_v19  ;;  %v1130_v45 = vld [vmem:[#allocation16 + $0xc88] sm:$0xff]  ;;  %v1153_v61 = vld [vmem:[#allocation16 + $0xd40] sm:$0xff]  ;;  %v1176_v2 = vld [vmem:[#allocation16 + $0xdf8] sm:$0xff] }
 0x38f   :  { %4466 = vmatpush1.bf16.msra.mxu0 %v4465_v12  ;;  %2625 = vmatprep.mubr.f32.mxu0 %v6209_v9  ;;  %v997_v12 = vld [vmem:[#allocation16 + $0x860] sm:$0xff]  ;;  %v4619_v42 = vpack.c.bf16 %v1110_v36, %v1088_v35  ;;  %v1154_v49 = vld [vmem:[#allocation16 + $0xd48] sm:$0xff]  ;;  %v1220_v18 = vld [vmem:[#allocation16 + $0xf58] sm:$0xff] }
 0x390   :  { %4594 = vmatpush1.bf16.msra.mxu1 %v4593_v14  ;;  %2779 = vmatprep.mubr.f32.mxu1 %v6209_v9  ;;  %v1019_v14 = vld [vmem:[#allocation16 + $0x910] sm:$0xff]  ;;  %v4623_v60 = vpack.c.bf16 %v1154_v49, %v1132_v48  ;;  %v1174_v62 = vld [vmem:[#allocation16 + $0xde8] sm:$0xff] }
 0x391   :  { %4468 = vmatprep.subr.bf16.mxu0 %v4467_v24  ;;  %4596 = vmatprep.subr.bf16.mxu1 %v4595_v30  ;;  %v1042_v24 = vld [vmem:[#allocation16 + $0x9c8] sm:$0xff]  ;;  %v1064_v30 = vld [vmem:[#allocation16 + $0xa78] sm:$0xff]  ;;  %v4485_v21 = vpack.c.bf16 %v1019_v14, %v997_v12  ;;  %v1197_v14 = vld [vmem:[#allocation16 + $0xea0] sm:$0xff] }
 0x392   :  { %v4487_v23 = vpack.c.bf16 %v1064_v30, %v1042_v24  ;;  %v1198_v3 = vld [vmem:[#allocation16 + $0xea8] sm:$0xff] }
 0x393   :  { %4470 = vmatpush1.bf16.msra.mxu0 %v4469_v34  ;;  %v1041_v34 = vld [vmem:[#allocation16 + $0x9c0] sm:$0xff]  ;;  %v4627_v12 = vpack.c.bf16 %v1198_v3, %v1176_v2  ;;  %v1218_v15 = vld [vmem:[#allocation16 + $0xf48] sm:$0xff] }
 0x394   :  { %4598 = vmatpush1.bf16.msra.mxu1 %v4597_v26  ;;  %4472 = vmatprep.subr.bf16.mxu0 %v4471_v27  ;;  %v1063_v26 = vld [vmem:[#allocation16 + $0xa70] sm:$0xff]  ;;  %v1242_v24 = vld [vmem:[#allocation16 + $0x1008] sm:$0xff] }
 0x395   :  { %4600 = vmatprep.subr.bf16.mxu1 %v4599_v33  ;;  %v1043_v27 = vld [vmem:[#allocation16 + $0x9d0] sm:$0xff]  ;;  %v1108_v33 = vld [vmem:[#allocation16 + $0xbd8] sm:$0xff]  ;;  %v4489_v37 = vpack.c.bf16 %v1063_v26, %v1041_v34  ;;  %v4631_v34 = vpack.c.bf16 %v1242_v24, %v1220_v18  ;;  %v1241_v26 = vld [vmem:[#allocation16 + $0x1000] sm:$0xff] }
 0x396   :  { %v4617_v38 = vpack.c.bf16 %v1065_v29, %v1043_v27  ;;  %v4491_v39 = vpack.c.bf16 %v1108_v33, %v1086_v32  ;;  %v1262_v27 = vld [vmem:[#allocation16 + $0x10a8] sm:$0xff]  ;;  %v1264_v29 = vld [vmem:[#allocation16 + $0x10b8] sm:$0xff] }
 0x397   :  { %4474 = vmatpush1.bf16.msra.mxu0 %v4473_v46  ;;  %v1085_v46 = vld [vmem:[#allocation16 + $0xb20] sm:$0xff]  ;;  %v1286_v32 = vld [vmem:[#allocation16 + $0x1168] sm:$0xff] }
 0x398   :  { %4602 = vmatpush1.bf16.msra.mxu1 %v4601_v40  ;;  %4476 = vmatprep.subr.bf16.mxu0 %v4475_v41  ;;  %v1107_v40 = vld [vmem:[#allocation16 + $0xbd0] sm:$0xff] }
 0x399   :  { %4604 = vmatprep.subr.bf16.mxu1 %v4603_v47  ;;  %v1087_v41 = vld [vmem:[#allocation16 + $0xb30] sm:$0xff]  ;;  %v1152_v47 = vld [vmem:[#allocation16 + $0xd38] sm:$0xff]  ;;  %v4493_v52 = vpack.c.bf16 %v1107_v40, %v1085_v46  ;;  %v4635_v46 = vpack.c.bf16 %v1286_v32, %v1264_v29  ;;  %v1285_v40 = vld [vmem:[#allocation16 + $0x1160] sm:$0xff] }
 0x39a   :  { %v4621_v53 = vpack.c.bf16 %v1109_v44, %v1087_v41  ;;  %v4495_v54 = vpack.c.bf16 %v1152_v47, %v1130_v45  ;;  %v1306_v41 = vld [vmem:[#allocation16 + $0x1208] sm:$0xff]  ;;  %v1308_v44 = vld [vmem:[#allocation16 + $0x1218] sm:$0xff] }
 0x39b   :  { %4478 = vmatpush1.bf16.msra.mxu0 %v4477_v56  ;;  %v1129_v56 = vld [vmem:[#allocation16 + $0xc80] sm:$0xff]  ;;  %v1330_v45 = vld [vmem:[#allocation16 + $0x12c8] sm:$0xff] }
 0x39c   :  { %4606 = vmatpush1.bf16.msra.mxu1 %v4605_v57  ;;  %4480 = vmatprep.subr.bf16.mxu0 %v4479_v58  ;;  %v1151_v57 = vld [vmem:[#allocation16 + $0xd30] sm:$0xff] }
 0x39d   :  { %4608 = vmatprep.subr.bf16.mxu1 %v4607_v63  ;;  %v1131_v58 = vld [vmem:[#allocation16 + $0xc90] sm:$0xff]  ;;  %v1196_v63 = vld [vmem:[#allocation16 + $0xe98] sm:$0xff]  ;;  %v4497_v4 = vpack.c.bf16 %v1151_v57, %v1129_v56  ;;  %v4639_v56 = vpack.c.bf16 %v1330_v45, %v1308_v44  ;;  %v1329_v57 = vld [vmem:[#allocation16 + $0x12c0] sm:$0xff] }
 0x39e   :  { %v4625_v5 = vpack.c.bf16 %v1153_v61, %v1131_v58  ;;  %v4499_v7 = vpack.c.bf16 %v1196_v63, %v1174_v62  ;;  %v1350_v58 = vld [vmem:[#allocation16 + $0x1368] sm:$0xff]  ;;  %v1352_v61 = vld [vmem:[#allocation16 + $0x1378] sm:$0xff] }
 0x39f   :  { %4482 = vmatpush1.bf16.msra.mxu0 %v4481_v8  ;;  %v1173_v8 = vld [vmem:[#allocation16 + $0xde0] sm:$0xff]  ;;  %v1374_v62 = vld [vmem:[#allocation16 + $0x1428] sm:$0xff] }
 0x3a0   :  { %4610 = vmatpush1.bf16.msra.mxu1 %v4609_v10  ;;  %4484 = vmatprep.subr.bf16.mxu0 %v4483_v11  ;;  %v1195_v10 = vld [vmem:[#allocation16 + $0xe90] sm:$0xff] }
 0x3a1   :  { %4612 = vmatprep.subr.bf16.mxu1 %v4611_v17  ;;  %v1175_v11 = vld [vmem:[#allocation16 + $0xdf0] sm:$0xff]  ;;  %v1240_v17 = vld [vmem:[#allocation16 + $0xff8] sm:$0xff]  ;;  %v4501_v30 = vpack.c.bf16 %v1195_v10, %v1173_v8  ;;  %v4643_v8 = vpack.c.bf16 %v1374_v62, %v1352_v61  ;;  %v1373_v10 = vld [vmem:[#allocation16 + $0x1420] sm:$0xff] }
 0x3a2   :  { %v4629_v19 = vpack.c.bf16 %v1197_v14, %v1175_v11  ;;  %v4503_v20 = vpack.c.bf16 %v1240_v17, %v1218_v15  ;;  %v1394_v11 = vld [vmem:[#allocation16 + $0x14c8] sm:$0xff]  ;;  %v1396_v14 = vld [vmem:[#allocation16 + $0x14d8] sm:$0xff] }
 0x3a3   :  { %4486 = vmatpush1.bf16.msra.mxu0 %v4485_v21  ;;  %v1217_v21 = vld [vmem:[#allocation16 + $0xf40] sm:$0xff]  ;;  %v1418_v15 = vld [vmem:[#allocation16 + $0x1588] sm:$0xff] }
 0x3a4   :  { %4614 = vmatpush1.bf16.msra.mxu1 %v4613_v22  ;;  %4488 = vmatprep.subr.bf16.mxu0 %v4487_v23  ;;  %v1239_v22 = vld [vmem:[#allocation16 + $0xff0] sm:$0xff] }
 0x3a5   :  { %4616 = vmatprep.subr.bf16.mxu1 %v4615_v28  ;;  %v1219_v23 = vld [vmem:[#allocation16 + $0xf50] sm:$0xff]  ;;  %v1284_v28 = vld [vmem:[#allocation16 + $0x1158] sm:$0xff]  ;;  %v4505_v33 = vpack.c.bf16 %v1239_v22, %v1217_v21  ;;  %v4647_v21 = vpack.c.bf16 %v1418_v15, %v1396_v14  ;;  %v1417_v22 = vld [vmem:[#allocation16 + $0x1580] sm:$0xff] }
 0x3a6   :  { %v4633_v35 = vpack.c.bf16 %v1241_v26, %v1219_v23  ;;  %v4507_v36 = vpack.c.bf16 %v1284_v28, %v1262_v27  ;;  %v1438_v23 = vld [vmem:[#allocation16 + $0x1628] sm:$0xff]  ;;  %v1440_v26 = vld [vmem:[#allocation16 + $0x1638] sm:$0xff] }
 0x3a7   :  { %4490 = vmatpush1.bf16.msra.mxu0 %v4489_v37  ;;  %v1261_v37 = vld [vmem:[#allocation16 + $0x10a0] sm:$0xff]  ;;  %v1462_v27 = vld [vmem:[#allocation16 + $0x16e8] sm:$0xff] }
 0x3a8   :  { %4618 = vmatpush1.bf16.msra.mxu1 %v4617_v38  ;;  %4492 = vmatprep.subr.bf16.mxu0 %v4491_v39  ;;  %v1283_v38 = vld [vmem:[#allocation16 + $0x1150] sm:$0xff] }
 0x3a9   :  { %4620 = vmatprep.subr.bf16.mxu1 %v4619_v42  ;;  %v1263_v39 = vld [vmem:[#allocation16 + $0x10b0] sm:$0xff]  ;;  %v1328_v42 = vld [vmem:[#allocation16 + $0x12b8] sm:$0xff]  ;;  %v4509_v47 = vpack.c.bf16 %v1283_v38, %v1261_v37  ;;  %v1461_v38 = vld [vmem:[#allocation16 + $0x16e0] sm:$0xff] }
 0x3aa   :  { %v4637_v48 = vpack.c.bf16 %v1285_v40, %v1263_v39  ;;  %v4511_v49 = vpack.c.bf16 %v1328_v42, %v1306_v41  ;;  %v1439_v37 = vld [vmem:[#allocation16 + $0x1630] sm:$0xff]  ;;  %v1482_v39 = vld [vmem:[#allocation16 + $0x1788] sm:$0xff]  ;;  %v1484_v40 = vld [vmem:[#allocation16 + $0x1798] sm:$0xff] }
 0x3ab   :  { %4494 = vmatpush1.bf16.msra.mxu0 %v4493_v52  ;;  %v1305_v52 = vld [vmem:[#allocation16 + $0x1200] sm:$0xff]  ;;  %v1506_v41 = vld [vmem:[#allocation16 + $0x1848] sm:$0xff]  ;;  %v4653_v44 = vpack.c.bf16 %v1461_v38, %v1439_v37  ;;  %v1680_v37 = vld [vmem:[#allocation16 + $0x1db8] sm:$0xff] }
 0x3ac   :  { %4622 = vmatpush1.bf16.msra.mxu1 %v4621_v53  ;;  %4496 = vmatprep.subr.bf16.mxu0 %v4495_v54  ;;  %v1327_v53 = vld [vmem:[#allocation16 + $0x12b0] sm:$0xff]  ;;  %v1660_v38 = vld [vmem:[#allocation16 + $0x1d18] sm:$0xff] }
 0x3ad   :  { %4624 = vmatprep.subr.bf16.mxu1 %v4623_v60  ;;  %v1307_v54 = vld [vmem:[#allocation16 + $0x1210] sm:$0xff]  ;;  %v1372_v60 = vld [vmem:[#allocation16 + $0x1418] sm:$0xff]  ;;  %v4513_v63 = vpack.c.bf16 %v1327_v53, %v1305_v52  ;;  %v4655_v52 = vpack.c.bf16 %v1506_v41, %v1484_v40  ;;  %v1505_v53 = vld [vmem:[#allocation16 + $0x1840] sm:$0xff] }
 0x3ae   :  { %v4641_v2 = vpack.c.bf16 %v1329_v57, %v1307_v54  ;;  %v4515_v3 = vpack.c.bf16 %v1372_v60, %v1350_v58  ;;  %v1526_v54 = vld [vmem:[#allocation16 + $0x18e8] sm:$0xff]  ;;  %v1528_v57 = vld [vmem:[#allocation16 + $0x18f8] sm:$0xff] }
 0x3af   :  { %4498 = vmatpush1.bf16.msra.mxu0 %v4497_v4  ;;  %v1349_v4 = vld [vmem:[#allocation16 + $0x1360] sm:$0xff]  ;;  %v1550_v58 = vld [vmem:[#allocation16 + $0x19a8] sm:$0xff] }
 0x3b0   :  { %4626 = vmatpush1.bf16.msra.mxu1 %v4625_v5  ;;  %4500 = vmatprep.subr.bf16.mxu0 %v4499_v7  ;;  %v1371_v5 = vld [vmem:[#allocation16 + $0x1410] sm:$0xff] }
 0x3b1   :  { %4628 = vmatprep.subr.bf16.mxu1 %v4627_v12  ;;  %v1351_v7 = vld [vmem:[#allocation16 + $0x1370] sm:$0xff]  ;;  %v1416_v12 = vld [vmem:[#allocation16 + $0x1578] sm:$0xff]  ;;  %v4517_v17 = vpack.c.bf16 %v1371_v5, %v1349_v4  ;;  %v4659_v4 = vpack.c.bf16 %v1550_v58, %v1528_v57  ;;  %v1549_v5 = vld [vmem:[#allocation16 + $0x19a0] sm:$0xff] }
 0x3b2   :  { %v4645_v18 = vpack.c.bf16 %v1373_v10, %v1351_v7  ;;  %v4519_v24 = vpack.c.bf16 %v1416_v12, %v1394_v11  ;;  %v1570_v7 = vld [vmem:[#allocation16 + $0x1a48] sm:$0xff]  ;;  %v1572_v10 = vld [vmem:[#allocation16 + $0x1a58] sm:$0xff] }
 0x3b3   :  { %4502 = vmatpush1.bf16.msra.mxu0 %v4501_v30  ;;  %v1393_v30 = vld [vmem:[#allocation16 + $0x14c0] sm:$0xff]  ;;  %v1594_v11 = vld [vmem:[#allocation16 + $0x1b08] sm:$0xff] }
 0x3b4   :  { %4630 = vmatpush1.bf16.msra.mxu1 %v4629_v19  ;;  %4504 = vmatprep.subr.bf16.mxu0 %v4503_v20  ;;  %v1415_v19 = vld [vmem:[#allocation16 + $0x1570] sm:$0xff] }
 0x3b5   :  { %4632 = vmatprep.subr.bf16.mxu1 %v4631_v34  ;;  %v1395_v20 = vld [vmem:[#allocation16 + $0x14d0] sm:$0xff]  ;;  %v1460_v34 = vld [vmem:[#allocation16 + $0x16d8] sm:$0xff]  ;;  %v4521_v28 = vpack.c.bf16 %v1415_v19, %v1393_v30  ;;  %v4663_v30 = vpack.c.bf16 %v1594_v11, %v1572_v10  ;;  %v1593_v19 = vld [vmem:[#allocation16 + $0x1b00] sm:$0xff] }
 0x3b6   :  { %v4649_v29 = vpack.c.bf16 %v1417_v22, %v1395_v20  ;;  %v4523_v32 = vpack.c.bf16 %v1460_v34, %v1438_v23  ;;  %v1614_v20 = vld [vmem:[#allocation16 + $0x1ba8] sm:$0xff]  ;;  %v1616_v22 = vld [vmem:[#allocation16 + $0x1bb8] sm:$0xff] }
 0x3b7   :  { %4506 = vmatpush1.bf16.msra.mxu0 %v4505_v33  ;;  %v4651_v33 = vpack.c.bf16 %v1462_v27, %v1440_v26  ;;  %v1638_v23 = vld [vmem:[#allocation16 + $0x1c68] sm:$0xff] }
 0x3b8   :  { %4634 = vmatpush1.bf16.msra.mxu1 %v4633_v35  ;;  %4508 = vmatprep.subr.bf16.mxu0 %v4507_v36  ;;  %v1437_v35 = vld [vmem:[#allocation16 + $0x1620] sm:$0xff]  ;;  %v1459_v36 = vld [vmem:[#allocation16 + $0x16d0] sm:$0xff] }
 0x3b9   :  { %4636 = vmatprep.subr.bf16.mxu1 %v4635_v46  ;;  %v1504_v46 = vld [vmem:[#allocation16 + $0x1838] sm:$0xff]  ;;  %v4525_v42 = vpack.c.bf16 %v1459_v36, %v1437_v35  ;;  %v1637_v35 = vld [vmem:[#allocation16 + $0x1c60] sm:$0xff]  ;;  %v1658_v36 = vld [vmem:[#allocation16 + $0x1d08] sm:$0xff] }
 0x3ba   :  { %v4527_v45 = vpack.c.bf16 %v1504_v46, %v1482_v39  ;;  %v1682_v39 = vld [vmem:[#allocation16 + $0x1dc8] sm:$0xff]  ;;  %v4543_v41 = vpack.c.bf16 %v1680_v37, %v1658_v36 }
 0x3bb   :  { %4510 = vmatpush1.bf16.msra.mxu0 %v4509_v47  ;;  %v1481_v47 = vld [vmem:[#allocation16 + $0x1780] sm:$0xff]  ;;  %v1858_v36 = vld [vmem:[#allocation16 + $0x2348] sm:$0xff] }
 0x3bc   :  { %4638 = vmatpush1.bf16.msra.mxu1 %v4637_v48  ;;  %4512 = vmatprep.subr.bf16.mxu0 %v4511_v49  ;;  %v1503_v48 = vld [vmem:[#allocation16 + $0x1830] sm:$0xff] }
 0x3bd   :  { %4640 = vmatprep.subr.bf16.mxu1 %v4639_v56  ;;  %v1483_v49 = vld [vmem:[#allocation16 + $0x1790] sm:$0xff]  ;;  %v1548_v56 = vld [vmem:[#allocation16 + $0x1998] sm:$0xff]  ;;  %v4529_v60 = vpack.c.bf16 %v1503_v48, %v1481_v47  ;;  %v4671_v47 = vpack.c.bf16 %v1682_v39, %v1660_v38  ;;  %v1681_v48 = vld [vmem:[#allocation16 + $0x1dc0] sm:$0xff] }
 0x3be   :  { %v4657_v61 = vpack.c.bf16 %v1505_v53, %v1483_v49  ;;  %v4531_v62 = vpack.c.bf16 %v1548_v56, %v1526_v54  ;;  %v1702_v49 = vld [vmem:[#allocation16 + $0x1e68] sm:$0xff]  ;;  %v1704_v53 = vld [vmem:[#allocation16 + $0x1e78] sm:$0xff] }
 0x3bf   :  { %4514 = vmatpush1.bf16.msra.mxu0 %v4513_v63  ;;  %v1525_v63 = vld [vmem:[#allocation16 + $0x18e0] sm:$0xff]  ;;  %v1726_v54 = vld [vmem:[#allocation16 + $0x1f28] sm:$0xff] }
 0x3c0   :  { %4642 = vmatpush1.bf16.msra.mxu1 %v4641_v2  ;;  %4516 = vmatprep.subr.bf16.mxu0 %v4515_v3  ;;  %v1547_v2 = vld [vmem:[#allocation16 + $0x1990] sm:$0xff] }
 0x3c1   :  { %4644 = vmatprep.subr.bf16.mxu1 %v4643_v8  ;;  %v1527_v3 = vld [vmem:[#allocation16 + $0x18f0] sm:$0xff]  ;;  %v1592_v8 = vld [vmem:[#allocation16 + $0x1af8] sm:$0xff]  ;;  %v4533_v12 = vpack.c.bf16 %v1547_v2, %v1525_v63  ;;  %v4675_v63 = vpack.c.bf16 %v1726_v54, %v1704_v53  ;;  %v1725_v2 = vld [vmem:[#allocation16 + $0x1f20] sm:$0xff] }
 0x3c2   :  { %v4661_v14 = vpack.c.bf16 %v1549_v5, %v1527_v3  ;;  %v4535_v15 = vpack.c.bf16 %v1592_v8, %v1570_v7  ;;  %v1746_v3 = vld [vmem:[#allocation16 + $0x1fc8] sm:$0xff]  ;;  %v1748_v5 = vld [vmem:[#allocation16 + $0x1fd8] sm:$0xff] }
 0x3c3   :  { %4518 = vmatpush1.bf16.msra.mxu0 %v4517_v17  ;;  %v1569_v17 = vld [vmem:[#allocation16 + $0x1a40] sm:$0xff]  ;;  %v1770_v7 = vld [vmem:[#allocation16 + $0x2088] sm:$0xff] }
 0x3c4   :  { %4646 = vmatpush1.bf16.msra.mxu1 %v4645_v18  ;;  %4520 = vmatprep.subr.bf16.mxu0 %v4519_v24  ;;  %v1591_v18 = vld [vmem:[#allocation16 + $0x1af0] sm:$0xff] }
 0x3c5   :  { %4648 = vmatprep.subr.bf16.mxu1 %v4647_v21  ;;  %v1571_v24 = vld [vmem:[#allocation16 + $0x1a50] sm:$0xff]  ;;  %v1636_v21 = vld [vmem:[#allocation16 + $0x1c58] sm:$0xff]  ;;  %v4537_v34 = vpack.c.bf16 %v1591_v18, %v1569_v17  ;;  %v4679_v17 = vpack.c.bf16 %v1770_v7, %v1748_v5  ;;  %v1769_v18 = vld [vmem:[#allocation16 + $0x2080] sm:$0xff] }
 0x3c6   :  { %v4665_v26 = vpack.c.bf16 %v1593_v19, %v1571_v24  ;;  %v4539_v27 = vpack.c.bf16 %v1636_v21, %v1614_v20  ;;  %v1790_v24 = vld [vmem:[#allocation16 + $0x2128] sm:$0xff]  ;;  %v1792_v19 = vld [vmem:[#allocation16 + $0x2138] sm:$0xff] }
 0x3c7   :  { %4522 = vmatpush1.bf16.msra.mxu0 %v4521_v28  ;;  %v1613_v28 = vld [vmem:[#allocation16 + $0x1ba0] sm:$0xff]  ;;  %v1814_v20 = vld [vmem:[#allocation16 + $0x21e8] sm:$0xff] }
 0x3c8   :  { %4650 = vmatpush1.bf16.msra.mxu1 %v4649_v29  ;;  %4524 = vmatprep.subr.bf16.mxu0 %v4523_v32  ;;  %v1635_v29 = vld [vmem:[#allocation16 + $0x1c50] sm:$0xff] }
 0x3c9   :  { %4652 = vmatprep.subr.bf16.mxu1 %v4651_v33  ;;  %v1615_v32 = vld [vmem:[#allocation16 + $0x1bb0] sm:$0xff]  ;;  %v4667_v33 = vpack.c.bf16 %v1638_v23, %v1616_v22  ;;  %v4541_v46 = vpack.c.bf16 %v1635_v29, %v1613_v28  ;;  %v4683_v28 = vpack.c.bf16 %v1814_v20, %v1792_v19  ;;  %v1813_v29 = vld [vmem:[#allocation16 + $0x21e0] sm:$0xff] }
 0x3ca   :  { %2626 = vmatmul.mubr.f32.vlgmr.msra.gmra.mrb[6].mxu0 %v6212_v16  ;;  %v4669_v40 = vpack.c.bf16 %v1637_v35, %v1615_v32  ;;  %v1834_v32 = vld [vmem:[#allocation16 + $0x2288] sm:$0xff]  ;;  %v1836_v35 = vld [vmem:[#allocation16 + $0x2298] sm:$0xff] }
 0x3cb   :  { %2780 = vmatmul.mubr.f32.vlgmr.msra.gmra.mrb[16].mxu1 %v6212_v16  ;;  %2631 = vmatprep.mubr.f32.mxu0 %v6220_v25 }
 0x3cc   :  { %4526 = vmatpush1.bf16.msra.mxu0 %v4525_v42  ;;  %2785 = vmatprep.mubr.f32.mxu1 %v6220_v25  ;;  %v1657_v42 = vld [vmem:[#allocation16 + $0x1d00] sm:$0xff] }
 0x3cd   :  { %4654 = vmatpush1.bf16.msra.mxu1 %v4653_v44  ;;  %4528 = vmatprep.subr.bf16.mxu0 %v4527_v45  ;;  %v1679_v44 = vld [vmem:[#allocation16 + $0x1db0] sm:$0xff] }
 0x3ce   :  { %2632 = vmatmul.mubr.f32.gmra.mrb[8].mxu0 %v6223_v31  ;;  %4656 = vmatprep.subr.bf16.mxu1 %v4655_v52  ;;  %v1659_v45 = vld [vmem:[#allocation16 + $0x1d10] sm:$0xff]  ;;  %v1724_v52 = vld [vmem:[#allocation16 + $0x1f18] sm:$0xff]  ;;  %v4545_v56 = vpack.c.bf16 %v1679_v44, %v1657_v42  ;;  %v4687_v42 = vpack.c.bf16 %v1858_v36, %v1836_v35  ;;  %v1857_v44 = vld [vmem:[#allocation16 + $0x2340] sm:$0xff] }
 0x3cf   :  { %2786 = vmatmul.mubr.f32.gmra.mrb[18].mxu1 %v6223_v31  ;;  %2702 = vmatprep.mubr.f32.mxu0 %v6241_v59  ;;  %v4673_v57 = vpack.c.bf16 %v1681_v48, %v1659_v45  ;;  %v4547_v58 = vpack.c.bf16 %v1724_v52, %v1702_v49  ;;  %v1878_v45 = vld [vmem:[#allocation16 + $0x23e8] sm:$0xff]  ;;  %v1880_v48 = vld [vmem:[#allocation16 + $0x23f8] sm:$0xff] }
 0x3d0   :  { %4530 = vmatpush1.bf16.msra.mxu0 %v4529_v60  ;;  %2856 = vmatprep.mubr.f32.mxu1 %v6241_v59  ;;  %v1701_v60 = vld [vmem:[#allocation16 + $0x1e60] sm:$0xff]  ;;  %v1902_v49 = vld [vmem:[#allocation16 + $0x24a8] sm:$0xff] }
 0x3d1   :  { %4658 = vmatpush1.bf16.msra.mxu1 %v4657_v61  ;;  %4532 = vmatprep.subr.bf16.mxu0 %v4531_v62  ;;  %v1723_v61 = vld [vmem:[#allocation16 + $0x1f10] sm:$0xff] }
 0x3d2   :  { %4660 = vmatprep.subr.bf16.mxu1 %v4659_v4  ;;  %v1703_v62 = vld [vmem:[#allocation16 + $0x1e70] sm:$0xff]  ;;  %v1768_v4 = vld [vmem:[#allocation16 + $0x2078] sm:$0xff]  ;;  %v4549_v8 = vpack.c.bf16 %v1723_v61, %v1701_v60  ;;  %v4691_v60 = vpack.c.bf16 %v1902_v49, %v1880_v48  ;;  %v1901_v61 = vld [vmem:[#allocation16 + $0x24a0] sm:$0xff] }
 0x3d3   :  { %v4677_v10 = vpack.c.bf16 %v1725_v2, %v1703_v62  ;;  %v4551_v11 = vpack.c.bf16 %v1768_v4, %v1746_v3  ;;  %v1922_v62 = vld [vmem:[#allocation16 + $0x2548] sm:$0xff]  ;;  %v1924_v2 = vld [vmem:[#allocation16 + $0x2558] sm:$0xff] }
 0x3d4   :  { %4534 = vmatpush1.bf16.msra.mxu0 %v4533_v12  ;;  %v1745_v12 = vld [vmem:[#allocation16 + $0x1fc0] sm:$0xff]  ;;  %v1946_v3 = vld [vmem:[#allocation16 + $0x2608] sm:$0xff] }
 0x3d5   :  { %4662 = vmatpush1.bf16.msra.mxu1 %v4661_v14  ;;  %4536 = vmatprep.subr.bf16.mxu0 %v4535_v15  ;;  %v1767_v14 = vld [vmem:[#allocation16 + $0x2070] sm:$0xff] }
 0x3d6   :  { %4664 = vmatprep.subr.bf16.mxu1 %v4663_v30  ;;  %v1747_v15 = vld [vmem:[#allocation16 + $0x1fd0] sm:$0xff]  ;;  %v1812_v30 = vld [vmem:[#allocation16 + $0x21d8] sm:$0xff]  ;;  %v4553_v21 = vpack.c.bf16 %v1767_v14, %v1745_v12  ;;  %v4695_v12 = vpack.c.bf16 %v1946_v3, %v1924_v2  ;;  %v1945_v14 = vld [vmem:[#allocation16 + $0x2600] sm:$0xff] }
 0x3d7   :  { %v4681_v22 = vpack.c.bf16 %v1769_v18, %v1747_v15  ;;  %v4555_v23 = vpack.c.bf16 %v1812_v30, %v1790_v24  ;;  %v1966_v15 = vld [vmem:[#allocation16 + $0x26a8] sm:$0xff]  ;;  %v1968_v18 = vld [vmem:[#allocation16 + $0x26b8] sm:$0xff] }
 0x3d8   :  { %4538 = vmatpush1.bf16.msra.mxu0 %v4537_v34  ;;  %v1789_v34 = vld [vmem:[#allocation16 + $0x2120] sm:$0xff]  ;;  %v1990_v24 = vld [vmem:[#allocation16 + $0x2768] sm:$0xff] }
 0x3d9   :  { %4666 = vmatpush1.bf16.msra.mxu1 %v4665_v26  ;;  %4540 = vmatprep.subr.bf16.mxu0 %v4539_v27  ;;  %v1811_v26 = vld [vmem:[#allocation16 + $0x21d0] sm:$0xff] }
 0x3da   :  { %4668 = vmatprep.subr.bf16.mxu1 %v4667_v33  ;;  %v1791_v27 = vld [vmem:[#allocation16 + $0x2130] sm:$0xff]  ;;  %v1856_v33 = vld [vmem:[#allocation16 + $0x2338] sm:$0xff]  ;;  %v4557_v37 = vpack.c.bf16 %v1811_v26, %v1789_v34  ;;  %v4699_v34 = vpack.c.bf16 %v1990_v24, %v1968_v18  ;;  %v1989_v26 = vld [vmem:[#allocation16 + $0x2760] sm:$0xff] }
 0x3db   :  { %v4685_v38 = vpack.c.bf16 %v1813_v29, %v1791_v27  ;;  %v4559_v39 = vpack.c.bf16 %v1856_v33, %v1834_v32  ;;  %v2010_v27 = vld [vmem:[#allocation16 + $0x2808] sm:$0xff]  ;;  %v2012_v29 = vld [vmem:[#allocation16 + $0x2818] sm:$0xff] }
 0x3dc   :  { %4542 = vmatpush1.bf16.msra.mxu0 %v4541_v46  ;;  %v1833_v46 = vld [vmem:[#allocation16 + $0x2280] sm:$0xff]  ;;  %v2034_v32 = vld [vmem:[#allocation16 + $0x28c8] sm:$0xff] }
 0x3dd   :  { %4670 = vmatpush1.bf16.msra.mxu1 %v4669_v40  ;;  %4544 = vmatprep.subr.bf16.mxu0 %v4543_v41  ;;  %v1855_v40 = vld [vmem:[#allocation16 + $0x2330] sm:$0xff] }
 0x3de   :  { %4672 = vmatprep.subr.bf16.mxu1 %v4671_v47  ;;  %v1835_v41 = vld [vmem:[#allocation16 + $0x2290] sm:$0xff]  ;;  %v1900_v47 = vld [vmem:[#allocation16 + $0x2498] sm:$0xff]  ;;  %v4561_v52 = vpack.c.bf16 %v1855_v40, %v1833_v46  ;;  %v4703_v46 = vpack.c.bf16 %v2034_v32, %v2012_v29  ;;  %v2033_v40 = vld [vmem:[#allocation16 + $0x28c0] sm:$0xff] }
 0x3df   :  { %v4689_v53 = vpack.c.bf16 %v1857_v44, %v1835_v41  ;;  %v4563_v54 = vpack.c.bf16 %v1900_v47, %v1878_v45  ;;  %v2054_v41 = vld [vmem:[#allocation16 + $0x2968] sm:$0xff]  ;;  %v2056_v44 = vld [vmem:[#allocation16 + $0x2978] sm:$0xff] }
 0x3e0   :  { %4546 = vmatpush1.bf16.msra.mxu0 %v4545_v56  ;;  %v1877_v56 = vld [vmem:[#allocation16 + $0x23e0] sm:$0xff]  ;;  %v2078_v45 = vld [vmem:[#allocation16 + $0x2a28] sm:$0xff] }
 0x3e1   :  { %4674 = vmatpush1.bf16.msra.mxu1 %v4673_v57  ;;  %4548 = vmatprep.subr.bf16.mxu0 %v4547_v58  ;;  %v1899_v57 = vld [vmem:[#allocation16 + $0x2490] sm:$0xff] }
 0x3e2   :  { %4676 = vmatprep.subr.bf16.mxu1 %v4675_v63  ;;  %v1879_v58 = vld [vmem:[#allocation16 + $0x23f0] sm:$0xff]  ;;  %v1944_v63 = vld [vmem:[#allocation16 + $0x25f8] sm:$0xff]  ;;  %v4565_v4 = vpack.c.bf16 %v1899_v57, %v1877_v56  ;;  %v4707_v56 = vpack.c.bf16 %v2078_v45, %v2056_v44  ;;  %v2077_v57 = vld [vmem:[#allocation16 + $0x2a20] sm:$0xff] }
 0x3e3   :  { %v4693_v5 = vpack.c.bf16 %v1901_v61, %v1879_v58  ;;  %v4567_v7 = vpack.c.bf16 %v1944_v63, %v1922_v62  ;;  %v2098_v58 = vld [vmem:[#allocation16 + $0x2ac8] sm:$0xff]  ;;  %v2100_v61 = vld [vmem:[#allocation16 + $0x2ad8] sm:$0xff] }
 0x3e4   :  { %4550 = vmatpush1.bf16.msra.mxu0 %v4549_v8  ;;  %v1921_v8 = vld [vmem:[#allocation16 + $0x2540] sm:$0xff]  ;;  %v2122_v62 = vld [vmem:[#allocation16 + $0x2b88] sm:$0xff] }
 0x3e5   :  { %4678 = vmatpush1.bf16.msra.mxu1 %v4677_v10  ;;  %4552 = vmatprep.subr.bf16.mxu0 %v4551_v11  ;;  %v1943_v10 = vld [vmem:[#allocation16 + $0x25f0] sm:$0xff] }
 0x3e6   :  { %4680 = vmatprep.subr.bf16.mxu1 %v4679_v17  ;;  %v1923_v11 = vld [vmem:[#allocation16 + $0x2550] sm:$0xff]  ;;  %v1988_v17 = vld [vmem:[#allocation16 + $0x2758] sm:$0xff]  ;;  %v4569_v30 = vpack.c.bf16 %v1943_v10, %v1921_v8  ;;  %v4711_v8 = vpack.c.bf16 %v2122_v62, %v2100_v61  ;;  %v2121_v10 = vld [vmem:[#allocation16 + $0x2b80] sm:$0xff] }
 0x3e7   :  { %v4697_v19 = vpack.c.bf16 %v1945_v14, %v1923_v11  ;;  %v4571_v20 = vpack.c.bf16 %v1988_v17, %v1966_v15  ;;  %v738_v11 = vld [vmem:[#allocation16 + $0x48] sm:$0xff]  ;;  %v740_v14 = vld [vmem:[#allocation16 + $0x58] sm:$0xff] }
 0x3e8   :  { %4554 = vmatpush1.bf16.msra.mxu0 %v4553_v21  ;;  %v1965_v21 = vld [vmem:[#allocation16 + $0x26a0] sm:$0xff]  ;;  %v762_v15 = vld [vmem:[#allocation16 + $0x108] sm:$0xff] }
 0x3e9   :  { %4682 = vmatpush1.bf16.msra.mxu1 %v4681_v22  ;;  %4556 = vmatprep.subr.bf16.mxu0 %v4555_v23  ;;  %v1987_v22 = vld [vmem:[#allocation16 + $0x2750] sm:$0xff] }
 0x3ea   :  { %4684 = vmatprep.subr.bf16.mxu1 %v4683_v28  ;;  %v1967_v23 = vld [vmem:[#allocation16 + $0x26b0] sm:$0xff]  ;;  %v2032_v28 = vld [vmem:[#allocation16 + $0x28b8] sm:$0xff]  ;;  %v4573_v33 = vpack.c.bf16 %v1987_v22, %v1965_v21  ;;  %v761_v22 = vld [vmem:[#allocation16 + $0x100] sm:$0xff] }
 0x3eb   :  { %v4701_v35 = vpack.c.bf16 %v1989_v26, %v1967_v23  ;;  %v4575_v36 = vpack.c.bf16 %v2032_v28, %v2010_v27  ;;  %v739_v21 = vld [vmem:[#allocation16 + $0x50] sm:$0xff]  ;;  %v782_v23 = vld [vmem:[#allocation16 + $0x1a8] sm:$0xff]  ;;  %v784_v26 = vld [vmem:[#allocation16 + $0x1b8] sm:$0xff] }
 0x3ec   :  { %4558 = vmatpush1.bf16.msra.mxu0 %v4557_v37  ;;  %v2009_v37 = vld [vmem:[#allocation16 + $0x2800] sm:$0xff]  ;;  %v806_v27 = vld [vmem:[#allocation16 + $0x268] sm:$0xff]  ;;  %v4845_v29 = vpack.c.bf16 %v761_v22, %v739_v21  ;;  %v980_v21 = vld [vmem:[#allocation16 + $0x7d8] sm:$0xff] }
 0x3ed   :  { %4686 = vmatpush1.bf16.msra.mxu1 %v4685_v38  ;;  %4560 = vmatprep.subr.bf16.mxu0 %v4559_v39  ;;  %v2031_v38 = vld [vmem:[#allocation16 + $0x28b0] sm:$0xff]  ;;  %v960_v22 = vld [vmem:[#allocation16 + $0x738] sm:$0xff] }
 0x3ee   :  { %4688 = vmatprep.subr.bf16.mxu1 %v4687_v42  ;;  %v2011_v39 = vld [vmem:[#allocation16 + $0x2810] sm:$0xff]  ;;  %v2076_v42 = vld [vmem:[#allocation16 + $0x2a18] sm:$0xff]  ;;  %v4577_v47 = vpack.c.bf16 %v2031_v38, %v2009_v37  ;;  %v4847_v37 = vpack.c.bf16 %v806_v27, %v784_v26  ;;  %v805_v38 = vld [vmem:[#allocation16 + $0x260] sm:$0xff] }
 0x3ef   :  { %v4705_v48 = vpack.c.bf16 %v2033_v40, %v2011_v39  ;;  %v4579_v49 = vpack.c.bf16 %v2076_v42, %v2054_v41  ;;  %v826_v39 = vld [vmem:[#allocation16 + $0x308] sm:$0xff]  ;;  %v828_v40 = vld [vmem:[#allocation16 + $0x318] sm:$0xff] }
 0x3f0   :  { %4562 = vmatpush1.bf16.msra.mxu0 %v4561_v52  ;;  %v2053_v52 = vld [vmem:[#allocation16 + $0x2960] sm:$0xff]  ;;  %v850_v41 = vld [vmem:[#allocation16 + $0x3c8] sm:$0xff] }
 0x3f1   :  { %4690 = vmatpush1.bf16.msra.mxu1 %v4689_v53  ;;  %4564 = vmatprep.subr.bf16.mxu0 %v4563_v54  ;;  %v2075_v53 = vld [vmem:[#allocation16 + $0x2a10] sm:$0xff] }
 0x3f2   :  { %4692 = vmatprep.subr.bf16.mxu1 %v4691_v60  ;;  %v2055_v54 = vld [vmem:[#allocation16 + $0x2970] sm:$0xff]  ;;  %v2120_v60 = vld [vmem:[#allocation16 + $0x2b78] sm:$0xff]  ;;  %v4581_v63 = vpack.c.bf16 %v2075_v53, %v2053_v52  ;;  %v4851_v52 = vpack.c.bf16 %v850_v41, %v828_v40  ;;  %v849_v53 = vld [vmem:[#allocation16 + $0x3c0] sm:$0xff] }
 0x3f3   :  { %v4709_v2 = vpack.c.bf16 %v2077_v57, %v2055_v54  ;;  %v4583_v3 = vpack.c.bf16 %v2120_v60, %v2098_v58  ;;  %v870_v54 = vld [vmem:[#allocation16 + $0x468] sm:$0xff]  ;;  %v872_v57 = vld [vmem:[#allocation16 + $0x478] sm:$0xff] }
 0x3f4   :  { %4566 = vmatpush1.bf16.msra.mxu0 %v4565_v4  ;;  %v2097_v4 = vld [vmem:[#allocation16 + $0x2ac0] sm:$0xff]  ;;  %v894_v58 = vld [vmem:[#allocation16 + $0x528] sm:$0xff] }
 0x3f5   :  { %4694 = vmatpush1.bf16.msra.mxu1 %v4693_v5  ;;  %4568 = vmatprep.subr.bf16.mxu0 %v4567_v7  ;;  %v2119_v5 = vld [vmem:[#allocation16 + $0x2b70] sm:$0xff] }
 0x3f6   :  { %4696 = vmatprep.subr.bf16.mxu1 %v4695_v12  ;;  %v2099_v7 = vld [vmem:[#allocation16 + $0x2ad0] sm:$0xff]  ;;  %v760_v12 = vld [vmem:[#allocation16 + $0xf8] sm:$0xff]  ;;  %v4585_v17 = vpack.c.bf16 %v2119_v5, %v2097_v4  ;;  %v4855_v4 = vpack.c.bf16 %v894_v58, %v872_v57  ;;  %v893_v5 = vld [vmem:[#allocation16 + $0x520] sm:$0xff] }
 0x3f7   :  { %v4713_v18 = vpack.c.bf16 %v2121_v10, %v2099_v7  ;;  %v4715_v24 = vpack.c.bf16 %v760_v12, %v738_v11  ;;  %v914_v7 = vld [vmem:[#allocation16 + $0x5c8] sm:$0xff]  ;;  %v916_v10 = vld [vmem:[#allocation16 + $0x5d8] sm:$0xff] }
 0x3f8   :  { %4570 = vmatpush1.bf16.msra.mxu0 %v4569_v30  ;;  %v4843_v30 = vpack.c.bf16 %v762_v15, %v740_v14  ;;  %v938_v11 = vld [vmem:[#allocation16 + $0x688] sm:$0xff] }
 0x3f9   :  { %4698 = vmatpush1.bf16.msra.mxu1 %v4697_v19  ;;  %4572 = vmatprep.subr.bf16.mxu0 %v4571_v20  ;;  %v737_v19 = vld [vmem:[#allocation16 + $0x40] sm:$0xff]  ;;  %v759_v20 = vld [vmem:[#allocation16 + $0xf0] sm:$0xff] }
 0x3fa   :  { %4700 = vmatprep.subr.bf16.mxu1 %v4699_v34  ;;  %v804_v34 = vld [vmem:[#allocation16 + $0x258] sm:$0xff]  ;;  %v4717_v28 = vpack.c.bf16 %v759_v20, %v737_v19  ;;  %v937_v19 = vld [vmem:[#allocation16 + $0x680] sm:$0xff]  ;;  %v958_v20 = vld [vmem:[#allocation16 + $0x728] sm:$0xff] }
 0x3fb   :  { %v4719_v32 = vpack.c.bf16 %v804_v34, %v782_v23  ;;  %v982_v23 = vld [vmem:[#allocation16 + $0x7e8] sm:$0xff]  ;;  %v4735_v27 = vpack.c.bf16 %v980_v21, %v958_v20 }
 0x3fc   :  { %4574 = vmatpush1.bf16.msra.mxu0 %v4573_v33  ;;  %v781_v33 = vld [vmem:[#allocation16 + $0x1a0] sm:$0xff]  ;;  %v1158_v20 = vld [vmem:[#allocation16 + $0xd68] sm:$0xff] }
 0x3fd   :  { %4702 = vmatpush1.bf16.msra.mxu1 %v4701_v35  ;;  %4576 = vmatprep.subr.bf16.mxu0 %v4575_v36  ;;  %v803_v35 = vld [vmem:[#allocation16 + $0x250] sm:$0xff] }
 0x3fe   :  { %4704 = vmatprep.subr.bf16.mxu1 %v4703_v46  ;;  %v783_v36 = vld [vmem:[#allocation16 + $0x1b0] sm:$0xff]  ;;  %v848_v46 = vld [vmem:[#allocation16 + $0x3b8] sm:$0xff]  ;;  %v4721_v42 = vpack.c.bf16 %v803_v35, %v781_v33  ;;  %v4863_v33 = vpack.c.bf16 %v982_v23, %v960_v22  ;;  %v981_v35 = vld [vmem:[#allocation16 + $0x7e0] sm:$0xff] }
 0x3ff   :  { %v4849_v44 = vpack.c.bf16 %v805_v38, %v783_v36  ;;  %v4723_v45 = vpack.c.bf16 %v848_v46, %v826_v39  ;;  %v1002_v36 = vld [vmem:[#allocation16 + $0x888] sm:$0xff]  ;;  %v1004_v38 = vld [vmem:[#allocation16 + $0x898] sm:$0xff] }
 0x400   :  { %4578 = vmatpush1.bf16.msra.mxu0 %v4577_v47  ;;  %v825_v47 = vld [vmem:[#allocation16 + $0x300] sm:$0xff]  ;;  %v1026_v39 = vld [vmem:[#allocation16 + $0x948] sm:$0xff] }
 0x401   :  { %4706 = vmatpush1.bf16.msra.mxu1 %v4705_v48  ;;  %4580 = vmatprep.subr.bf16.mxu0 %v4579_v49  ;;  %v847_v48 = vld [vmem:[#allocation16 + $0x3b0] sm:$0xff] }
 0x402   :  { %4708 = vmatprep.subr.bf16.mxu1 %v4707_v56  ;;  %v827_v49 = vld [vmem:[#allocation16 + $0x310] sm:$0xff]  ;;  %v892_v56 = vld [vmem:[#allocation16 + $0x518] sm:$0xff]  ;;  %v4725_v60 = vpack.c.bf16 %v847_v48, %v825_v47  ;;  %v4867_v47 = vpack.c.bf16 %v1026_v39, %v1004_v38  ;;  %v1025_v48 = vld [vmem:[#allocation16 + $0x940] sm:$0xff] }
 0x403   :  { %v4853_v61 = vpack.c.bf16 %v849_v53, %v827_v49  ;;  %v4727_v62 = vpack.c.bf16 %v892_v56, %v870_v54  ;;  %v1046_v49 = vld [vmem:[#allocation16 + $0x9e8] sm:$0xff]  ;;  %v1048_v53 = vld [vmem:[#allocation16 + $0x9f8] sm:$0xff] }
 0x404   :  { %4582 = vmatpush1.bf16.msra.mxu0 %v4581_v63  ;;  %v869_v63 = vld [vmem:[#allocation16 + $0x460] sm:$0xff]  ;;  %v1070_v54 = vld [vmem:[#allocation16 + $0xaa8] sm:$0xff] }
 0x405   :  { %4710 = vmatpush1.bf16.msra.mxu1 %v4709_v2  ;;  %4584 = vmatprep.subr.bf16.mxu0 %v4583_v3  ;;  %v891_v2 = vld [vmem:[#allocation16 + $0x510] sm:$0xff] }
 0x406   :  { %4712 = vmatprep.subr.bf16.mxu1 %v4711_v8  ;;  %v871_v3 = vld [vmem:[#allocation16 + $0x470] sm:$0xff]  ;;  %v936_v8 = vld [vmem:[#allocation16 + $0x678] sm:$0xff]  ;;  %v4729_v12 = vpack.c.bf16 %v891_v2, %v869_v63  ;;  %v4871_v63 = vpack.c.bf16 %v1070_v54, %v1048_v53  ;;  %v1069_v2 = vld [vmem:[#allocation16 + $0xaa0] sm:$0xff] }
 0x407   :  { %v4857_v14 = vpack.c.bf16 %v893_v5, %v871_v3  ;;  %v4731_v15 = vpack.c.bf16 %v936_v8, %v914_v7  ;;  %v1090_v3 = vld [vmem:[#allocation16 + $0xb48] sm:$0xff]  ;;  %v1092_v5 = vld [vmem:[#allocation16 + $0xb58] sm:$0xff] }
 0x408   :  { %4586 = vmatpush1.bf16.msra.mxu0 %v4585_v17  ;;  %v913_v17 = vld [vmem:[#allocation16 + $0x5c0] sm:$0xff]  ;;  %v1114_v7 = vld [vmem:[#allocation16 + $0xc08] sm:$0xff] }
 0x409   :  { %4714 = vmatpush1.bf16.msra.mxu1 %v4713_v18  ;;  %4716 = vmatprep.subr.bf16.mxu0 %v4715_v24  ;;  %v935_v18 = vld [vmem:[#allocation16 + $0x670] sm:$0xff] }
 0x40a   :  { %4844 = vmatprep.subr.bf16.mxu1 %v4843_v30  ;;  %v915_v24 = vld [vmem:[#allocation16 + $0x5d0] sm:$0xff]  ;;  %v4859_v30 = vpack.c.bf16 %v938_v11, %v916_v10  ;;  %v4733_v34 = vpack.c.bf16 %v935_v18, %v913_v17  ;;  %v4875_v17 = vpack.c.bf16 %v1114_v7, %v1092_v5  ;;  %v1113_v18 = vld [vmem:[#allocation16 + $0xc00] sm:$0xff] }
 0x40b   :  { %2703 = vmatmul.mubr.f32.vlgmr.msra.gmra.mrb[6].mxu0 %v6244_v0  ;;  %v4861_v26 = vpack.c.bf16 %v937_v19, %v915_v24  ;;  %v1134_v24 = vld [vmem:[#allocation16 + $0xca8] sm:$0xff]  ;;  %v1136_v19 = vld [vmem:[#allocation16 + $0xcb8] sm:$0xff] }
 0x40c   :  { %2857 = vmatmul.mubr.f32.vlgmr.msra.gmra.mrb[16].mxu1 %v6244_v0  ;;  %2708 = vmatprep.mubr.f32.mxu0 %v6252_v13 }
 0x40d   :  { %2862 = vmatprep.mubr.f32.mxu1 %v6252_v13  ;;  %4718 = vmatpush1.bf16.msra.mxu0 %v4717_v28  ;;  %v957_v28 = vld [vmem:[#allocation16 + $0x720] sm:$0xff] }
 0x40e   :  { %4846 = vmatpush1.bf16.msra.mxu1 %v4845_v29  ;;  %4720 = vmatprep.subr.bf16.mxu0 %v4719_v32  ;;  %v979_v29 = vld [vmem:[#allocation16 + $0x7d0] sm:$0xff] }
 0x40f   :  { %2709 = vmatmul.mubr.f32.gmra.mrb[8].mxu0 %v6255_v51  ;;  %4848 = vmatprep.subr.bf16.mxu1 %v4847_v37  ;;  %v959_v32 = vld [vmem:[#allocation16 + $0x730] sm:$0xff]  ;;  %v1024_v37 = vld [vmem:[#allocation16 + $0x938] sm:$0xff]  ;;  %v4737_v46 = vpack.c.bf16 %v979_v29, %v957_v28  ;;  %v4879_v28 = vpack.c.bf16 %v1158_v20, %v1136_v19  ;;  %v1157_v29 = vld [vmem:[#allocation16 + $0xd60] sm:$0xff] }
 0x410   :  { %2863 = vmatmul.mubr.f32.gmra.mrb[18].mxu1 %v6255_v51  ;;  %2933 = vmatprep.mubr.f32.mxu0 %v6209_v9  ;;  %v4865_v40 = vpack.c.bf16 %v981_v35, %v959_v32  ;;  %v4739_v41 = vpack.c.bf16 %v1024_v37, %v1002_v36  ;;  %v1178_v32 = vld [vmem:[#allocation16 + $0xe08] sm:$0xff]  ;;  %v1180_v35 = vld [vmem:[#allocation16 + $0xe18] sm:$0xff] }
 0x411   :  { %4722 = vmatpush1.bf16.msra.mxu0 %v4721_v42  ;;  %3087 = vmatprep.mubr.f32.mxu1 %v6209_v9  ;;  %v1001_v42 = vld [vmem:[#allocation16 + $0x880] sm:$0xff]  ;;  %v1202_v36 = vld [vmem:[#allocation16 + $0xec8] sm:$0xff] }
 0x412   :  { %4850 = vmatpush1.bf16.msra.mxu1 %v4849_v44  ;;  %4724 = vmatprep.subr.bf16.mxu0 %v4723_v45  ;;  %v1023_v44 = vld [vmem:[#allocation16 + $0x930] sm:$0xff] }
 0x413   :  { %4852 = vmatprep.subr.bf16.mxu1 %v4851_v52  ;;  %v1003_v45 = vld [vmem:[#allocation16 + $0x890] sm:$0xff]  ;;  %v1068_v52 = vld [vmem:[#allocation16 + $0xa98] sm:$0xff]  ;;  %v4741_v56 = vpack.c.bf16 %v1023_v44, %v1001_v42  ;;  %v4883_v42 = vpack.c.bf16 %v1202_v36, %v1180_v35  ;;  %v1201_v44 = vld [vmem:[#allocation16 + $0xec0] sm:$0xff] }
 0x414   :  { %v4869_v57 = vpack.c.bf16 %v1025_v48, %v1003_v45  ;;  %v4743_v58 = vpack.c.bf16 %v1068_v52, %v1046_v49  ;;  %v1222_v45 = vld [vmem:[#allocation16 + $0xf68] sm:$0xff]  ;;  %v1224_v48 = vld [vmem:[#allocation16 + $0xf78] sm:$0xff] }
 0x415   :  { %4726 = vmatpush1.bf16.msra.mxu0 %v4725_v60  ;;  %v1045_v60 = vld [vmem:[#allocation16 + $0x9e0] sm:$0xff]  ;;  %v1246_v49 = vld [vmem:[#allocation16 + $0x1028] sm:$0xff] }
 0x416   :  { %4854 = vmatpush1.bf16.msra.mxu1 %v4853_v61  ;;  %4728 = vmatprep.subr.bf16.mxu0 %v4727_v62  ;;  %v1067_v61 = vld [vmem:[#allocation16 + $0xa90] sm:$0xff] }
 0x417   :  { %4856 = vmatprep.subr.bf16.mxu1 %v4855_v4  ;;  %v1047_v62 = vld [vmem:[#allocation16 + $0x9f0] sm:$0xff]  ;;  %v1112_v4 = vld [vmem:[#allocation16 + $0xbf8] sm:$0xff]  ;;  %v4745_v8 = vpack.c.bf16 %v1067_v61, %v1045_v60  ;;  %v4887_v60 = vpack.c.bf16 %v1246_v49, %v1224_v48  ;;  %v1245_v61 = vld [vmem:[#allocation16 + $0x1020] sm:$0xff] }
 0x418   :  { %v4873_v10 = vpack.c.bf16 %v1069_v2, %v1047_v62  ;;  %v4747_v11 = vpack.c.bf16 %v1112_v4, %v1090_v3  ;;  %v1266_v62 = vld [vmem:[#allocation16 + $0x10c8] sm:$0xff]  ;;  %v1268_v2 = vld [vmem:[#allocation16 + $0x10d8] sm:$0xff] }
 0x419   :  { %4730 = vmatpush1.bf16.msra.mxu0 %v4729_v12  ;;  %v1089_v12 = vld [vmem:[#allocation16 + $0xb40] sm:$0xff]  ;;  %v1290_v3 = vld [vmem:[#allocation16 + $0x1188] sm:$0xff] }
 0x41a   :  { %4858 = vmatpush1.bf16.msra.mxu1 %v4857_v14  ;;  %4732 = vmatprep.subr.bf16.mxu0 %v4731_v15  ;;  %v1111_v14 = vld [vmem:[#allocation16 + $0xbf0] sm:$0xff] }
 0x41b   :  { %4860 = vmatprep.subr.bf16.mxu1 %v4859_v30  ;;  %v1091_v15 = vld [vmem:[#allocation16 + $0xb50] sm:$0xff]  ;;  %v1156_v30 = vld [vmem:[#allocation16 + $0xd58] sm:$0xff]  ;;  %v4749_v21 = vpack.c.bf16 %v1111_v14, %v1089_v12  ;;  %v4891_v12 = vpack.c.bf16 %v1290_v3, %v1268_v2  ;;  %v1289_v14 = vld [vmem:[#allocation16 + $0x1180] sm:$0xff] }
 0x41c   :  { %v4877_v22 = vpack.c.bf16 %v1113_v18, %v1091_v15  ;;  %v4751_v23 = vpack.c.bf16 %v1156_v30, %v1134_v24  ;;  %v1310_v15 = vld [vmem:[#allocation16 + $0x1228] sm:$0xff]  ;;  %v1312_v18 = vld [vmem:[#allocation16 + $0x1238] sm:$0xff] }
 0x41d   :  { %4734 = vmatpush1.bf16.msra.mxu0 %v4733_v34  ;;  %v1133_v34 = vld [vmem:[#allocation16 + $0xca0] sm:$0xff]  ;;  %v1334_v24 = vld [vmem:[#allocation16 + $0x12e8] sm:$0xff] }
 0x41e   :  { %4862 = vmatpush1.bf16.msra.mxu1 %v4861_v26  ;;  %4736 = vmatprep.subr.bf16.mxu0 %v4735_v27  ;;  %v1155_v26 = vld [vmem:[#allocation16 + $0xd50] sm:$0xff] }
 0x41f   :  { %4864 = vmatprep.subr.bf16.mxu1 %v4863_v33  ;;  %v1135_v27 = vld [vmem:[#allocation16 + $0xcb0] sm:$0xff]  ;;  %v1200_v33 = vld [vmem:[#allocation16 + $0xeb8] sm:$0xff]  ;;  %v4753_v37 = vpack.c.bf16 %v1155_v26, %v1133_v34  ;;  %v4895_v34 = vpack.c.bf16 %v1334_v24, %v1312_v18  ;;  %v1333_v26 = vld [vmem:[#allocation16 + $0x12e0] sm:$0xff] }
 0x420   :  { %v4881_v38 = vpack.c.bf16 %v1157_v29, %v1135_v27  ;;  %v4755_v39 = vpack.c.bf16 %v1200_v33, %v1178_v32  ;;  %v1354_v27 = vld [vmem:[#allocation16 + $0x1388] sm:$0xff]  ;;  %v1356_v29 = vld [vmem:[#allocation16 + $0x1398] sm:$0xff] }
 0x421   :  { %4738 = vmatpush1.bf16.msra.mxu0 %v4737_v46  ;;  %v1177_v46 = vld [vmem:[#allocation16 + $0xe00] sm:$0xff]  ;;  %v1378_v32 = vld [vmem:[#allocation16 + $0x1448] sm:$0xff] }
 0x422   :  { %4866 = vmatpush1.bf16.msra.mxu1 %v4865_v40  ;;  %4740 = vmatprep.subr.bf16.mxu0 %v4739_v41  ;;  %v1199_v40 = vld [vmem:[#allocation16 + $0xeb0] sm:$0xff] }
 0x423   :  { %4868 = vmatprep.subr.bf16.mxu1 %v4867_v47  ;;  %v1179_v41 = vld [vmem:[#allocation16 + $0xe10] sm:$0xff]  ;;  %v1244_v47 = vld [vmem:[#allocation16 + $0x1018] sm:$0xff]  ;;  %v4757_v52 = vpack.c.bf16 %v1199_v40, %v1177_v46  ;;  %v4899_v46 = vpack.c.bf16 %v1378_v32, %v1356_v29  ;;  %v1377_v40 = vld [vmem:[#allocation16 + $0x1440] sm:$0xff] }
 0x424   :  { %v4885_v53 = vpack.c.bf16 %v1201_v44, %v1179_v41  ;;  %v4759_v54 = vpack.c.bf16 %v1244_v47, %v1222_v45  ;;  %v1398_v41 = vld [vmem:[#allocation16 + $0x14e8] sm:$0xff]  ;;  %v1400_v44 = vld [vmem:[#allocation16 + $0x14f8] sm:$0xff] }
 0x425   :  { %4742 = vmatpush1.bf16.msra.mxu0 %v4741_v56  ;;  %v1221_v56 = vld [vmem:[#allocation16 + $0xf60] sm:$0xff]  ;;  %v1422_v45 = vld [vmem:[#allocation16 + $0x15a8] sm:$0xff] }
 0x426   :  { %4870 = vmatpush1.bf16.msra.mxu1 %v4869_v57  ;;  %4744 = vmatprep.subr.bf16.mxu0 %v4743_v58  ;;  %v1243_v57 = vld [vmem:[#allocation16 + $0x1010] sm:$0xff] }
 0x427   :  { %4872 = vmatprep.subr.bf16.mxu1 %v4871_v63  ;;  %v1223_v58 = vld [vmem:[#allocation16 + $0xf70] sm:$0xff]  ;;  %v1288_v63 = vld [vmem:[#allocation16 + $0x1178] sm:$0xff]  ;;  %v4761_v4 = vpack.c.bf16 %v1243_v57, %v1221_v56  ;;  %v4903_v56 = vpack.c.bf16 %v1422_v45, %v1400_v44  ;;  %v1421_v57 = vld [vmem:[#allocation16 + $0x15a0] sm:$0xff] }
 0x428   :  { %v4889_v5 = vpack.c.bf16 %v1245_v61, %v1223_v58  ;;  %v4763_v7 = vpack.c.bf16 %v1288_v63, %v1266_v62  ;;  %v1442_v58 = vld [vmem:[#allocation16 + $0x1648] sm:$0xff]  ;;  %v1444_v61 = vld [vmem:[#allocation16 + $0x1658] sm:$0xff] }
 0x429   :  { %4746 = vmatpush1.bf16.msra.mxu0 %v4745_v8  ;;  %v1265_v8 = vld [vmem:[#allocation16 + $0x10c0] sm:$0xff]  ;;  %v1466_v62 = vld [vmem:[#allocation16 + $0x1708] sm:$0xff] }
 0x42a   :  { %4874 = vmatpush1.bf16.msra.mxu1 %v4873_v10  ;;  %4748 = vmatprep.subr.bf16.mxu0 %v4747_v11  ;;  %v1287_v10 = vld [vmem:[#allocation16 + $0x1170] sm:$0xff] }
 0x42b   :  { %4876 = vmatprep.subr.bf16.mxu1 %v4875_v17  ;;  %v1267_v11 = vld [vmem:[#allocation16 + $0x10d0] sm:$0xff]  ;;  %v1332_v17 = vld [vmem:[#allocation16 + $0x12d8] sm:$0xff]  ;;  %v4765_v30 = vpack.c.bf16 %v1287_v10, %v1265_v8  ;;  %v1465_v10 = vld [vmem:[#allocation16 + $0x1700] sm:$0xff] }
 0x42c   :  { %v4893_v19 = vpack.c.bf16 %v1289_v14, %v1267_v11  ;;  %v4767_v20 = vpack.c.bf16 %v1332_v17, %v1310_v15  ;;  %v1443_v8 = vld [vmem:[#allocation16 + $0x1650] sm:$0xff]  ;;  %v1486_v11 = vld [vmem:[#allocation16 + $0x17a8] sm:$0xff]  ;;  %v1488_v14 = vld [vmem:[#allocation16 + $0x17b8] sm:$0xff] }
 0x42d   :  { %4750 = vmatpush1.bf16.msra.mxu0 %v4749_v21  ;;  %v1309_v21 = vld [vmem:[#allocation16 + $0x1220] sm:$0xff]  ;;  %v1510_v15 = vld [vmem:[#allocation16 + $0x1868] sm:$0xff]  ;;  %v4909_v18 = vpack.c.bf16 %v1465_v10, %v1443_v8  ;;  %v1684_v10 = vld [vmem:[#allocation16 + $0x1dd8] sm:$0xff] }
 0x42e   :  { %4878 = vmatpush1.bf16.msra.mxu1 %v4877_v22  ;;  %4752 = vmatprep.subr.bf16.mxu0 %v4751_v23  ;;  %v1331_v22 = vld [vmem:[#allocation16 + $0x12d0] sm:$0xff]  ;;  %v1662_v8 = vld [vmem:[#allocation16 + $0x1d28] sm:$0xff] }
 0x42f   :  { %4880 = vmatprep.subr.bf16.mxu1 %v4879_v28  ;;  %v1311_v23 = vld [vmem:[#allocation16 + $0x1230] sm:$0xff]  ;;  %v1376_v28 = vld [vmem:[#allocation16 + $0x1438] sm:$0xff]  ;;  %v4769_v33 = vpack.c.bf16 %v1331_v22, %v1309_v21  ;;  %v4911_v21 = vpack.c.bf16 %v1510_v15, %v1488_v14  ;;  %v1509_v22 = vld [vmem:[#allocation16 + $0x1860] sm:$0xff] }
 0x430   :  { %v4897_v35 = vpack.c.bf16 %v1333_v26, %v1311_v23  ;;  %v4771_v36 = vpack.c.bf16 %v1376_v28, %v1354_v27  ;;  %v1530_v23 = vld [vmem:[#allocation16 + $0x1908] sm:$0xff]  ;;  %v1532_v26 = vld [vmem:[#allocation16 + $0x1918] sm:$0xff] }
 0x431   :  { %4754 = vmatpush1.bf16.msra.mxu0 %v4753_v37  ;;  %v1353_v37 = vld [vmem:[#allocation16 + $0x1380] sm:$0xff]  ;;  %v1554_v27 = vld [vmem:[#allocation16 + $0x19c8] sm:$0xff] }
 0x432   :  { %4882 = vmatpush1.bf16.msra.mxu1 %v4881_v38  ;;  %4756 = vmatprep.subr.bf16.mxu0 %v4755_v39  ;;  %v1375_v38 = vld [vmem:[#allocation16 + $0x1430] sm:$0xff] }
 0x433   :  { %4884 = vmatprep.subr.bf16.mxu1 %v4883_v42  ;;  %v1355_v39 = vld [vmem:[#allocation16 + $0x1390] sm:$0xff]  ;;  %v1420_v42 = vld [vmem:[#allocation16 + $0x1598] sm:$0xff]  ;;  %v4773_v47 = vpack.c.bf16 %v1375_v38, %v1353_v37  ;;  %v4915_v37 = vpack.c.bf16 %v1554_v27, %v1532_v26  ;;  %v1553_v38 = vld [vmem:[#allocation16 + $0x19c0] sm:$0xff] }
 0x434   :  { %v4901_v48 = vpack.c.bf16 %v1377_v40, %v1355_v39  ;;  %v4775_v49 = vpack.c.bf16 %v1420_v42, %v1398_v41  ;;  %v1574_v39 = vld [vmem:[#allocation16 + $0x1a68] sm:$0xff]  ;;  %v1576_v40 = vld [vmem:[#allocation16 + $0x1a78] sm:$0xff] }
 0x435   :  { %4758 = vmatpush1.bf16.msra.mxu0 %v4757_v52  ;;  %v1397_v52 = vld [vmem:[#allocation16 + $0x14e0] sm:$0xff]  ;;  %v1598_v41 = vld [vmem:[#allocation16 + $0x1b28] sm:$0xff]  ;;  %v1728_v27 = vld [vmem:[#allocation16 + $0x1f38] sm:$0xff] }
 0x436   :  { %4886 = vmatpush1.bf16.msra.mxu1 %v4885_v53  ;;  %4760 = vmatprep.subr.bf16.mxu0 %v4759_v54  ;;  %v1419_v53 = vld [vmem:[#allocation16 + $0x1590] sm:$0xff]  ;;  %v1706_v26 = vld [vmem:[#allocation16 + $0x1e88] sm:$0xff] }
 0x437   :  { %4888 = vmatprep.subr.bf16.mxu1 %v4887_v60  ;;  %v1399_v54 = vld [vmem:[#allocation16 + $0x14f0] sm:$0xff]  ;;  %v1464_v60 = vld [vmem:[#allocation16 + $0x16f8] sm:$0xff]  ;;  %v4777_v63 = vpack.c.bf16 %v1419_v53, %v1397_v52  ;;  %v4919_v52 = vpack.c.bf16 %v1598_v41, %v1576_v40  ;;  %v1597_v53 = vld [vmem:[#allocation16 + $0x1b20] sm:$0xff] }
 0x438   :  { %v4905_v2 = vpack.c.bf16 %v1421_v57, %v1399_v54  ;;  %v4779_v3 = vpack.c.bf16 %v1464_v60, %v1442_v58  ;;  %v1618_v54 = vld [vmem:[#allocation16 + $0x1bc8] sm:$0xff]  ;;  %v1620_v57 = vld [vmem:[#allocation16 + $0x1bd8] sm:$0xff]  ;;  %v1705_v40 = vld [vmem:[#allocation16 + $0x1e80] sm:$0xff] }
 0x439   :  { %4762 = vmatpush1.bf16.msra.mxu0 %v4761_v4  ;;  %v4907_v4 = vpack.c.bf16 %v1466_v62, %v1444_v61  ;;  %v1642_v58 = vld [vmem:[#allocation16 + $0x1c88] sm:$0xff]  ;;  %v1617_v61 = vld [vmem:[#allocation16 + $0x1bc0] sm:$0xff]  ;;  %v1639_v62 = vld [vmem:[#allocation16 + $0x1c70] sm:$0xff] }
 0x43a   :  { %4890 = vmatpush1.bf16.msra.mxu1 %v4889_v5  ;;  %4764 = vmatprep.subr.bf16.mxu0 %v4763_v7  ;;  %v1441_v5 = vld [vmem:[#allocation16 + $0x1640] sm:$0xff]  ;;  %v1463_v7 = vld [vmem:[#allocation16 + $0x16f0] sm:$0xff]  ;;  %v4797_v14 = vpack.c.bf16 %v1639_v62, %v1617_v61 }
 0x43b   :  { %4892 = vmatprep.subr.bf16.mxu1 %v4891_v12  ;;  %v1508_v12 = vld [vmem:[#allocation16 + $0x1858] sm:$0xff]  ;;  %v4781_v17 = vpack.c.bf16 %v1463_v7, %v1441_v5  ;;  %v2137_v5 = vld [vmem:[#allocation18] sm:$0xff]  ;;  %v4923_v7 = vpack.c.bf16 %v1642_v58, %v1620_v57  ;;  %v1774_v58 = vld [vmem:[#allocation16 + $0x20a8] sm:$0xff] }
 0x43c   :  { %v4783_v24 = vpack.c.bf16 %v1508_v12, %v1486_v11  ;;  %v1664_v11 = vld [vmem:[#allocation16 + $0x1d38] sm:$0xff]  ;;  %v1686_v12 = vld [vmem:[#allocation16 + $0x1de8] sm:$0xff] }
 0x43d   :  { %4766 = vmatpush1.bf16.msra.mxu0 %v4765_v30  ;;  %v1485_v30 = vld [vmem:[#allocation16 + $0x17a0] sm:$0xff]  ;;  %v1752_v57 = vld [vmem:[#allocation16 + $0x1ff8] sm:$0xff] }
 0x43e   :  { %4894 = vmatpush1.bf16.msra.mxu1 %v4893_v19  ;;  %4768 = vmatprep.subr.bf16.mxu0 %v4767_v20  ;;  %v1507_v19 = vld [vmem:[#allocation16 + $0x1850] sm:$0xff] }
 0x43f   :  { %4896 = vmatprep.subr.bf16.mxu1 %v4895_v34  ;;  %v1487_v20 = vld [vmem:[#allocation16 + $0x17b0] sm:$0xff]  ;;  %v1552_v34 = vld [vmem:[#allocation16 + $0x19b8] sm:$0xff]  ;;  %v4785_v28 = vpack.c.bf16 %v1507_v19, %v1485_v30  ;;  %v2150_v30 = vrot.slane %v2137_v5, %v6183_v55  ;;  %v2158_v19 = vrot.slane %v2137_v5, %v6233_v6 }
 0x440   :  { %v4913_v29 = vpack.c.bf16 %v1509_v22, %v1487_v20  ;;  %v4787_v32 = vpack.c.bf16 %v1552_v34, %v1530_v23  ;;  %v4799_v20 = vpack.c.bf16 %v1684_v10, %v1662_v8  ;;  %v1663_v22 = vld [vmem:[#allocation16 + $0x1d30] sm:$0xff]  ;;  %v1685_v23 = vld [vmem:[#allocation16 + $0x1de0] sm:$0xff]  ;;  %v4927_v34 = vpack.c.bf16 %v1686_v12, %v1664_v11 }
 0x441   :  { %4770 = vmatpush1.bf16.msra.mxu0 %v4769_v33  ;;  %v1529_v33 = vld [vmem:[#allocation16 + $0x1900] sm:$0xff]  ;;  %v1771_v10 = vld [vmem:[#allocation16 + $0x2090] sm:$0xff]  ;;  %v4935_v12 = vpack.c.bf16 %v1774_v58, %v1752_v57  ;;  %v1926_v58 = vld [vmem:[#allocation16 + $0x2568] sm:$0xff] }
 0x442   :  { %4898 = vmatpush1.bf16.msra.mxu1 %v4897_v35  ;;  %4772 = vmatprep.subr.bf16.mxu0 %v4771_v36  ;;  %v1551_v35 = vld [vmem:[#allocation16 + $0x19b0] sm:$0xff]  ;;  %v1749_v8 = vld [vmem:[#allocation16 + $0x1fe0] sm:$0xff] }
 0x443   :  { %4900 = vmatprep.subr.bf16.mxu1 %v4899_v46  ;;  %v1531_v36 = vld [vmem:[#allocation16 + $0x1910] sm:$0xff]  ;;  %v1596_v46 = vld [vmem:[#allocation16 + $0x1b18] sm:$0xff]  ;;  %v4789_v42 = vpack.c.bf16 %v1551_v35, %v1529_v33  ;;  %v1730_v33 = vld [vmem:[#allocation16 + $0x1f48] sm:$0xff] }
 0x444   :  { %v4917_v44 = vpack.c.bf16 %v1553_v38, %v1531_v36  ;;  %v4791_v45 = vpack.c.bf16 %v1596_v46, %v1574_v39  ;;  %v4929_v46 = vpack.c.bf16 %v1685_v23, %v1663_v22  ;;  %v1751_v11 = vld [vmem:[#allocation16 + $0x1ff0] sm:$0xff]  ;;  %v1905_v57 = vld [vmem:[#allocation16 + $0x24c0] sm:$0xff] }
 0x445   :  { %4774 = vmatpush1.bf16.msra.mxu0 %v4773_v47  ;;  %v1573_v47 = vld [vmem:[#allocation16 + $0x1a60] sm:$0xff]  ;;  %v1815_v22 = vld [vmem:[#allocation16 + $0x21f0] sm:$0xff] }
 0x446   :  { %4902 = vmatpush1.bf16.msra.mxu1 %v4901_v48  ;;  %4776 = vmatprep.subr.bf16.mxu0 %v4775_v49  ;;  %v1595_v48 = vld [vmem:[#allocation16 + $0x1b10] sm:$0xff] }
 0x447   :  { %4904 = vmatprep.subr.bf16.mxu1 %v4903_v56  ;;  %v1575_v49 = vld [vmem:[#allocation16 + $0x1a70] sm:$0xff]  ;;  %v1640_v56 = vld [vmem:[#allocation16 + $0x1c78] sm:$0xff]  ;;  %v4793_v60 = vpack.c.bf16 %v1595_v48, %v1573_v47  ;;  %v1729_v48 = vld [vmem:[#allocation16 + $0x1f40] sm:$0xff] }
 0x448   :  { %v1707_v47 = vld [vmem:[#allocation16 + $0x1e90] sm:$0xff] }
 0x449   :  { %4778 = vmatpush1.bf16.msra.mxu0 %v4777_v63  ;;  %v4921_v63 = vpack.c.bf16 %v1597_v53, %v1575_v49  ;;  %v1772_v53 = vld [vmem:[#allocation16 + $0x2098] sm:$0xff]  ;;  %v1795_v23 = vld [vmem:[#allocation16 + $0x2150] sm:$0xff] }
 0x44a   :  { %4906 = vmatpush1.bf16.msra.mxu1 %v4905_v2  ;;  %4780 = vmatprep.subr.bf16.mxu0 %v4779_v3  ;;  %v4795_v2 = vpack.c.bf16 %v1640_v56, %v1618_v54  ;;  %v1619_v3 = vld [vmem:[#allocation16 + $0x1bd0] sm:$0xff] }
 0x44b   :  { %4908 = vmatprep.subr.bf16.mxu1 %v4907_v4  ;;  %v1641_v4 = vld [vmem:[#allocation16 + $0x1c80] sm:$0xff] }
 0x44c   :  { %2934 = vmatmul.mubr.f32.vlgmr.msra.gmra.mrb[10].mxu0 %v6212_v16  ;;  %v4925_v15 = vpack.c.bf16 %v1641_v4, %v1619_v3  ;;  %v4933_v3 = vpack.c.bf16 %v1729_v48, %v1707_v47 }
 0x44d   :  { %3088 = vmatmul.mubr.f32.vlgmr.msra.gmra.mrb[20].mxu1 %v6212_v16  ;;  %2939 = vmatprep.mubr.f32.mxu0 %v6220_v25 }
 0x44e   :  { %4782 = vmatpush1.bf16.msra.mxu0 %v4781_v17  ;;  %3093 = vmatprep.mubr.f32.mxu1 %v6220_v25  ;;  %v2146_v17 = vrot.slane %v2137_v5, %v6180_v50 }
 0x44f   :  { %4910 = vmatpush1.bf16.msra.mxu1 %v4909_v18  ;;  %4784 = vmatprep.subr.bf16.mxu0 %v4783_v24  ;;  %v2154_v18 = vrot.slane %v2137_v5, %v6230_v1  ;;  %v1661_v24 = vld [vmem:[#allocation16 + $0x1d20] sm:$0xff] }
 0x450   :  { %2940 = vmatmul.mubr.f32.gmra.mrb[12].mxu0 %v6223_v31  ;;  %4912 = vmatprep.subr.bf16.mxu1 %v4911_v21  ;;  %v1683_v21 = vld [vmem:[#allocation16 + $0x1dd0] sm:$0xff] }
 0x451   :  { %3094 = vmatmul.mubr.f32.gmra.mrb[22].mxu1 %v6223_v31  ;;  %3010 = vmatprep.mubr.f32.mxu0 %v6241_v59  ;;  %v4801_v39 = vpack.c.bf16 %v1683_v21, %v1661_v24  ;;  %v1818_v24 = vld [vmem:[#allocation16 + $0x2208] sm:$0xff]  ;;  %v1793_v21 = vld [vmem:[#allocation16 + $0x2140] sm:$0xff] }
 0x452   :  { %4786 = vmatpush1.bf16.msra.mxu0 %v4785_v28  ;;  %3164 = vmatprep.mubr.f32.mxu1 %v6241_v59 }
 0x453   :  { %4914 = vmatpush1.bf16.msra.mxu1 %v4913_v29  ;;  %4788 = vmatprep.subr.bf16.mxu0 %v4787_v32  ;;  %v1708_v32 = vld [vmem:[#allocation16 + $0x1e98] sm:$0xff] }
 0x454   :  { %4916 = vmatprep.subr.bf16.mxu1 %v4915_v37  ;;  %v4931_v49 = vpack.c.bf16 %v1730_v33, %v1708_v32  ;;  %v1862_v32 = vld [vmem:[#allocation16 + $0x2368] sm:$0xff]  ;;  %v4813_v33 = vpack.c.bf16 %v1815_v22, %v1793_v21  ;;  %v1993_v22 = vld [vmem:[#allocation16 + $0x2780] sm:$0xff] }
 0x456   :  { %4790 = vmatpush1.bf16.msra.mxu0 %v4789_v42 }
 0x457   :  { %4918 = vmatpush1.bf16.msra.mxu1 %v4917_v44  ;;  %4792 = vmatprep.subr.bf16.mxu0 %v4791_v45  ;;  %v4803_v44 = vpack.c.bf16 %v1728_v27, %v1706_v26  ;;  %v1727_v45 = vld [vmem:[#allocation16 + $0x1f30] sm:$0xff]  ;;  %v1817_v26 = vld [vmem:[#allocation16 + $0x2200] sm:$0xff]  ;;  %v1838_v27 = vld [vmem:[#allocation16 + $0x22a8] sm:$0xff] }
 0x458   :  { %4920 = vmatprep.subr.bf16.mxu1 %v4919_v52  ;;  %v1750_v52 = vld [vmem:[#allocation16 + $0x1fe8] sm:$0xff] }
 0x45a   :  { %4794 = vmatpush1.bf16.msra.mxu0 %v4793_v60 }
 0x45b   :  { %4922 = vmatpush1.bf16.msra.mxu1 %v4921_v63  ;;  %4796 = vmatprep.subr.bf16.mxu0 %v4795_v2  ;;  %v4805_v2 = vpack.c.bf16 %v1727_v45, %v1705_v40  ;;  %v1861_v40 = vld [vmem:[#allocation16 + $0x2360] sm:$0xff]  ;;  %v1906_v45 = vld [vmem:[#allocation16 + $0x24c8] sm:$0xff] }
 0x45c   :  { %4924 = vmatprep.subr.bf16.mxu1 %v4923_v7  ;;  %v4807_v7 = vpack.c.bf16 %v1772_v53, %v1750_v52  ;;  %v1881_v52 = vld [vmem:[#allocation16 + $0x2400] sm:$0xff]  ;;  %v1903_v53 = vld [vmem:[#allocation16 + $0x24b0] sm:$0xff] }
 0x45d   :  { %v2396_v28 = vpop.f32.mrb[2].mxu0  ;;  %v2550_v29 = vpop.f32.mrb[12].mxu1 }
 0x45e   :  { %4798 = vmatpush1.bf16.msra.mxu0 %v4797_v14  ;;  %v5611_v35 = vadd.f32 %v2396_v28, %v2146_v17  ;;  %v5615_v36 = vadd.f32 %v2550_v29, %v2154_v18  ;;  %v2398_v37 = vpop.f32.mrb[3].mxu0  ;;  %v2552_v38 = vpop.f32.mrb[13].mxu1  ;;  %v1773_v14 = vld [vmem:[#allocation16 + $0x20a0] sm:$0xff]  ;;  %v1860_v28 = vld [vmem:[#allocation16 + $0x2358] sm:$0xff] }
 0x45f   :  { %4926 = vmatpush1.bf16.msra.mxu1 %v4925_v15  ;;  %v5612_v41 = vadd.f32 %v2398_v37, %v2150_v30  ;;  %v5616_v42 = vadd.f32 %v2552_v38, %v2158_v19  ;;  %4800 = vmatprep.subr.bf16.mxu0 %v4799_v20  ;;  %v1794_v15 = vld [vmem:[#allocation16 + $0x2148] sm:$0xff]  ;;  %v4809_v20 = vpack.c.bf16 %v1771_v10, %v1749_v8  ;;  %v1840_v29 = vld [vmem:[#allocation16 + $0x22b8] sm:$0xff]  ;;  %v1837_v37 = vld [vmem:[#allocation16 + $0x22a0] sm:$0xff] }
 0x460   :  { %3947 = vst [vmem:[#allocation19] sm:$0xff] %v5611_v35  ;;  %3949 = vst [vmem:[#allocation19 + $0x10] sm:$0xff] %v5615_v36  ;;  %4928 = vmatprep.subr.bf16.mxu1 %v4927_v34  ;;  %v4941_v35 = vpack.c.bf16 %v1817_v26, %v1795_v23  ;;  %v4815_v36 = vpack.c.bf16 %v1860_v28, %v1838_v27  ;;  %v1859_v38 = vld [vmem:[#allocation16 + $0x2350] sm:$0xff]  ;;  %v1949_v10 = vld [vmem:[#allocation16 + $0x2620] sm:$0xff] }
 0x461   :  { %3948 = vst [vmem:[#allocation19 + $0x8] sm:$0xff] %v5612_v41  ;;  %3950 = vst [vmem:[#allocation19 + $0x18] sm:$0xff] %v5616_v42  ;;  %v2402_v54 = vpop.f32.mrb[4].mxu0  ;;  %v2556_v56 = vpop.f32.mrb[14].mxu1  ;;  %v1882_v41 = vld [vmem:[#allocation16 + $0x2408] sm:$0xff]  ;;  %v1904_v42 = vld [vmem:[#allocation16 + $0x24b8] sm:$0xff]  ;;  %v4817_v47 = vpack.c.bf16 %v1859_v38, %v1837_v37 }
 0x462   :  { %4802 = vmatpush1.bf16.msra.mxu0 %v4801_v39  ;;  %v5613_v60 = vadd.f32 %v2402_v54, %v2146_v17  ;;  %v5617_v61 = vadd.f32 %v2556_v56, %v2154_v18  ;;  %v2404_v62 = vpop.f32.mrb[5].mxu0  ;;  %v2558_v63 = vpop.f32.mrb[15].mxu1  ;;  %v1816_v17 = vld [vmem:[#allocation16 + $0x21f8] sm:$0xff]  ;;  %v1839_v39 = vld [vmem:[#allocation16 + $0x22b0] sm:$0xff]  ;;  %v2014_v23 = vld [vmem:[#allocation16 + $0x2828] sm:$0xff] }
 0x463   :  { %4930 = vmatpush1.bf16.msra.mxu1 %v4929_v46  ;;  %v5614_v4 = vadd.f32 %v2404_v62, %v2150_v30  ;;  %v5618_v5 = vadd.f32 %v2558_v63, %v2158_v19  ;;  %4804 = vmatprep.subr.bf16.mxu0 %v4803_v44  ;;  %v1796_v18 = vld [vmem:[#allocation16 + $0x2158] sm:$0xff]  ;;  %v4937_v30 = vpack.c.bf16 %v1773_v14, %v1751_v11  ;;  %v1883_v54 = vld [vmem:[#allocation16 + $0x2410] sm:$0xff]  ;;  %v1950_v62 = vld [vmem:[#allocation16 + $0x2628] sm:$0xff] }
 0x464   :  { %3969 = vst [vmem:[#allocation19 + $0xb0] sm:$0xff] %v5613_v60  ;;  %3971 = vst [vmem:[#allocation19 + $0xc0] sm:$0xff] %v5617_v61  ;;  %4932 = vmatprep.subr.bf16.mxu1 %v4931_v49  ;;  %v4811_v19 = vpack.c.bf16 %v1816_v17, %v1794_v15  ;;  %v4939_v34 = vpack.c.bf16 %v1818_v24, %v1796_v18  ;;  %v4943_v46 = vpack.c.bf16 %v1862_v32, %v1840_v29  ;;  %v1884_v44 = vld [vmem:[#allocation16 + $0x2418] sm:$0xff]  ;;  %v1970_v11 = vld [vmem:[#allocation16 + $0x26c8] sm:$0xff] }
 0x465   :  { %3970 = vst [vmem:[#allocation19 + $0xb8] sm:$0xff] %v5614_v4  ;;  %3972 = vst [vmem:[#allocation19 + $0xc8] sm:$0xff] %v5618_v5  ;;  %v4945_v48 = vpack.c.bf16 %v1861_v40, %v1839_v39  ;;  %v4819_v49 = vpack.c.bf16 %v1904_v42, %v1882_v41  ;;  %v4947_v56 = vpack.c.bf16 %v1906_v45, %v1884_v44  ;;  %v1948_v60 = vld [vmem:[#allocation16 + $0x2618] sm:$0xff]  ;;  %v1925_v4 = vld [vmem:[#allocation16 + $0x2560] sm:$0xff] }
 0x466   :  { %4806 = vmatpush1.bf16.msra.mxu0 %v4805_v2  ;;  %v1928_v61 = vld [vmem:[#allocation16 + $0x2578] sm:$0xff]  ;;  %v4821_v63 = vpack.c.bf16 %v1903_v53, %v1881_v52  ;;  %v4949_v2 = vpack.c.bf16 %v1905_v57, %v1883_v54  ;;  %v1947_v5 = vld [vmem:[#allocation16 + $0x2610] sm:$0xff]  ;;  %v1994_v15 = vld [vmem:[#allocation16 + $0x2788] sm:$0xff] }
 0x467   :  { %4934 = vmatpush1.bf16.msra.mxu1 %v4933_v3  ;;  %4808 = vmatprep.subr.bf16.mxu0 %v4807_v7  ;;  %v4823_v3 = vpack.c.bf16 %v1948_v60, %v1926_v58  ;;  %v1927_v7 = vld [vmem:[#allocation16 + $0x2570] sm:$0xff]  ;;  %v4951_v8 = vpack.c.bf16 %v1950_v62, %v1928_v61  ;;  %v1972_v14 = vld [vmem:[#allocation16 + $0x26d8] sm:$0xff]  ;;  %v4825_v17 = vpack.c.bf16 %v1947_v5, %v1925_v4  ;;  %v2038_v27 = vld [vmem:[#allocation16 + $0x28e8] sm:$0xff] }
 0x468   :  { %4936 = vmatprep.subr.bf16.mxu1 %v4935_v12  ;;  %v1992_v12 = vld [vmem:[#allocation16 + $0x2778] sm:$0xff]  ;;  %v4953_v18 = vpack.c.bf16 %v1949_v10, %v1927_v7  ;;  %v4955_v21 = vpack.c.bf16 %v1994_v15, %v1972_v14  ;;  %v2037_v38 = vld [vmem:[#allocation16 + $0x28e0] sm:$0xff]  ;;  %v2058_v39 = vld [vmem:[#allocation16 + $0x2988] sm:$0xff] }
 0x469   :  { %v4827_v24 = vpack.c.bf16 %v1992_v12, %v1970_v11  ;;  %v2016_v26 = vld [vmem:[#allocation16 + $0x2838] sm:$0xff]  ;;  %v2082_v41 = vld [vmem:[#allocation16 + $0x2a48] sm:$0xff]  ;;  %v2081_v53 = vld [vmem:[#allocation16 + $0x2a40] sm:$0xff] }
 0x46a   :  { %4810 = vmatpush1.bf16.msra.mxu0 %v4809_v20  ;;  %v1969_v20 = vld [vmem:[#allocation16 + $0x26c0] sm:$0xff]  ;;  %v4959_v37 = vpack.c.bf16 %v2038_v27, %v2016_v26  ;;  %v2060_v40 = vld [vmem:[#allocation16 + $0x2998] sm:$0xff]  ;;  %v2102_v54 = vld [vmem:[#allocation16 + $0x2ae8] sm:$0xff] }
 0x46b   :  { %4938 = vmatpush1.bf16.msra.mxu1 %v4937_v30  ;;  %4812 = vmatprep.subr.bf16.mxu0 %v4811_v19  ;;  %v1991_v30 = vld [vmem:[#allocation16 + $0x2770] sm:$0xff]  ;;  %v4963_v52 = vpack.c.bf16 %v2082_v41, %v2060_v40  ;;  %v2104_v57 = vld [vmem:[#allocation16 + $0x2af8] sm:$0xff]  ;;  %v2126_v58 = vld [vmem:[#allocation16 + $0x2ba8] sm:$0xff] }
 0x46c   :  { %4940 = vmatprep.subr.bf16.mxu1 %v4939_v34  ;;  %v1971_v19 = vld [vmem:[#allocation16 + $0x26d0] sm:$0xff]  ;;  %v2036_v34 = vld [vmem:[#allocation16 + $0x28d8] sm:$0xff]  ;;  %v4829_v28 = vpack.c.bf16 %v1991_v30, %v1969_v20  ;;  %v4967_v4 = vpack.c.bf16 %v2126_v58, %v2104_v57  ;;  %v2125_v5 = vld [vmem:[#allocation16 + $0x2ba0] sm:$0xff] }
 0x46d   :  { %v4957_v29 = vpack.c.bf16 %v1993_v22, %v1971_v19  ;;  %v4831_v32 = vpack.c.bf16 %v2036_v34, %v2014_v23  ;;  %v742_v7 = vld [vmem:[#allocation16 + $0x68] sm:$0xff]  ;;  %v744_v10 = vld [vmem:[#allocation16 + $0x78] sm:$0xff]  ;;  %v743_v20 = vld [vmem:[#allocation16 + $0x70] sm:$0xff] }
 0x46e   :  { %4814 = vmatpush1.bf16.msra.mxu0 %v4813_v33  ;;  %v2013_v33 = vld [vmem:[#allocation16 + $0x2820] sm:$0xff]  ;;  %v766_v11 = vld [vmem:[#allocation16 + $0x128] sm:$0xff]  ;;  %v788_v22 = vld [vmem:[#allocation16 + $0x1d8] sm:$0xff] }
 0x46f   :  { %4942 = vmatpush1.bf16.msra.mxu1 %v4941_v35  ;;  %4816 = vmatprep.subr.bf16.mxu0 %v4815_v36  ;;  %v2035_v35 = vld [vmem:[#allocation16 + $0x28d0] sm:$0xff]  ;;  %v765_v30 = vld [vmem:[#allocation16 + $0x120] sm:$0xff]  ;;  %v786_v19 = vld [vmem:[#allocation16 + $0x1c8] sm:$0xff] }
 0x470   :  { %4944 = vmatprep.subr.bf16.mxu1 %v4943_v46  ;;  %v2015_v36 = vld [vmem:[#allocation16 + $0x2830] sm:$0xff]  ;;  %v2080_v46 = vld [vmem:[#allocation16 + $0x2a38] sm:$0xff]  ;;  %v4833_v42 = vpack.c.bf16 %v2035_v35, %v2013_v33  ;;  %v810_v23 = vld [vmem:[#allocation16 + $0x288] sm:$0xff]  ;;  %v5101_v26 = vpack.c.bf16 %v765_v30, %v743_v20 }
 0x471   :  { %v4961_v44 = vpack.c.bf16 %v2037_v38, %v2015_v36  ;;  %v4835_v45 = vpack.c.bf16 %v2080_v46, %v2058_v39  ;;  %v5103_v33 = vpack.c.bf16 %v810_v23, %v788_v22  ;;  %v809_v35 = vld [vmem:[#allocation16 + $0x280] sm:$0xff]  ;;  %v830_v36 = vld [vmem:[#allocation16 + $0x328] sm:$0xff]  ;;  %v832_v38 = vld [vmem:[#allocation16 + $0x338] sm:$0xff] }
 0x472   :  { %4818 = vmatpush1.bf16.msra.mxu0 %v4817_v47  ;;  %v2057_v47 = vld [vmem:[#allocation16 + $0x2980] sm:$0xff]  ;;  %v854_v39 = vld [vmem:[#allocation16 + $0x3e8] sm:$0xff]  ;;  %v984_v20 = vld [vmem:[#allocation16 + $0x7f8] sm:$0xff] }
 0x473   :  { %4946 = vmatpush1.bf16.msra.mxu1 %v4945_v48  ;;  %4820 = vmatprep.subr.bf16.mxu0 %v4819_v49  ;;  %v2079_v48 = vld [vmem:[#allocation16 + $0x2a30] sm:$0xff]  ;;  %v964_v30 = vld [vmem:[#allocation16 + $0x758] sm:$0xff] }
 0x474   :  { %4948 = vmatprep.subr.bf16.mxu1 %v4947_v56  ;;  %v2059_v49 = vld [vmem:[#allocation16 + $0x2990] sm:$0xff]  ;;  %v2124_v56 = vld [vmem:[#allocation16 + $0x2b98] sm:$0xff]  ;;  %v4837_v60 = vpack.c.bf16 %v2079_v48, %v2057_v47  ;;  %v5107_v47 = vpack.c.bf16 %v854_v39, %v832_v38  ;;  %v853_v48 = vld [vmem:[#allocation16 + $0x3e0] sm:$0xff] }
 0x475   :  { %v4965_v61 = vpack.c.bf16 %v2081_v53, %v2059_v49  ;;  %v4839_v62 = vpack.c.bf16 %v2124_v56, %v2102_v54  ;;  %v874_v49 = vld [vmem:[#allocation16 + $0x488] sm:$0xff]  ;;  %v876_v53 = vld [vmem:[#allocation16 + $0x498] sm:$0xff] }
 0x476   :  { %4822 = vmatpush1.bf16.msra.mxu0 %v4821_v63  ;;  %v2101_v63 = vld [vmem:[#allocation16 + $0x2ae0] sm:$0xff]  ;;  %v898_v54 = vld [vmem:[#allocation16 + $0x548] sm:$0xff] }
 0x477   :  { %4950 = vmatpush1.bf16.msra.mxu1 %v4949_v2  ;;  %4824 = vmatprep.subr.bf16.mxu0 %v4823_v3  ;;  %v2123_v2 = vld [vmem:[#allocation16 + $0x2b90] sm:$0xff] }
 0x478   :  { %4952 = vmatprep.subr.bf16.mxu1 %v4951_v8  ;;  %v2103_v3 = vld [vmem:[#allocation16 + $0x2af0] sm:$0xff]  ;;  %v764_v8 = vld [vmem:[#allocation16 + $0x118] sm:$0xff]  ;;  %v4841_v12 = vpack.c.bf16 %v2123_v2, %v2101_v63  ;;  %v5111_v63 = vpack.c.bf16 %v898_v54, %v876_v53  ;;  %v897_v2 = vld [vmem:[#allocation16 + $0x540] sm:$0xff] }
 0x479   :  { %v4969_v14 = vpack.c.bf16 %v2125_v5, %v2103_v3  ;;  %v4971_v15 = vpack.c.bf16 %v764_v8, %v742_v7  ;;  %v918_v3 = vld [vmem:[#allocation16 + $0x5e8] sm:$0xff]  ;;  %v920_v5 = vld [vmem:[#allocation16 + $0x5f8] sm:$0xff] }
 0x47a   :  { %4826 = vmatpush1.bf16.msra.mxu0 %v4825_v17  ;;  %v5099_v17 = vpack.c.bf16 %v766_v11, %v744_v10  ;;  %v942_v7 = vld [vmem:[#allocation16 + $0x6a8] sm:$0xff] }
 0x47b   :  { %4954 = vmatpush1.bf16.msra.mxu1 %v4953_v18  ;;  %4828 = vmatprep.subr.bf16.mxu0 %v4827_v24  ;;  %v741_v18 = vld [vmem:[#allocation16 + $0x60] sm:$0xff]  ;;  %v763_v24 = vld [vmem:[#allocation16 + $0x110] sm:$0xff] }
 0x47c   :  { %4956 = vmatprep.subr.bf16.mxu1 %v4955_v21  ;;  %v808_v21 = vld [vmem:[#allocation16 + $0x278] sm:$0xff]  ;;  %v4973_v34 = vpack.c.bf16 %v763_v24, %v741_v18  ;;  %v941_v18 = vld [vmem:[#allocation16 + $0x6a0] sm:$0xff]  ;;  %v962_v24 = vld [vmem:[#allocation16 + $0x748] sm:$0xff] }
 0x47d   :  { %v4975_v27 = vpack.c.bf16 %v808_v21, %v786_v19  ;;  %v986_v19 = vld [vmem:[#allocation16 + $0x808] sm:$0xff]  ;;  %v4991_v23 = vpack.c.bf16 %v984_v20, %v962_v24 }
 0x47e   :  { %4830 = vmatpush1.bf16.msra.mxu0 %v4829_v28  ;;  %v785_v28 = vld [vmem:[#allocation16 + $0x1c0] sm:$0xff]  ;;  %v1162_v24 = vld [vmem:[#allocation16 + $0xd88] sm:$0xff] }
 0x47f   :  { %4958 = vmatpush1.bf16.msra.mxu1 %v4957_v29  ;;  %4832 = vmatprep.subr.bf16.mxu0 %v4831_v32  ;;  %v807_v29 = vld [vmem:[#allocation16 + $0x270] sm:$0xff] }
 0x480   :  { %4960 = vmatprep.subr.bf16.mxu1 %v4959_v37  ;;  %v787_v32 = vld [vmem:[#allocation16 + $0x1d0] sm:$0xff]  ;;  %v852_v37 = vld [vmem:[#allocation16 + $0x3d8] sm:$0xff]  ;;  %v4977_v46 = vpack.c.bf16 %v807_v29, %v785_v28  ;;  %v5119_v28 = vpack.c.bf16 %v986_v19, %v964_v30  ;;  %v985_v29 = vld [vmem:[#allocation16 + $0x800] sm:$0xff] }
 0x481   :  { %v5105_v40 = vpack.c.bf16 %v809_v35, %v787_v32  ;;  %v4979_v41 = vpack.c.bf16 %v852_v37, %v830_v36  ;;  %v1006_v32 = vld [vmem:[#allocation16 + $0x8a8] sm:$0xff]  ;;  %v1008_v35 = vld [vmem:[#allocation16 + $0x8b8] sm:$0xff] }
 0x482   :  { %4834 = vmatpush1.bf16.msra.mxu0 %v4833_v42  ;;  %v829_v42 = vld [vmem:[#allocation16 + $0x320] sm:$0xff]  ;;  %v1030_v36 = vld [vmem:[#allocation16 + $0x968] sm:$0xff] }
 0x483   :  { %4962 = vmatpush1.bf16.msra.mxu1 %v4961_v44  ;;  %4836 = vmatprep.subr.bf16.mxu0 %v4835_v45  ;;  %v851_v44 = vld [vmem:[#allocation16 + $0x3d0] sm:$0xff] }
 0x484   :  { %4964 = vmatprep.subr.bf16.mxu1 %v4963_v52  ;;  %v831_v45 = vld [vmem:[#allocation16 + $0x330] sm:$0xff]  ;;  %v896_v52 = vld [vmem:[#allocation16 + $0x538] sm:$0xff]  ;;  %v4981_v56 = vpack.c.bf16 %v851_v44, %v829_v42  ;;  %v5123_v42 = vpack.c.bf16 %v1030_v36, %v1008_v35  ;;  %v1029_v44 = vld [vmem:[#allocation16 + $0x960] sm:$0xff] }
 0x485   :  { %v5109_v57 = vpack.c.bf16 %v853_v48, %v831_v45  ;;  %v4983_v58 = vpack.c.bf16 %v896_v52, %v874_v49  ;;  %v1050_v45 = vld [vmem:[#allocation16 + $0xa08] sm:$0xff]  ;;  %v1052_v48 = vld [vmem:[#allocation16 + $0xa18] sm:$0xff] }
 0x486   :  { %4838 = vmatpush1.bf16.msra.mxu0 %v4837_v60  ;;  %v873_v60 = vld [vmem:[#allocation16 + $0x480] sm:$0xff]  ;;  %v1074_v49 = vld [vmem:[#allocation16 + $0xac8] sm:$0xff] }
 0x487   :  { %4966 = vmatpush1.bf16.msra.mxu1 %v4965_v61  ;;  %4840 = vmatprep.subr.bf16.mxu0 %v4839_v62  ;;  %v895_v61 = vld [vmem:[#allocation16 + $0x530] sm:$0xff] }
 0x488   :  { %4968 = vmatprep.subr.bf16.mxu1 %v4967_v4  ;;  %v875_v62 = vld [vmem:[#allocation16 + $0x490] sm:$0xff]  ;;  %v940_v4 = vld [vmem:[#allocation16 + $0x698] sm:$0xff]  ;;  %v4985_v8 = vpack.c.bf16 %v895_v61, %v873_v60  ;;  %v5127_v60 = vpack.c.bf16 %v1074_v49, %v1052_v48  ;;  %v1073_v61 = vld [vmem:[#allocation16 + $0xac0] sm:$0xff] }
 0x489   :  { %v5113_v10 = vpack.c.bf16 %v897_v2, %v875_v62  ;;  %v4987_v11 = vpack.c.bf16 %v940_v4, %v918_v3  ;;  %v1094_v62 = vld [vmem:[#allocation16 + $0xb68] sm:$0xff]  ;;  %v1096_v2 = vld [vmem:[#allocation16 + $0xb78] sm:$0xff] }
 0x48a   :  { %4842 = vmatpush1.bf16.msra.mxu0 %v4841_v12  ;;  %v917_v12 = vld [vmem:[#allocation16 + $0x5e0] sm:$0xff]  ;;  %v1118_v3 = vld [vmem:[#allocation16 + $0xc28] sm:$0xff] }
 0x48b   :  { %4970 = vmatpush1.bf16.msra.mxu1 %v4969_v14  ;;  %4972 = vmatprep.subr.bf16.mxu0 %v4971_v15  ;;  %v939_v14 = vld [vmem:[#allocation16 + $0x690] sm:$0xff] }
 0x48c   :  { %5100 = vmatprep.subr.bf16.mxu1 %v5099_v17  ;;  %v919_v15 = vld [vmem:[#allocation16 + $0x5f0] sm:$0xff]  ;;  %v5115_v17 = vpack.c.bf16 %v942_v7, %v920_v5  ;;  %v4989_v21 = vpack.c.bf16 %v939_v14, %v917_v12  ;;  %v5131_v12 = vpack.c.bf16 %v1118_v3, %v1096_v2  ;;  %v1117_v14 = vld [vmem:[#allocation16 + $0xc20] sm:$0xff] }
 0x48d   :  { %3011 = vmatmul.mubr.f32.vlgmr.msra.gmra.mrb[10].mxu0 %v6244_v0  ;;  %v5117_v22 = vpack.c.bf16 %v941_v18, %v919_v15  ;;  %v1138_v15 = vld [vmem:[#allocation16 + $0xcc8] sm:$0xff]  ;;  %v1140_v18 = vld [vmem:[#allocation16 + $0xcd8] sm:$0xff] }
 0x48e   :  { %3165 = vmatmul.mubr.f32.vlgmr.msra.gmra.mrb[20].mxu1 %v6244_v0  ;;  %3016 = vmatprep.mubr.f32.mxu0 %v6252_v13 }
 0x48f   :  { %3170 = vmatprep.mubr.f32.mxu1 %v6252_v13  ;;  %4974 = vmatpush1.bf16.msra.mxu0 %v4973_v34  ;;  %v961_v34 = vld [vmem:[#allocation16 + $0x740] sm:$0xff] }
 0x490   :  { %5102 = vmatpush1.bf16.msra.mxu1 %v5101_v26  ;;  %4976 = vmatprep.subr.bf16.mxu0 %v4975_v27  ;;  %v983_v26 = vld [vmem:[#allocation16 + $0x7f0] sm:$0xff] }
 0x491   :  { %3017 = vmatmul.mubr.f32.gmra.mrb[12].mxu0 %v6255_v51  ;;  %5104 = vmatprep.subr.bf16.mxu1 %v5103_v33  ;;  %v963_v27 = vld [vmem:[#allocation16 + $0x750] sm:$0xff]  ;;  %v1028_v33 = vld [vmem:[#allocation16 + $0x958] sm:$0xff]  ;;  %v4993_v37 = vpack.c.bf16 %v983_v26, %v961_v34  ;;  %v5135_v34 = vpack.c.bf16 %v1162_v24, %v1140_v18  ;;  %v1161_v26 = vld [vmem:[#allocation16 + $0xd80] sm:$0xff] }
 0x492   :  { %3171 = vmatmul.mubr.f32.gmra.mrb[22].mxu1 %v6255_v51  ;;  %3241 = vmatprep.mubr.f32.mxu0 %v6209_v9  ;;  %v5121_v38 = vpack.c.bf16 %v985_v29, %v963_v27  ;;  %v4995_v39 = vpack.c.bf16 %v1028_v33, %v1006_v32  ;;  %v1182_v27 = vld [vmem:[#allocation16 + $0xe28] sm:$0xff]  ;;  %v1184_v29 = vld [vmem:[#allocation16 + $0xe38] sm:$0xff] }
 0x493   :  { %4978 = vmatpush1.bf16.msra.mxu0 %v4977_v46  ;;  %3395 = vmatprep.mubr.f32.mxu1 %v6209_v9  ;;  %v1005_v46 = vld [vmem:[#allocation16 + $0x8a0] sm:$0xff]  ;;  %v1206_v32 = vld [vmem:[#allocation16 + $0xee8] sm:$0xff] }
 0x494   :  { %5106 = vmatpush1.bf16.msra.mxu1 %v5105_v40  ;;  %4980 = vmatprep.subr.bf16.mxu0 %v4979_v41  ;;  %v1027_v40 = vld [vmem:[#allocation16 + $0x950] sm:$0xff] }
 0x495   :  { %5108 = vmatprep.subr.bf16.mxu1 %v5107_v47  ;;  %v1007_v41 = vld [vmem:[#allocation16 + $0x8b0] sm:$0xff]  ;;  %v1072_v47 = vld [vmem:[#allocation16 + $0xab8] sm:$0xff]  ;;  %v4997_v52 = vpack.c.bf16 %v1027_v40, %v1005_v46  ;;  %v5139_v46 = vpack.c.bf16 %v1206_v32, %v1184_v29  ;;  %v1205_v40 = vld [vmem:[#allocation16 + $0xee0] sm:$0xff] }
 0x496   :  { %v5125_v53 = vpack.c.bf16 %v1029_v44, %v1007_v41  ;;  %v4999_v54 = vpack.c.bf16 %v1072_v47, %v1050_v45  ;;  %v1226_v41 = vld [vmem:[#allocation16 + $0xf88] sm:$0xff]  ;;  %v1228_v44 = vld [vmem:[#allocation16 + $0xf98] sm:$0xff] }
 0x497   :  { %4982 = vmatpush1.bf16.msra.mxu0 %v4981_v56  ;;  %v1049_v56 = vld [vmem:[#allocation16 + $0xa00] sm:$0xff]  ;;  %v1250_v45 = vld [vmem:[#allocation16 + $0x1048] sm:$0xff] }
 0x498   :  { %5110 = vmatpush1.bf16.msra.mxu1 %v5109_v57  ;;  %4984 = vmatprep.subr.bf16.mxu0 %v4983_v58  ;;  %v1071_v57 = vld [vmem:[#allocation16 + $0xab0] sm:$0xff] }
 0x499   :  { %5112 = vmatprep.subr.bf16.mxu1 %v5111_v63  ;;  %v1051_v58 = vld [vmem:[#allocation16 + $0xa10] sm:$0xff]  ;;  %v1116_v63 = vld [vmem:[#allocation16 + $0xc18] sm:$0xff]  ;;  %v5001_v4 = vpack.c.bf16 %v1071_v57, %v1049_v56  ;;  %v5143_v56 = vpack.c.bf16 %v1250_v45, %v1228_v44  ;;  %v1249_v57 = vld [vmem:[#allocation16 + $0x1040] sm:$0xff] }
 0x49a   :  { %v5129_v5 = vpack.c.bf16 %v1073_v61, %v1051_v58  ;;  %v5003_v7 = vpack.c.bf16 %v1116_v63, %v1094_v62  ;;  %v1270_v58 = vld [vmem:[#allocation16 + $0x10e8] sm:$0xff]  ;;  %v1272_v61 = vld [vmem:[#allocation16 + $0x10f8] sm:$0xff] }
 0x49b   :  { %4986 = vmatpush1.bf16.msra.mxu0 %v4985_v8  ;;  %v1093_v8 = vld [vmem:[#allocation16 + $0xb60] sm:$0xff]  ;;  %v1294_v62 = vld [vmem:[#allocation16 + $0x11a8] sm:$0xff] }
 0x49c   :  { %5114 = vmatpush1.bf16.msra.mxu1 %v5113_v10  ;;  %4988 = vmatprep.subr.bf16.mxu0 %v4987_v11  ;;  %v1115_v10 = vld [vmem:[#allocation16 + $0xc10] sm:$0xff] }
 0x49d   :  { %5116 = vmatprep.subr.bf16.mxu1 %v5115_v17  ;;  %v1095_v11 = vld [vmem:[#allocation16 + $0xb70] sm:$0xff]  ;;  %v1160_v17 = vld [vmem:[#allocation16 + $0xd78] sm:$0xff]  ;;  %v5005_v20 = vpack.c.bf16 %v1115_v10, %v1093_v8  ;;  %v5147_v8 = vpack.c.bf16 %v1294_v62, %v1272_v61  ;;  %v1293_v10 = vld [vmem:[#allocation16 + $0x11a0] sm:$0xff] }
 0x49e   :  { %v5133_v30 = vpack.c.bf16 %v1117_v14, %v1095_v11  ;;  %v5007_v19 = vpack.c.bf16 %v1160_v17, %v1138_v15  ;;  %v1314_v11 = vld [vmem:[#allocation16 + $0x1248] sm:$0xff]  ;;  %v1316_v14 = vld [vmem:[#allocation16 + $0x1258] sm:$0xff] }
 0x49f   :  { %4990 = vmatpush1.bf16.msra.mxu0 %v4989_v21  ;;  %v1137_v21 = vld [vmem:[#allocation16 + $0xcc0] sm:$0xff]  ;;  %v1338_v15 = vld [vmem:[#allocation16 + $0x1308] sm:$0xff] }
 0x4a0   :  { %5118 = vmatpush1.bf16.msra.mxu1 %v5117_v22  ;;  %4992 = vmatprep.subr.bf16.mxu0 %v4991_v23  ;;  %v1159_v22 = vld [vmem:[#allocation16 + $0xd70] sm:$0xff] }
 0x4a1   :  { %5120 = vmatprep.subr.bf16.mxu1 %v5119_v28  ;;  %v1139_v23 = vld [vmem:[#allocation16 + $0xcd0] sm:$0xff]  ;;  %v1204_v28 = vld [vmem:[#allocation16 + $0xed8] sm:$0xff]  ;;  %v5009_v33 = vpack.c.bf16 %v1159_v22, %v1137_v21  ;;  %v5151_v21 = vpack.c.bf16 %v1338_v15, %v1316_v14  ;;  %v1337_v22 = vld [vmem:[#allocation16 + $0x1300] sm:$0xff] }
 0x4a2   :  { %v5137_v35 = vpack.c.bf16 %v1161_v26, %v1139_v23  ;;  %v5011_v36 = vpack.c.bf16 %v1204_v28, %v1182_v27  ;;  %v1358_v23 = vld [vmem:[#allocation16 + $0x13a8] sm:$0xff]  ;;  %v1360_v26 = vld [vmem:[#allocation16 + $0x13b8] sm:$0xff] }
 0x4a3   :  { %4994 = vmatpush1.bf16.msra.mxu0 %v4993_v37  ;;  %v1181_v37 = vld [vmem:[#allocation16 + $0xe20] sm:$0xff]  ;;  %v1382_v27 = vld [vmem:[#allocation16 + $0x1468] sm:$0xff] }
 0x4a4   :  { %5122 = vmatpush1.bf16.msra.mxu1 %v5121_v38  ;;  %4996 = vmatprep.subr.bf16.mxu0 %v4995_v39  ;;  %v1203_v38 = vld [vmem:[#allocation16 + $0xed0] sm:$0xff] }
 0x4a5   :  { %5124 = vmatprep.subr.bf16.mxu1 %v5123_v42  ;;  %v1183_v39 = vld [vmem:[#allocation16 + $0xe30] sm:$0xff]  ;;  %v1248_v42 = vld [vmem:[#allocation16 + $0x1038] sm:$0xff]  ;;  %v5013_v47 = vpack.c.bf16 %v1203_v38, %v1181_v37  ;;  %v5155_v37 = vpack.c.bf16 %v1382_v27, %v1360_v26  ;;  %v1381_v38 = vld [vmem:[#allocation16 + $0x1460] sm:$0xff] }
 0x4a6   :  { %v5141_v48 = vpack.c.bf16 %v1205_v40, %v1183_v39  ;;  %v5015_v49 = vpack.c.bf16 %v1248_v42, %v1226_v41  ;;  %v1402_v39 = vld [vmem:[#allocation16 + $0x1508] sm:$0xff]  ;;  %v1404_v40 = vld [vmem:[#allocation16 + $0x1518] sm:$0xff] }
 0x4a7   :  { %4998 = vmatpush1.bf16.msra.mxu0 %v4997_v52  ;;  %v1225_v52 = vld [vmem:[#allocation16 + $0xf80] sm:$0xff]  ;;  %v1426_v41 = vld [vmem:[#allocation16 + $0x15c8] sm:$0xff] }
 0x4a8   :  { %5126 = vmatpush1.bf16.msra.mxu1 %v5125_v53  ;;  %5000 = vmatprep.subr.bf16.mxu0 %v4999_v54  ;;  %v1247_v53 = vld [vmem:[#allocation16 + $0x1030] sm:$0xff] }
 0x4a9   :  { %5128 = vmatprep.subr.bf16.mxu1 %v5127_v60  ;;  %v1227_v54 = vld [vmem:[#allocation16 + $0xf90] sm:$0xff]  ;;  %v1292_v60 = vld [vmem:[#allocation16 + $0x1198] sm:$0xff]  ;;  %v5017_v63 = vpack.c.bf16 %v1247_v53, %v1225_v52  ;;  %v5159_v52 = vpack.c.bf16 %v1426_v41, %v1404_v40  ;;  %v1425_v53 = vld [vmem:[#allocation16 + $0x15c0] sm:$0xff] }
 0x4aa   :  { %v5145_v2 = vpack.c.bf16 %v1249_v57, %v1227_v54  ;;  %v5019_v3 = vpack.c.bf16 %v1292_v60, %v1270_v58  ;;  %v1446_v54 = vld [vmem:[#allocation16 + $0x1668] sm:$0xff]  ;;  %v1448_v57 = vld [vmem:[#allocation16 + $0x1678] sm:$0xff] }
 0x4ab   :  { %5002 = vmatpush1.bf16.msra.mxu0 %v5001_v4  ;;  %v1269_v4 = vld [vmem:[#allocation16 + $0x10e0] sm:$0xff]  ;;  %v1470_v58 = vld [vmem:[#allocation16 + $0x1728] sm:$0xff] }
 0x4ac   :  { %5130 = vmatpush1.bf16.msra.mxu1 %v5129_v5  ;;  %5004 = vmatprep.subr.bf16.mxu0 %v5003_v7  ;;  %v1291_v5 = vld [vmem:[#allocation16 + $0x1190] sm:$0xff] }
 0x4ad   :  { %5132 = vmatprep.subr.bf16.mxu1 %v5131_v12  ;;  %v1271_v7 = vld [vmem:[#allocation16 + $0x10f0] sm:$0xff]  ;;  %v1336_v12 = vld [vmem:[#allocation16 + $0x12f8] sm:$0xff]  ;;  %v5021_v17 = vpack.c.bf16 %v1291_v5, %v1269_v4  ;;  %v1469_v5 = vld [vmem:[#allocation16 + $0x1720] sm:$0xff] }
 0x4ae   :  { %v5149_v18 = vpack.c.bf16 %v1293_v10, %v1271_v7  ;;  %v5023_v24 = vpack.c.bf16 %v1336_v12, %v1314_v11  ;;  %v1447_v4 = vld [vmem:[#allocation16 + $0x1670] sm:$0xff]  ;;  %v1490_v7 = vld [vmem:[#allocation16 + $0x17c8] sm:$0xff]  ;;  %v1492_v10 = vld [vmem:[#allocation16 + $0x17d8] sm:$0xff] }
 0x4af   :  { %5006 = vmatpush1.bf16.msra.mxu0 %v5005_v20  ;;  %v1313_v20 = vld [vmem:[#allocation16 + $0x1240] sm:$0xff]  ;;  %v1514_v11 = vld [vmem:[#allocation16 + $0x1888] sm:$0xff]  ;;  %v5165_v14 = vpack.c.bf16 %v1469_v5, %v1447_v4  ;;  %v2173_v4 = vsub.s32 7, %v6177_v43 }
 0x4b0   :  { %5134 = vmatpush1.bf16.msra.mxu1 %v5133_v30  ;;  %5008 = vmatprep.subr.bf16.mxu0 %v5007_v19  ;;  %v1335_v30 = vld [vmem:[#allocation16 + $0x12f0] sm:$0xff] }
 0x4b1   :  { %5136 = vmatprep.subr.bf16.mxu1 %v5135_v34  ;;  %v1315_v19 = vld [vmem:[#allocation16 + $0x1250] sm:$0xff]  ;;  %v1380_v34 = vld [vmem:[#allocation16 + $0x1458] sm:$0xff]  ;;  %v5025_v28 = vpack.c.bf16 %v1335_v30, %v1313_v20  ;;  %v5167_v20 = vpack.c.bf16 %v1514_v11, %v1492_v10  ;;  %v1513_v30 = vld [vmem:[#allocation16 + $0x1880] sm:$0xff] }
 0x4b2   :  { %v5153_v29 = vpack.c.bf16 %v1337_v22, %v1315_v19  ;;  %v5027_v32 = vpack.c.bf16 %v1380_v34, %v1358_v23  ;;  %v1534_v19 = vld [vmem:[#allocation16 + $0x1928] sm:$0xff]  ;;  %v1536_v22 = vld [vmem:[#allocation16 + $0x1938] sm:$0xff]  ;;  %v5719_v11 = vld [vmem:[#allocation18] sm:$0xff] }
 0x4b3   :  { %5010 = vmatpush1.bf16.msra.mxu0 %v5009_v33  ;;  %v1357_v33 = vld [vmem:[#allocation16 + $0x13a0] sm:$0xff]  ;;  %v1558_v23 = vld [vmem:[#allocation16 + $0x19e8] sm:$0xff]  ;;  %v1688_v10 = vld [vmem:[#allocation16 + $0x1df8] sm:$0xff] }
 0x4b4   :  { %5138 = vmatpush1.bf16.msra.mxu1 %v5137_v35  ;;  %5012 = vmatprep.subr.bf16.mxu0 %v5011_v36  ;;  %v1379_v35 = vld [vmem:[#allocation16 + $0x1450] sm:$0xff] }
 0x4b5   :  { %5140 = vmatprep.subr.bf16.mxu1 %v5139_v46  ;;  %v1359_v36 = vld [vmem:[#allocation16 + $0x13b0] sm:$0xff]  ;;  %v1424_v46 = vld [vmem:[#allocation16 + $0x15b8] sm:$0xff]  ;;  %v5029_v42 = vpack.c.bf16 %v1379_v35, %v1357_v33  ;;  %v5171_v33 = vpack.c.bf16 %v1558_v23, %v1536_v22  ;;  %v1557_v35 = vld [vmem:[#allocation16 + $0x19e0] sm:$0xff] }
 0x4b6   :  { %v5157_v44 = vpack.c.bf16 %v1381_v38, %v1359_v36  ;;  %v5031_v45 = vpack.c.bf16 %v1424_v46, %v1402_v39  ;;  %v1578_v36 = vld [vmem:[#allocation16 + $0x1a88] sm:$0xff]  ;;  %v1580_v38 = vld [vmem:[#allocation16 + $0x1a98] sm:$0xff]  ;;  %v1687_v22 = vld [vmem:[#allocation16 + $0x1df0] sm:$0xff] }
 0x4b7   :  { %5014 = vmatpush1.bf16.msra.mxu0 %v5013_v47  ;;  %v1401_v47 = vld [vmem:[#allocation16 + $0x1500] sm:$0xff]  ;;  %v1602_v39 = vld [vmem:[#allocation16 + $0x1b48] sm:$0xff]  ;;  %v1667_v23 = vld [vmem:[#allocation16 + $0x1d50] sm:$0xff] }
 0x4b8   :  { %5142 = vmatpush1.bf16.msra.mxu1 %v5141_v48  ;;  %5016 = vmatprep.subr.bf16.mxu0 %v5015_v49  ;;  %v1423_v48 = vld [vmem:[#allocation16 + $0x15b0] sm:$0xff] }
 0x4b9   :  { %5144 = vmatprep.subr.bf16.mxu1 %v5143_v56  ;;  %v1403_v49 = vld [vmem:[#allocation16 + $0x1510] sm:$0xff]  ;;  %v1468_v56 = vld [vmem:[#allocation16 + $0x1718] sm:$0xff]  ;;  %v5033_v60 = vpack.c.bf16 %v1423_v48, %v1401_v47  ;;  %v5175_v47 = vpack.c.bf16 %v1602_v39, %v1580_v38  ;;  %v1601_v48 = vld [vmem:[#allocation16 + $0x1b40] sm:$0xff] }
 0x4ba   :  { %v5161_v61 = vpack.c.bf16 %v1425_v53, %v1403_v49  ;;  %v5035_v62 = vpack.c.bf16 %v1468_v56, %v1446_v54  ;;  %v1622_v49 = vld [vmem:[#allocation16 + $0x1be8] sm:$0xff]  ;;  %v1624_v53 = vld [vmem:[#allocation16 + $0x1bf8] sm:$0xff]  ;;  %v6308_v56 = vsub.s32 4, %v6177_v43 }
 0x4bb   :  { %5018 = vmatpush1.bf16.msra.mxu0 %v5017_v63  ;;  %v5163_v63 = vpack.c.bf16 %v1470_v58, %v1448_v57  ;;  %v1646_v54 = vld [vmem:[#allocation16 + $0x1ca8] sm:$0xff]  ;;  %v2169_v58 = vsub.s32 6, %v6177_v43 }
 0x4bc   :  { %5146 = vmatpush1.bf16.msra.mxu1 %v5145_v2  ;;  %5020 = vmatprep.subr.bf16.mxu0 %v5019_v3  ;;  %v1445_v2 = vld [vmem:[#allocation16 + $0x1660] sm:$0xff]  ;;  %v1467_v3 = vld [vmem:[#allocation16 + $0x1710] sm:$0xff]  ;;  %v5179_v5 = vpack.c.bf16 %v1646_v54, %v1624_v53  ;;  %v1754_v54 = vld [vmem:[#allocation16 + $0x2008] sm:$0xff] }
 0x4bd   :  { %5148 = vmatprep.subr.bf16.mxu1 %v5147_v8  ;;  %v1512_v8 = vld [vmem:[#allocation16 + $0x1878] sm:$0xff]  ;;  %v5037_v12 = vpack.c.bf16 %v1467_v3, %v1445_v2  ;;  %v1643_v2 = vld [vmem:[#allocation16 + $0x1c90] sm:$0xff]  ;;  %v1733_v53 = vld [vmem:[#allocation16 + $0x1f60] sm:$0xff] }
 0x4be   :  { %v5039_v15 = vpack.c.bf16 %v1512_v8, %v1490_v7  ;;  %v1623_v3 = vld [vmem:[#allocation16 + $0x1bf0] sm:$0xff]  ;;  %v1645_v7 = vld [vmem:[#allocation16 + $0x1ca0] sm:$0xff]  ;;  %v1666_v8 = vld [vmem:[#allocation16 + $0x1d48] sm:$0xff] }
 0x4bf   :  { %5022 = vmatpush1.bf16.msra.mxu0 %v5021_v17  ;;  %v1489_v17 = vld [vmem:[#allocation16 + $0x17c0] sm:$0xff] }
 0x4c0   :  { %5150 = vmatpush1.bf16.msra.mxu1 %v5149_v18  ;;  %5024 = vmatprep.subr.bf16.mxu0 %v5023_v24  ;;  %v1511_v18 = vld [vmem:[#allocation16 + $0x1870] sm:$0xff] }
 0x4c1   :  { %5152 = vmatprep.subr.bf16.mxu1 %v5151_v21  ;;  %v1491_v24 = vld [vmem:[#allocation16 + $0x17d0] sm:$0xff]  ;;  %v1556_v21 = vld [vmem:[#allocation16 + $0x19d8] sm:$0xff]  ;;  %v5041_v34 = vpack.c.bf16 %v1511_v18, %v1489_v17  ;;  %v2170_v18 = vrot.slane %v5719_v11, %v2169_v58 }
 0x4c2   :  { %v5169_v26 = vpack.c.bf16 %v1513_v30, %v1491_v24  ;;  %v5043_v27 = vpack.c.bf16 %v1556_v21, %v1534_v19  ;;  %v2174_v30 = vrot.slane %v5719_v11, %v2173_v4  ;;  %v5055_v19 = vpack.c.bf16 %v1688_v10, %v1666_v8  ;;  %v1665_v21 = vld [vmem:[#allocation16 + $0x1d40] sm:$0xff] }
 0x4c3   :  { %5026 = vmatpush1.bf16.msra.mxu0 %v5025_v28  ;;  %v1533_v28 = vld [vmem:[#allocation16 + $0x1920] sm:$0xff] }
 0x4c4   :  { %5154 = vmatpush1.bf16.msra.mxu1 %v5153_v29  ;;  %5028 = vmatprep.subr.bf16.mxu0 %v5027_v32  ;;  %v1555_v29 = vld [vmem:[#allocation16 + $0x19d0] sm:$0xff] }
 0x4c5   :  { %5156 = vmatprep.subr.bf16.mxu1 %v5155_v37  ;;  %v1535_v32 = vld [vmem:[#allocation16 + $0x1930] sm:$0xff]  ;;  %v1600_v37 = vld [vmem:[#allocation16 + $0x1b38] sm:$0xff]  ;;  %v5045_v46 = vpack.c.bf16 %v1555_v29, %v1533_v28  ;;  %v1710_v28 = vld [vmem:[#allocation16 + $0x1ea8] sm:$0xff] }
 0x4c6   :  { %v5173_v40 = vpack.c.bf16 %v1557_v35, %v1535_v32  ;;  %v5047_v41 = vpack.c.bf16 %v1600_v37, %v1578_v36  ;;  %v1732_v29 = vld [vmem:[#allocation16 + $0x1f58] sm:$0xff]  ;;  %v1734_v37 = vld [vmem:[#allocation16 + $0x1f68] sm:$0xff] }
 0x4c7   :  { %5030 = vmatpush1.bf16.msra.mxu0 %v5029_v42  ;;  %v1577_v42 = vld [vmem:[#allocation16 + $0x1a80] sm:$0xff]  ;;  %v1712_v36 = vld [vmem:[#allocation16 + $0x1eb8] sm:$0xff] }
 0x4c8   :  { %5158 = vmatpush1.bf16.msra.mxu1 %v5157_v44  ;;  %5032 = vmatprep.subr.bf16.mxu0 %v5031_v45  ;;  %v1599_v44 = vld [vmem:[#allocation16 + $0x1b30] sm:$0xff] }
 0x4c9   :  { %5160 = vmatprep.subr.bf16.mxu1 %v5159_v52  ;;  %v1579_v45 = vld [vmem:[#allocation16 + $0x1a90] sm:$0xff]  ;;  %v1644_v52 = vld [vmem:[#allocation16 + $0x1c98] sm:$0xff]  ;;  %v5049_v57 = vpack.c.bf16 %v1599_v44, %v1577_v42  ;;  %v5059_v44 = vpack.c.bf16 %v1732_v29, %v1710_v28 }
 0x4ca   :  { %v1819_v28 = vld [vmem:[#allocation16 + $0x2210] sm:$0xff] }
 0x4cb   :  { %5034 = vmatpush1.bf16.msra.mxu0 %v5033_v60  ;;  %v6312_v60 = vsub.s32 5, %v6177_v43  ;;  %v1799_v29 = vld [vmem:[#allocation16 + $0x2170] sm:$0xff]  ;;  %v1762_v43 = vld [vmem:[#allocation16 + $0x2048] sm:$0xff] }
 0x4cc   :  { %5162 = vmatpush1.bf16.msra.mxu1 %v5161_v61  ;;  %5036 = vmatprep.subr.bf16.mxu0 %v5035_v62  ;;  %v5177_v61 = vpack.c.bf16 %v1601_v48, %v1579_v45  ;;  %v5051_v62 = vpack.c.bf16 %v1644_v52, %v1622_v49  ;;  %v1709_v45 = vld [vmem:[#allocation16 + $0x1ea0] sm:$0xff]  ;;  %v1711_v48 = vld [vmem:[#allocation16 + $0x1eb0] sm:$0xff]  ;;  %v5187_v52 = vpack.c.bf16 %v1734_v37, %v1712_v36  ;;  %v1864_v36 = vld [vmem:[#allocation16 + $0x2378] sm:$0xff] }
 0x4cd   :  { %5164 = vmatprep.subr.bf16.mxu1 %v5163_v63  ;;  %v1621_v63 = vld [vmem:[#allocation16 + $0x1be0] sm:$0xff]  ;;  %v2166_v24 = vrot.slane %v5719_v11, %v6312_v60  ;;  %v1844_v37 = vld [vmem:[#allocation16 + $0x22d8] sm:$0xff] }
 0x4ce   :  { %3242 = vmatmul.mubr.f32.vlgmr.msra.gmra.mrb[14].mxu0 %v6212_v16  ;;  %v5053_v17 = vpack.c.bf16 %v1643_v2, %v1621_v63  ;;  %v1756_v2 = vld [vmem:[#allocation16 + $0x2018] sm:$0xff] }
 0x4cf   :  { %3396 = vmatmul.mubr.f32.vlgmr.msra.gmra.mrb[24].mxu1 %v6212_v16  ;;  %3247 = vmatprep.mubr.f32.mxu0 %v6220_v25 }
 0x4d0   :  { %5038 = vmatpush1.bf16.msra.mxu0 %v5037_v12  ;;  %3401 = vmatprep.mubr.f32.mxu1 %v6220_v25  ;;  %v2162_v12 = vrot.slane %v5719_v11, %v6308_v56 }
 0x4d1   :  { %5166 = vmatpush1.bf16.msra.mxu1 %v5165_v14  ;;  %5040 = vmatprep.subr.bf16.mxu0 %v5039_v15  ;;  %v1668_v14 = vld [vmem:[#allocation16 + $0x1d58] sm:$0xff]  ;;  %v1690_v15 = vld [vmem:[#allocation16 + $0x1e08] sm:$0xff] }
 0x4d2   :  { %3248 = vmatmul.mubr.f32.gmra.mrb[16].mxu0 %v6223_v31  ;;  %5168 = vmatprep.subr.bf16.mxu1 %v5167_v20  ;;  %v5181_v20 = vpack.c.bf16 %v1645_v7, %v1623_v3  ;;  %v1778_v3 = vld [vmem:[#allocation16 + $0x20c8] sm:$0xff] }
 0x4d3   :  { %3402 = vmatmul.mubr.f32.gmra.mrb[26].mxu1 %v6223_v31  ;;  %3318 = vmatprep.mubr.f32.mxu0 %v6241_v59 }
 0x4d4   :  { %5042 = vmatpush1.bf16.msra.mxu0 %v5041_v34  ;;  %3472 = vmatprep.mubr.f32.mxu1 %v6241_v59 }
 0x4d5   :  { %5170 = vmatpush1.bf16.msra.mxu1 %v5169_v26  ;;  %5044 = vmatprep.subr.bf16.mxu0 %v5043_v27  ;;  %v5183_v26 = vpack.c.bf16 %v1690_v15, %v1668_v14  ;;  %v1689_v27 = vld [vmem:[#allocation16 + $0x1e00] sm:$0xff]  ;;  %v5189_v14 = vpack.c.bf16 %v1733_v53, %v1711_v48  ;;  %v1886_v48 = vld [vmem:[#allocation16 + $0x2428] sm:$0xff] }
 0x4d6   :  { %5172 = vmatprep.subr.bf16.mxu1 %v5171_v33  ;;  %v5185_v42 = vpack.c.bf16 %v1689_v27, %v1667_v23  ;;  %v1820_v23 = vld [vmem:[#allocation16 + $0x2218] sm:$0xff]  ;;  %v1797_v27 = vld [vmem:[#allocation16 + $0x2160] sm:$0xff]  ;;  %v1910_v53 = vld [vmem:[#allocation16 + $0x24e8] sm:$0xff] }
 0x4d8   :  { %5046 = vmatpush1.bf16.msra.mxu0 %v5045_v46 }
 0x4d9   :  { %5174 = vmatpush1.bf16.msra.mxu1 %v5173_v40  ;;  %5048 = vmatprep.subr.bf16.mxu0 %v5047_v41  ;;  %v5057_v40 = vpack.c.bf16 %v1687_v22, %v1665_v21  ;;  %v1777_v21 = vld [vmem:[#allocation16 + $0x20c0] sm:$0xff]  ;;  %v1798_v22 = vld [vmem:[#allocation16 + $0x2168] sm:$0xff] }
 0x4da   :  { %5176 = vmatprep.subr.bf16.mxu1 %v5175_v47  ;;  %v1731_v47 = vld [vmem:[#allocation16 + $0x1f50] sm:$0xff] }
 0x4db   :  { %v5061_v10 = vpack.c.bf16 %v1731_v47, %v1709_v45  ;;  %v1865_v47 = vld [vmem:[#allocation16 + $0x2380] sm:$0xff] }
 0x4dc   :  { %5050 = vmatpush1.bf16.msra.mxu0 %v5049_v57  ;;  %v1776_v57 = vld [vmem:[#allocation16 + $0x20b8] sm:$0xff] }
 0x4dd   :  { %5178 = vmatpush1.bf16.msra.mxu1 %v5177_v61  ;;  %5052 = vmatprep.subr.bf16.mxu0 %v5051_v62  ;;  %v5063_v15 = vpack.c.bf16 %v1776_v57, %v1754_v54 }
 0x4de   :  { %5180 = vmatprep.subr.bf16.mxu1 %v5179_v5  ;;  %v2704_v34 = vpop.f32.mrb[6].mxu0 }
 0x4df   :  { %v5619_v32 = vadd.f32 %v2704_v34, %v2162_v12  ;;  %v2858_v33 = vpop.f32.mrb[16].mxu1  ;;  %v2706_v35 = vpop.f32.mrb[7].mxu0 }
 0x4e0   :  { %5054 = vmatpush1.bf16.msra.mxu0 %v5053_v17  ;;  %v5623_v38 = vadd.f32 %v2858_v33, %v2170_v18  ;;  %v5620_v39 = vadd.f32 %v2706_v35, %v2166_v24  ;;  %v2860_v46 = vpop.f32.mrb[17].mxu1  ;;  %v1753_v17 = vld [vmem:[#allocation16 + $0x2000] sm:$0xff]  ;;  %v1842_v35 = vld [vmem:[#allocation16 + $0x22c8] sm:$0xff] }
 0x4e1   :  { %5182 = vmatpush1.bf16.msra.mxu1 %v5181_v20  ;;  %3951 = vst [vmem:[#allocation19 + $0x20] sm:$0xff] %v5619_v32  ;;  %v5624_v41 = vadd.f32 %v2860_v46, %v2174_v30  ;;  %5056 = vmatprep.subr.bf16.mxu0 %v5055_v19  ;;  %v1775_v20 = vld [vmem:[#allocation16 + $0x20b0] sm:$0xff]  ;;  %v1821_v33 = vld [vmem:[#allocation16 + $0x2220] sm:$0xff] }
 0x4e2   :  { %3953 = vst [vmem:[#allocation19 + $0x30] sm:$0xff] %v5623_v38  ;;  %3952 = vst [vmem:[#allocation19 + $0x28] sm:$0xff] %v5620_v39  ;;  %5184 = vmatprep.subr.bf16.mxu1 %v5183_v26  ;;  %v2710_v49 = vpop.f32.mrb[8].mxu0  ;;  %v1755_v19 = vld [vmem:[#allocation16 + $0x2010] sm:$0xff]  ;;  %v5065_v34 = vpack.c.bf16 %v1775_v20, %v1753_v17  ;;  %v5067_v26 = vpack.c.bf16 %v1820_v23, %v1798_v22  ;;  %v1866_v38 = vld [vmem:[#allocation16 + $0x2388] sm:$0xff]  ;;  %v5069_v39 = vpack.c.bf16 %v1819_v28, %v1797_v27 }
 0x4e3   :  { %3954 = vst [vmem:[#allocation19 + $0x38] sm:$0xff] %v5624_v41  ;;  %v5621_v61 = vadd.f32 %v2710_v49, %v2162_v12  ;;  %v2864_v62 = vpop.f32.mrb[18].mxu1  ;;  %v2712_v63 = vpop.f32.mrb[9].mxu0  ;;  %v5191_v12 = vpack.c.bf16 %v1778_v3, %v1756_v2  ;;  %v5197_v46 = vpack.c.bf16 %v1821_v33, %v1799_v29  ;;  %v1841_v41 = vld [vmem:[#allocation16 + $0x22c0] sm:$0xff]  ;;  %v5199_v45 = vpack.c.bf16 %v1866_v38, %v1844_v37  ;;  %v1908_v49 = vld [vmem:[#allocation16 + $0x24d8] sm:$0xff]  ;;  %v1887_v2 = vld [vmem:[#allocation16 + $0x2430] sm:$0xff] }
 0x4e4   :  { %5058 = vmatpush1.bf16.msra.mxu0 %v5057_v40  ;;  %v5625_v5 = vadd.f32 %v2864_v62, %v2170_v18  ;;  %v5622_v7 = vadd.f32 %v2712_v63, %v2166_v24  ;;  %v2866_v8 = vpop.f32.mrb[19].mxu1  ;;  %v1800_v18 = vld [vmem:[#allocation16 + $0x2178] sm:$0xff]  ;;  %v1822_v24 = vld [vmem:[#allocation16 + $0x2228] sm:$0xff]  ;;  %v5071_v40 = vpack.c.bf16 %v1864_v36, %v1842_v35  ;;  %v1885_v62 = vld [vmem:[#allocation16 + $0x2420] sm:$0xff] }
 0x4e5   :  { %5186 = vmatpush1.bf16.msra.mxu1 %v5185_v42  ;;  %3973 = vst [vmem:[#allocation19 + $0xd0] sm:$0xff] %v5621_v61  ;;  %v5626_v11 = vadd.f32 %v2866_v8, %v2174_v30  ;;  %5060 = vmatprep.subr.bf16.mxu0 %v5059_v44  ;;  %v5193_v30 = vpack.c.bf16 %v1777_v21, %v1755_v19  ;;  %v1863_v42 = vld [vmem:[#allocation16 + $0x2370] sm:$0xff]  ;;  %v1952_v8 = vld [vmem:[#allocation16 + $0x2638] sm:$0xff]  ;;  %v1929_v20 = vld [vmem:[#allocation16 + $0x2580] sm:$0xff] }
 0x4e6   :  { %3975 = vst [vmem:[#allocation19 + $0xe0] sm:$0xff] %v5625_v5  ;;  %3974 = vst [vmem:[#allocation19 + $0xd8] sm:$0xff] %v5622_v7  ;;  %5188 = vmatprep.subr.bf16.mxu1 %v5187_v52  ;;  %v5195_v32 = vpack.c.bf16 %v1822_v24, %v1800_v18  ;;  %v1843_v44 = vld [vmem:[#allocation16 + $0x22d0] sm:$0xff]  ;;  %v1888_v52 = vld [vmem:[#allocation16 + $0x2438] sm:$0xff]  ;;  %v5073_v54 = vpack.c.bf16 %v1863_v42, %v1841_v41  ;;  %v5075_v61 = vpack.c.bf16 %v1908_v49, %v1886_v48 }
 0x4e7   :  { %3976 = vst [vmem:[#allocation19 + $0xe8] sm:$0xff] %v5626_v11  ;;  %v5201_v57 = vpack.c.bf16 %v1865_v47, %v1843_v44  ;;  %v1907_v63 = vld [vmem:[#allocation16 + $0x24d0] sm:$0xff]  ;;  %v5203_v3 = vpack.c.bf16 %v1910_v53, %v1888_v52  ;;  %v1909_v5 = vld [vmem:[#allocation16 + $0x24e0] sm:$0xff]  ;;  %v1930_v7 = vld [vmem:[#allocation16 + $0x2588] sm:$0xff] }
 0x4e8   :  { %5062 = vmatpush1.bf16.msra.mxu0 %v5061_v10  ;;  %v1932_v10 = vld [vmem:[#allocation16 + $0x2598] sm:$0xff]  ;;  %v1954_v11 = vld [vmem:[#allocation16 + $0x2648] sm:$0xff]  ;;  %v5079_v17 = vpack.c.bf16 %v1952_v8, %v1930_v7  ;;  %v1951_v19 = vld [vmem:[#allocation16 + $0x2630] sm:$0xff] }
 0x4e9   :  { %5190 = vmatpush1.bf16.msra.mxu1 %v5189_v14  ;;  %5064 = vmatprep.subr.bf16.mxu0 %v5063_v15  ;;  %v5077_v14 = vpack.c.bf16 %v1907_v63, %v1885_v62  ;;  %v5205_v15 = vpack.c.bf16 %v1909_v5, %v1887_v2  ;;  %v5207_v21 = vpack.c.bf16 %v1954_v11, %v1932_v10  ;;  %v1953_v22 = vld [vmem:[#allocation16 + $0x2640] sm:$0xff]  ;;  %v1974_v23 = vld [vmem:[#allocation16 + $0x26e8] sm:$0xff]  ;;  %v1996_v18 = vld [vmem:[#allocation16 + $0x2798] sm:$0xff] }
 0x4ea   :  { %5192 = vmatprep.subr.bf16.mxu1 %v5191_v12  ;;  %v1931_v12 = vld [vmem:[#allocation16 + $0x2590] sm:$0xff]  ;;  %v1976_v24 = vld [vmem:[#allocation16 + $0x26f8] sm:$0xff]  ;;  %v5083_v27 = vpack.c.bf16 %v1996_v18, %v1974_v23  ;;  %v1973_v28 = vld [vmem:[#allocation16 + $0x26e0] sm:$0xff] }
 0x4eb   :  { %v1995_v29 = vld [vmem:[#allocation16 + $0x2790] sm:$0xff]  ;;  %v1997_v35 = vld [vmem:[#allocation16 + $0x27a0] sm:$0xff]  ;;  %v2018_v36 = vld [vmem:[#allocation16 + $0x2848] sm:$0xff] }
 0x4ec   :  { %5066 = vmatpush1.bf16.msra.mxu0 %v5065_v34  ;;  %v1998_v34 = vld [vmem:[#allocation16 + $0x27a8] sm:$0xff]  ;;  %v2040_v37 = vld [vmem:[#allocation16 + $0x28f8] sm:$0xff]  ;;  %v2017_v42 = vld [vmem:[#allocation16 + $0x2840] sm:$0xff] }
 0x4ed   :  { %5194 = vmatpush1.bf16.msra.mxu1 %v5193_v30  ;;  %5068 = vmatprep.subr.bf16.mxu0 %v5067_v26  ;;  %v5081_v30 = vpack.c.bf16 %v1951_v19, %v1929_v20  ;;  %v5209_v26 = vpack.c.bf16 %v1953_v22, %v1931_v12  ;;  %v5211_v33 = vpack.c.bf16 %v1998_v34, %v1976_v24  ;;  %v2020_v38 = vld [vmem:[#allocation16 + $0x2858] sm:$0xff]  ;;  %v2039_v44 = vld [vmem:[#allocation16 + $0x28f0] sm:$0xff]  ;;  %v2041_v48 = vld [vmem:[#allocation16 + $0x2900] sm:$0xff] }
 0x4ee   :  { %5196 = vmatprep.subr.bf16.mxu1 %v5195_v32  ;;  %v1975_v32 = vld [vmem:[#allocation16 + $0x26f0] sm:$0xff]  ;;  %v5087_v41 = vpack.c.bf16 %v2040_v37, %v2018_v36  ;;  %v2062_v49 = vld [vmem:[#allocation16 + $0x29a8] sm:$0xff]  ;;  %v2084_v52 = vld [vmem:[#allocation16 + $0x2a58] sm:$0xff] }
 0x4ef   :  { %v2064_v53 = vld [vmem:[#allocation16 + $0x29b8] sm:$0xff]  ;;  %v5091_v62 = vpack.c.bf16 %v2084_v52, %v2062_v49  ;;  %v2061_v63 = vld [vmem:[#allocation16 + $0x29a0] sm:$0xff]  ;;  %v2083_v2 = vld [vmem:[#allocation16 + $0x2a50] sm:$0xff] }
 0x4f0   :  { %5070 = vmatpush1.bf16.msra.mxu0 %v5069_v39  ;;  %v2042_v39 = vld [vmem:[#allocation16 + $0x2908] sm:$0xff]  ;;  %v2085_v7 = vld [vmem:[#allocation16 + $0x2a60] sm:$0xff]  ;;  %v2128_v10 = vld [vmem:[#allocation16 + $0x2bb8] sm:$0xff] }
 0x4f1   :  { %5198 = vmatpush1.bf16.msra.mxu1 %v5197_v46  ;;  %5072 = vmatprep.subr.bf16.mxu0 %v5071_v40  ;;  %v5085_v46 = vpack.c.bf16 %v1995_v29, %v1973_v28  ;;  %v5213_v40 = vpack.c.bf16 %v1997_v35, %v1975_v32  ;;  %v5215_v47 = vpack.c.bf16 %v2042_v39, %v2020_v38  ;;  %v2106_v8 = vld [vmem:[#allocation16 + $0x2b08] sm:$0xff]  ;;  %v2108_v11 = vld [vmem:[#allocation16 + $0x2b18] sm:$0xff]  ;;  %v2105_v19 = vld [vmem:[#allocation16 + $0x2b00] sm:$0xff] }
 0x4f2   :  { %5200 = vmatprep.subr.bf16.mxu1 %v5199_v45  ;;  %v2019_v45 = vld [vmem:[#allocation16 + $0x2850] sm:$0xff]  ;;  %v5095_v20 = vpack.c.bf16 %v2128_v10, %v2106_v8  ;;  %v2129_v23 = vld [vmem:[#allocation16 + $0x2bc0] sm:$0xff]  ;;  %v746_v18 = vld [vmem:[#allocation16 + $0x88] sm:$0xff] }
 0x4f3   :  { %v2127_v12 = vld [vmem:[#allocation16 + $0x2bb0] sm:$0xff]  ;;  %v768_v24 = vld [vmem:[#allocation16 + $0x138] sm:$0xff]  ;;  %v745_v32 = vld [vmem:[#allocation16 + $0x80] sm:$0xff] }
 0x4f4   :  { %5074 = vmatpush1.bf16.msra.mxu0 %v5073_v54  ;;  %v2086_v54 = vld [vmem:[#allocation16 + $0x2a68] sm:$0xff]  ;;  %v748_v34 = vld [vmem:[#allocation16 + $0x98] sm:$0xff]  ;;  %v5227_v28 = vpack.c.bf16 %v768_v24, %v746_v18  ;;  %v747_v35 = vld [vmem:[#allocation16 + $0x90] sm:$0xff] }
 0x4f5   :  { %5202 = vmatpush1.bf16.msra.mxu1 %v5201_v57  ;;  %5076 = vmatprep.subr.bf16.mxu0 %v5075_v61  ;;  %v5089_v57 = vpack.c.bf16 %v2039_v44, %v2017_v42  ;;  %v5217_v61 = vpack.c.bf16 %v2041_v48, %v2019_v45  ;;  %v5219_v5 = vpack.c.bf16 %v2086_v54, %v2064_v53  ;;  %v769_v36 = vld [vmem:[#allocation16 + $0x140] sm:$0xff]  ;;  %v790_v37 = vld [vmem:[#allocation16 + $0x1e8] sm:$0xff]  ;;  %v812_v38 = vld [vmem:[#allocation16 + $0x298] sm:$0xff] }
 0x4f6   :  { %5204 = vmatprep.subr.bf16.mxu1 %v5203_v3  ;;  %v2063_v3 = vld [vmem:[#allocation16 + $0x29b0] sm:$0xff]  ;;  %v792_v39 = vld [vmem:[#allocation16 + $0x1f8] sm:$0xff]  ;;  %v5231_v42 = vpack.c.bf16 %v812_v38, %v790_v37  ;;  %v789_v44 = vld [vmem:[#allocation16 + $0x1e0] sm:$0xff] }
 0x4f7   :  { %v811_v45 = vld [vmem:[#allocation16 + $0x290] sm:$0xff]  ;;  %v813_v49 = vld [vmem:[#allocation16 + $0x2a0] sm:$0xff]  ;;  %v834_v52 = vld [vmem:[#allocation16 + $0x348] sm:$0xff] }
 0x4f8   :  { %5078 = vmatpush1.bf16.msra.mxu0 %v5077_v14  ;;  %v2130_v14 = vld [vmem:[#allocation16 + $0x2bc8] sm:$0xff]  ;;  %v856_v53 = vld [vmem:[#allocation16 + $0x3f8] sm:$0xff]  ;;  %v857_v8 = vld [vmem:[#allocation16 + $0x400] sm:$0xff] }
 0x4f9   :  { %5206 = vmatpush1.bf16.msra.mxu1 %v5205_v15  ;;  %5080 = vmatprep.subr.bf16.mxu0 %v5079_v17  ;;  %v5093_v15 = vpack.c.bf16 %v2083_v2, %v2061_v63  ;;  %v5221_v17 = vpack.c.bf16 %v2085_v7, %v2063_v3  ;;  %v5223_v22 = vpack.c.bf16 %v2130_v14, %v2108_v11  ;;  %v836_v54 = vld [vmem:[#allocation16 + $0x358] sm:$0xff]  ;;  %v833_v2 = vld [vmem:[#allocation16 + $0x340] sm:$0xff]  ;;  %v855_v3 = vld [vmem:[#allocation16 + $0x3f0] sm:$0xff] }
 0x4fa   :  { %5208 = vmatprep.subr.bf16.mxu1 %v5207_v21  ;;  %v2107_v21 = vld [vmem:[#allocation16 + $0x2b10] sm:$0xff]  ;;  %v5235_v63 = vpack.c.bf16 %v856_v53, %v834_v52  ;;  %v878_v10 = vld [vmem:[#allocation16 + $0x4a8] sm:$0xff]  ;;  %v900_v11 = vld [vmem:[#allocation16 + $0x558] sm:$0xff] }
 0x4fb   :  { %v880_v14 = vld [vmem:[#allocation16 + $0x4b8] sm:$0xff]  ;;  %v901_v18 = vld [vmem:[#allocation16 + $0x560] sm:$0xff]  ;;  %v922_v24 = vld [vmem:[#allocation16 + $0x608] sm:$0xff] }
 0x4fc   :  { %5082 = vmatpush1.bf16.msra.mxu0 %v5081_v30  ;;  %v770_v30 = vld [vmem:[#allocation16 + $0x148] sm:$0xff]  ;;  %v945_v37 = vld [vmem:[#allocation16 + $0x6c0] sm:$0xff] }
 0x4fd   :  { %5210 = vmatpush1.bf16.msra.mxu1 %v5209_v26  ;;  %5084 = vmatprep.subr.bf16.mxu0 %v5083_v27  ;;  %v5097_v26 = vpack.c.bf16 %v2127_v12, %v2105_v19  ;;  %v5225_v27 = vpack.c.bf16 %v2129_v23, %v2107_v21  ;;  %v5355_v29 = vpack.c.bf16 %v770_v30, %v748_v34  ;;  %v877_v12 = vld [vmem:[#allocation16 + $0x4a0] sm:$0xff]  ;;  %v899_v21 = vld [vmem:[#allocation16 + $0x550] sm:$0xff]  ;;  %v944_v34 = vld [vmem:[#allocation16 + $0x6b8] sm:$0xff] }
 0x4fe   :  { %5212 = vmatprep.subr.bf16.mxu1 %v5211_v33  ;;  %v767_v33 = vld [vmem:[#allocation16 + $0x130] sm:$0xff]  ;;  %v5239_v19 = vpack.c.bf16 %v900_v11, %v878_v10  ;;  %v924_v30 = vld [vmem:[#allocation16 + $0x618] sm:$0xff]  ;;  %v966_v38 = vld [vmem:[#allocation16 + $0x768] sm:$0xff] }
 0x4ff   :  { %v989_v52 = vld [vmem:[#allocation16 + $0x820] sm:$0xff]  ;;  %v1010_v53 = vld [vmem:[#allocation16 + $0x8c8] sm:$0xff] }
 0x500   :  { %5086 = vmatpush1.bf16.msra.mxu0 %v5085_v46  ;;  %v814_v46 = vld [vmem:[#allocation16 + $0x2a8] sm:$0xff]  ;;  %v1033_v10 = vld [vmem:[#allocation16 + $0x980] sm:$0xff] }
 0x501   :  { %5214 = vmatpush1.bf16.msra.mxu1 %v5213_v40  ;;  %5088 = vmatprep.subr.bf16.mxu0 %v5087_v41  ;;  %v5229_v40 = vpack.c.bf16 %v767_v33, %v745_v32  ;;  %v5357_v41 = vpack.c.bf16 %v769_v36, %v747_v35  ;;  %v5359_v48 = vpack.c.bf16 %v814_v46, %v792_v39  ;;  %v921_v32 = vld [vmem:[#allocation16 + $0x600] sm:$0xff]  ;;  %v943_v33 = vld [vmem:[#allocation16 + $0x6b0] sm:$0xff]  ;;  %v988_v39 = vld [vmem:[#allocation16 + $0x818] sm:$0xff] }
 0x502   :  { %5216 = vmatprep.subr.bf16.mxu1 %v5215_v47  ;;  %v791_v47 = vld [vmem:[#allocation16 + $0x1f0] sm:$0xff]  ;;  %v968_v46 = vld [vmem:[#allocation16 + $0x778] sm:$0xff]  ;;  %v1054_v11 = vld [vmem:[#allocation16 + $0xa28] sm:$0xff] }
 0x503   :  { %v923_v35 = vld [vmem:[#allocation16 + $0x610] sm:$0xff] }
 0x504   :  { %5090 = vmatpush1.bf16.msra.mxu0 %v5089_v57  ;;  %v858_v57 = vld [vmem:[#allocation16 + $0x408] sm:$0xff] }
 0x505   :  { %5218 = vmatpush1.bf16.msra.mxu1 %v5217_v61  ;;  %5092 = vmatprep.subr.bf16.mxu0 %v5091_v62  ;;  %v5233_v61 = vpack.c.bf16 %v811_v45, %v789_v44  ;;  %v5361_v62 = vpack.c.bf16 %v813_v49, %v791_v47  ;;  %v5363_v7 = vpack.c.bf16 %v858_v57, %v836_v54  ;;  %v965_v45 = vld [vmem:[#allocation16 + $0x760] sm:$0xff]  ;;  %v987_v47 = vld [vmem:[#allocation16 + $0x810] sm:$0xff]  ;;  %v1032_v54 = vld [vmem:[#allocation16 + $0x978] sm:$0xff] }
 0x506   :  { %5220 = vmatprep.subr.bf16.mxu1 %v5219_v5  ;;  %v835_v5 = vld [vmem:[#allocation16 + $0x350] sm:$0xff]  ;;  %v5247_v44 = vpack.c.bf16 %v988_v39, %v966_v38  ;;  %v1012_v57 = vld [vmem:[#allocation16 + $0x8d8] sm:$0xff]  ;;  %v1121_v38 = vld [vmem:[#allocation16 + $0xc40] sm:$0xff] }
 0x507   :  { %v1142_v39 = vld [vmem:[#allocation16 + $0xce8] sm:$0xff] }
 0x508   :  { %5094 = vmatpush1.bf16.msra.mxu0 %v5093_v15  ;;  %v902_v15 = vld [vmem:[#allocation16 + $0x568] sm:$0xff] }
 0x509   :  { %5222 = vmatpush1.bf16.msra.mxu1 %v5221_v17  ;;  %5096 = vmatprep.subr.bf16.mxu0 %v5095_v20  ;;  %v5237_v17 = vpack.c.bf16 %v855_v3, %v833_v2  ;;  %v5365_v20 = vpack.c.bf16 %v857_v8, %v835_v5  ;;  %v5367_v23 = vpack.c.bf16 %v902_v15, %v880_v14  ;;  %v1009_v3 = vld [vmem:[#allocation16 + $0x8c0] sm:$0xff]  ;;  %v1031_v5 = vld [vmem:[#allocation16 + $0x970] sm:$0xff]  ;;  %v1076_v14 = vld [vmem:[#allocation16 + $0xad8] sm:$0xff] }
 0x50a   :  { %5224 = vmatprep.subr.bf16.mxu1 %v5223_v22  ;;  %v879_v22 = vld [vmem:[#allocation16 + $0x4b0] sm:$0xff]  ;;  %v5251_v2 = vpack.c.bf16 %v1032_v54, %v1010_v53  ;;  %v1056_v15 = vld [vmem:[#allocation16 + $0xa38] sm:$0xff]  ;;  %v1165_v53 = vld [vmem:[#allocation16 + $0xda0] sm:$0xff] }
 0x50b   :  { %v1186_v54 = vld [vmem:[#allocation16 + $0xe48] sm:$0xff] }
 0x50c   :  { %5098 = vmatpush1.bf16.msra.mxu0 %v5097_v26  ;;  %v946_v26 = vld [vmem:[#allocation16 + $0x6c8] sm:$0xff] }
 0x50d   :  { %5226 = vmatpush1.bf16.msra.mxu1 %v5225_v27  ;;  %5228 = vmatprep.subr.bf16.mxu0 %v5227_v28  ;;  %v5241_v27 = vpack.c.bf16 %v899_v21, %v877_v12  ;;  %v5369_v28 = vpack.c.bf16 %v901_v18, %v879_v22  ;;  %v5371_v36 = vpack.c.bf16 %v946_v26, %v924_v30  ;;  %v1053_v21 = vld [vmem:[#allocation16 + $0xa20] sm:$0xff]  ;;  %v1075_v22 = vld [vmem:[#allocation16 + $0xad0] sm:$0xff]  ;;  %v1120_v30 = vld [vmem:[#allocation16 + $0xc38] sm:$0xff] }
 0x50e   :  { %5356 = vmatprep.subr.bf16.mxu1 %v5355_v29  ;;  %v5243_v29 = vpack.c.bf16 %v944_v34, %v922_v24  ;;  %v5255_v12 = vpack.c.bf16 %v1076_v14, %v1054_v11  ;;  %v1077_v24 = vld [vmem:[#allocation16 + $0xae0] sm:$0xff]  ;;  %v1098_v34 = vld [vmem:[#allocation16 + $0xb88] sm:$0xff]  ;;  %v1100_v26 = vld [vmem:[#allocation16 + $0xb98] sm:$0xff] }
 0x50f   :  { %3319 = vmatmul.mubr.f32.vlgmr.msra.gmra.mrb[14].mxu0 %v6244_v0  ;;  %v1209_v11 = vld [vmem:[#allocation16 + $0xf00] sm:$0xff]  ;;  %v1230_v14 = vld [vmem:[#allocation16 + $0xfa8] sm:$0xff] }
 0x510   :  { %3473 = vmatmul.mubr.f32.vlgmr.msra.gmra.mrb[24].mxu1 %v6244_v0  ;;  %3324 = vmatprep.mubr.f32.mxu0 %v6252_v13 }
 0x511   :  { %3478 = vmatprep.mubr.f32.mxu1 %v6252_v13  ;;  %5230 = vmatpush1.bf16.msra.mxu0 %v5229_v40  ;;  %v990_v40 = vld [vmem:[#allocation16 + $0x828] sm:$0xff] }
 0x512   :  { %5358 = vmatpush1.bf16.msra.mxu1 %v5357_v41  ;;  %5232 = vmatprep.subr.bf16.mxu0 %v5231_v42  ;;  %v5245_v41 = vpack.c.bf16 %v943_v33, %v921_v32  ;;  %v5373_v42 = vpack.c.bf16 %v945_v37, %v923_v35  ;;  %v5375_v49 = vpack.c.bf16 %v990_v40, %v968_v46  ;;  %v1097_v33 = vld [vmem:[#allocation16 + $0xb80] sm:$0xff]  ;;  %v1119_v35 = vld [vmem:[#allocation16 + $0xc30] sm:$0xff]  ;;  %v1164_v46 = vld [vmem:[#allocation16 + $0xd98] sm:$0xff] }
 0x513   :  { %3325 = vmatmul.mubr.f32.gmra.mrb[16].mxu0 %v6255_v51  ;;  %5360 = vmatprep.subr.bf16.mxu1 %v5359_v48  ;;  %v967_v48 = vld [vmem:[#allocation16 + $0x770] sm:$0xff]  ;;  %v5259_v32 = vpack.c.bf16 %v1120_v30, %v1098_v34  ;;  %v1144_v40 = vld [vmem:[#allocation16 + $0xcf8] sm:$0xff]  ;;  %v1253_v34 = vld [vmem:[#allocation16 + $0x1060] sm:$0xff] }
 0x514   :  { %3479 = vmatmul.mubr.f32.gmra.mrb[26].mxu1 %v6255_v51  ;;  %3549 = vmatprep.mubr.f32.mxu0 %v6209_v9  ;;  %v1274_v30 = vld [vmem:[#allocation16 + $0x1108] sm:$0xff] }
 0x515   :  { %5234 = vmatpush1.bf16.msra.mxu0 %v5233_v61  ;;  %3703 = vmatprep.mubr.f32.mxu1 %v6209_v9  ;;  %v1034_v61 = vld [vmem:[#allocation16 + $0x988] sm:$0xff] }
 0x516   :  { %5362 = vmatpush1.bf16.msra.mxu1 %v5361_v62  ;;  %5236 = vmatprep.subr.bf16.mxu0 %v5235_v63  ;;  %v5249_v62 = vpack.c.bf16 %v987_v47, %v965_v45  ;;  %v5377_v63 = vpack.c.bf16 %v989_v52, %v967_v48  ;;  %v5379_v8 = vpack.c.bf16 %v1034_v61, %v1012_v57  ;;  %v1141_v47 = vld [vmem:[#allocation16 + $0xce0] sm:$0xff]  ;;  %v1163_v48 = vld [vmem:[#allocation16 + $0xd90] sm:$0xff]  ;;  %v1208_v57 = vld [vmem:[#allocation16 + $0xef8] sm:$0xff] }
 0x517   :  { %5364 = vmatprep.subr.bf16.mxu1 %v5363_v7  ;;  %v1011_v7 = vld [vmem:[#allocation16 + $0x8d0] sm:$0xff]  ;;  %v5263_v45 = vpack.c.bf16 %v1164_v46, %v1142_v39  ;;  %v1188_v61 = vld [vmem:[#allocation16 + $0xe58] sm:$0xff]  ;;  %v1297_v39 = vld [vmem:[#allocation16 + $0x11c0] sm:$0xff] }
 0x518   :  { %v1318_v46 = vld [vmem:[#allocation16 + $0x1268] sm:$0xff] }
 0x519   :  { %5238 = vmatpush1.bf16.msra.mxu0 %v5237_v17  ;;  %v1078_v17 = vld [vmem:[#allocation16 + $0xae8] sm:$0xff] }
 0x51a   :  { %5366 = vmatpush1.bf16.msra.mxu1 %v5365_v20  ;;  %5240 = vmatprep.subr.bf16.mxu0 %v5239_v19  ;;  %v5253_v20 = vpack.c.bf16 %v1031_v5, %v1009_v3  ;;  %v5381_v19 = vpack.c.bf16 %v1033_v10, %v1011_v7  ;;  %v5383_v18 = vpack.c.bf16 %v1078_v17, %v1056_v15  ;;  %v1185_v5 = vld [vmem:[#allocation16 + $0xe40] sm:$0xff]  ;;  %v1207_v7 = vld [vmem:[#allocation16 + $0xef0] sm:$0xff]  ;;  %v1252_v15 = vld [vmem:[#allocation16 + $0x1058] sm:$0xff] }
 0x51b   :  { %5368 = vmatprep.subr.bf16.mxu1 %v5367_v23  ;;  %v1055_v23 = vld [vmem:[#allocation16 + $0xa30] sm:$0xff]  ;;  %v5267_v3 = vpack.c.bf16 %v1208_v57, %v1186_v54  ;;  %v1232_v17 = vld [vmem:[#allocation16 + $0xfb8] sm:$0xff]  ;;  %v1341_v54 = vld [vmem:[#allocation16 + $0x1320] sm:$0xff] }
 0x51c   :  { %v1362_v57 = vld [vmem:[#allocation16 + $0x13c8] sm:$0xff] }
 0x51d   :  { %5242 = vmatpush1.bf16.msra.mxu0 %v5241_v27  ;;  %v1122_v27 = vld [vmem:[#allocation16 + $0xc48] sm:$0xff] }
 0x51e   :  { %5370 = vmatpush1.bf16.msra.mxu1 %v5369_v28  ;;  %5244 = vmatprep.subr.bf16.mxu0 %v5243_v29  ;;  %v5257_v28 = vpack.c.bf16 %v1075_v22, %v1053_v21  ;;  %v5385_v29 = vpack.c.bf16 %v1077_v24, %v1055_v23  ;;  %v5387_v37 = vpack.c.bf16 %v1122_v27, %v1100_v26  ;;  %v1229_v22 = vld [vmem:[#allocation16 + $0xfa0] sm:$0xff]  ;;  %v1251_v23 = vld [vmem:[#allocation16 + $0x1050] sm:$0xff]  ;;  %v1296_v26 = vld [vmem:[#allocation16 + $0x11b8] sm:$0xff] }
 0x51f   :  { %5372 = vmatprep.subr.bf16.mxu1 %v5371_v36  ;;  %v1099_v36 = vld [vmem:[#allocation16 + $0xb90] sm:$0xff]  ;;  %v5271_v21 = vpack.c.bf16 %v1252_v15, %v1230_v14  ;;  %v1276_v27 = vld [vmem:[#allocation16 + $0x1118] sm:$0xff]  ;;  %v1385_v14 = vld [vmem:[#allocation16 + $0x1480] sm:$0xff] }
 0x520   :  { %v1406_v15 = vld [vmem:[#allocation16 + $0x1528] sm:$0xff] }
 0x521   :  { %5246 = vmatpush1.bf16.msra.mxu0 %v5245_v41  ;;  %v1166_v41 = vld [vmem:[#allocation16 + $0xda8] sm:$0xff] }
 0x522   :  { %5374 = vmatpush1.bf16.msra.mxu1 %v5373_v42  ;;  %5248 = vmatprep.subr.bf16.mxu0 %v5247_v44  ;;  %v5261_v42 = vpack.c.bf16 %v1119_v35, %v1097_v33  ;;  %v5389_v44 = vpack.c.bf16 %v1121_v38, %v1099_v36  ;;  %v5391_v52 = vpack.c.bf16 %v1166_v41, %v1144_v40  ;;  %v1273_v35 = vld [vmem:[#allocation16 + $0x1100] sm:$0xff]  ;;  %v1295_v36 = vld [vmem:[#allocation16 + $0x11b0] sm:$0xff]  ;;  %v1340_v40 = vld [vmem:[#allocation16 + $0x1318] sm:$0xff] }
 0x523   :  { %5376 = vmatprep.subr.bf16.mxu1 %v5375_v49  ;;  %v1143_v49 = vld [vmem:[#allocation16 + $0xcf0] sm:$0xff]  ;;  %v5275_v33 = vpack.c.bf16 %v1296_v26, %v1274_v30  ;;  %v1320_v41 = vld [vmem:[#allocation16 + $0x1278] sm:$0xff]  ;;  %v1429_v30 = vld [vmem:[#allocation16 + $0x15e0] sm:$0xff] }
 0x524   :  { %v1450_v26 = vld [vmem:[#allocation16 + $0x1688] sm:$0xff] }
 0x525   :  { %5250 = vmatpush1.bf16.msra.mxu0 %v5249_v62  ;;  %v1210_v62 = vld [vmem:[#allocation16 + $0xf08] sm:$0xff] }
 0x526   :  { %5378 = vmatpush1.bf16.msra.mxu1 %v5377_v63  ;;  %5252 = vmatprep.subr.bf16.mxu0 %v5251_v2  ;;  %v5265_v63 = vpack.c.bf16 %v1163_v48, %v1141_v47  ;;  %v5393_v2 = vpack.c.bf16 %v1165_v53, %v1143_v49  ;;  %v5395_v10 = vpack.c.bf16 %v1210_v62, %v1188_v61  ;;  %v1317_v48 = vld [vmem:[#allocation16 + $0x1260] sm:$0xff]  ;;  %v1339_v49 = vld [vmem:[#allocation16 + $0x1310] sm:$0xff]  ;;  %v1384_v61 = vld [vmem:[#allocation16 + $0x1478] sm:$0xff] }
 0x527   :  { %5380 = vmatprep.subr.bf16.mxu1 %v5379_v8  ;;  %v1187_v8 = vld [vmem:[#allocation16 + $0xe50] sm:$0xff]  ;;  %v5279_v47 = vpack.c.bf16 %v1340_v40, %v1318_v46  ;;  %v1364_v62 = vld [vmem:[#allocation16 + $0x13d8] sm:$0xff]  ;;  %v1473_v46 = vld [vmem:[#allocation16 + $0x1740] sm:$0xff] }
 0x528   :  { %v1494_v40 = vld [vmem:[#allocation16 + $0x17e8] sm:$0xff] }
 0x529   :  { %5254 = vmatpush1.bf16.msra.mxu0 %v5253_v20  ;;  %v1254_v20 = vld [vmem:[#allocation16 + $0x1068] sm:$0xff] }
 0x52a   :  { %5382 = vmatpush1.bf16.msra.mxu1 %v5381_v19  ;;  %5256 = vmatprep.subr.bf16.mxu0 %v5255_v12  ;;  %v5269_v19 = vpack.c.bf16 %v1207_v7, %v1185_v5  ;;  %v5397_v12 = vpack.c.bf16 %v1209_v11, %v1187_v8  ;;  %v5399_v24 = vpack.c.bf16 %v1254_v20, %v1232_v17  ;;  %v1361_v7 = vld [vmem:[#allocation16 + $0x13c0] sm:$0xff]  ;;  %v1383_v8 = vld [vmem:[#allocation16 + $0x1470] sm:$0xff]  ;;  %v1428_v17 = vld [vmem:[#allocation16 + $0x15d8] sm:$0xff] }
 0x52b   :  { %5384 = vmatprep.subr.bf16.mxu1 %v5383_v18  ;;  %v1231_v18 = vld [vmem:[#allocation16 + $0xfb0] sm:$0xff]  ;;  %v5283_v5 = vpack.c.bf16 %v1384_v61, %v1362_v57  ;;  %v1408_v20 = vld [vmem:[#allocation16 + $0x1538] sm:$0xff]  ;;  %v1517_v57 = vld [vmem:[#allocation16 + $0x18a0] sm:$0xff] }
 0x52c   :  { %v1538_v61 = vld [vmem:[#allocation16 + $0x1948] sm:$0xff] }
 0x52d   :  { %5258 = vmatpush1.bf16.msra.mxu0 %v5257_v28  ;;  %v1298_v28 = vld [vmem:[#allocation16 + $0x11c8] sm:$0xff] }
 0x52e   :  { %5386 = vmatpush1.bf16.msra.mxu1 %v5385_v29  ;;  %5260 = vmatprep.subr.bf16.mxu0 %v5259_v32  ;;  %v5273_v29 = vpack.c.bf16 %v1251_v23, %v1229_v22  ;;  %v5401_v32 = vpack.c.bf16 %v1253_v34, %v1231_v18  ;;  %v5403_v38 = vpack.c.bf16 %v1298_v28, %v1276_v27  ;;  %v1405_v23 = vld [vmem:[#allocation16 + $0x1520] sm:$0xff]  ;;  %v1427_v18 = vld [vmem:[#allocation16 + $0x15d0] sm:$0xff]  ;;  %v1472_v27 = vld [vmem:[#allocation16 + $0x1738] sm:$0xff] }
 0x52f   :  { %5388 = vmatprep.subr.bf16.mxu1 %v5387_v37  ;;  %v1275_v37 = vld [vmem:[#allocation16 + $0x1110] sm:$0xff]  ;;  %v5287_v22 = vpack.c.bf16 %v1428_v17, %v1406_v15  ;;  %v1452_v28 = vld [vmem:[#allocation16 + $0x1698] sm:$0xff]  ;;  %v1561_v15 = vld [vmem:[#allocation16 + $0x1a00] sm:$0xff] }
 0x530   :  { %v1582_v17 = vld [vmem:[#allocation16 + $0x1aa8] sm:$0xff] }
 0x531   :  { %5262 = vmatpush1.bf16.msra.mxu0 %v5261_v42  ;;  %v1342_v42 = vld [vmem:[#allocation16 + $0x1328] sm:$0xff] }
 0x532   :  { %5390 = vmatpush1.bf16.msra.mxu1 %v5389_v44  ;;  %5264 = vmatprep.subr.bf16.mxu0 %v5263_v45  ;;  %v5277_v44 = vpack.c.bf16 %v1295_v36, %v1273_v35  ;;  %v5405_v45 = vpack.c.bf16 %v1297_v39, %v1275_v37  ;;  %v5407_v53 = vpack.c.bf16 %v1342_v42, %v1320_v41  ;;  %v1449_v37 = vld [vmem:[#allocation16 + $0x1680] sm:$0xff]  ;;  %v1451_v39 = vld [vmem:[#allocation16 + $0x1690] sm:$0xff]  ;;  %v1516_v41 = vld [vmem:[#allocation16 + $0x1898] sm:$0xff] }
 0x533   :  { %5392 = vmatprep.subr.bf16.mxu1 %v5391_v52  ;;  %v1319_v52 = vld [vmem:[#allocation16 + $0x1270] sm:$0xff]  ;;  %v5291_v35 = vpack.c.bf16 %v1472_v27, %v1450_v26  ;;  %v1496_v42 = vld [vmem:[#allocation16 + $0x17f8] sm:$0xff]  ;;  %v1605_v26 = vld [vmem:[#allocation16 + $0x1b60] sm:$0xff] }
 0x534   :  { %v1626_v27 = vld [vmem:[#allocation16 + $0x1c08] sm:$0xff] }
 0x535   :  { %5266 = vmatpush1.bf16.msra.mxu0 %v5265_v63  ;;  %v1386_v63 = vld [vmem:[#allocation16 + $0x1488] sm:$0xff] }
 0x536   :  { %5394 = vmatpush1.bf16.msra.mxu1 %v5393_v2  ;;  %5268 = vmatprep.subr.bf16.mxu0 %v5267_v3  ;;  %v5281_v2 = vpack.c.bf16 %v1339_v49, %v1317_v48  ;;  %v5409_v3 = vpack.c.bf16 %v1341_v54, %v1319_v52  ;;  %v5411_v11 = vpack.c.bf16 %v1386_v63, %v1364_v62  ;;  %v1493_v49 = vld [vmem:[#allocation16 + $0x17e0] sm:$0xff]  ;;  %v1515_v52 = vld [vmem:[#allocation16 + $0x1890] sm:$0xff]  ;;  %v1560_v62 = vld [vmem:[#allocation16 + $0x19f8] sm:$0xff] }
 0x537   :  { %5396 = vmatprep.subr.bf16.mxu1 %v5395_v10  ;;  %v1363_v10 = vld [vmem:[#allocation16 + $0x13d0] sm:$0xff]  ;;  %v5295_v48 = vpack.c.bf16 %v1516_v41, %v1494_v40  ;;  %v1540_v63 = vld [vmem:[#allocation16 + $0x1958] sm:$0xff]  ;;  %v1649_v41 = vld [vmem:[#allocation16 + $0x1cc0] sm:$0xff] }
 0x539   :  { %5270 = vmatpush1.bf16.msra.mxu0 %v5269_v19  ;;  %v1430_v19 = vld [vmem:[#allocation16 + $0x15e8] sm:$0xff] }
 0x53a   :  { %5398 = vmatpush1.bf16.msra.mxu1 %v5397_v12  ;;  %5272 = vmatprep.subr.bf16.mxu0 %v5271_v21  ;;  %v5285_v12 = vpack.c.bf16 %v1383_v8, %v1361_v7  ;;  %v5413_v21 = vpack.c.bf16 %v1385_v14, %v1363_v10  ;;  %v5415_v34 = vpack.c.bf16 %v1430_v19, %v1408_v20  ;;  %v1537_v8 = vld [vmem:[#allocation16 + $0x1940] sm:$0xff]  ;;  %v1559_v10 = vld [vmem:[#allocation16 + $0x19f0] sm:$0xff]  ;;  %v1604_v20 = vld [vmem:[#allocation16 + $0x1b58] sm:$0xff] }
 0x53b   :  { %5400 = vmatprep.subr.bf16.mxu1 %v5399_v24  ;;  %v1407_v24 = vld [vmem:[#allocation16 + $0x1530] sm:$0xff]  ;;  %v5299_v7 = vpack.c.bf16 %v1560_v62, %v1538_v61  ;;  %v1584_v19 = vld [vmem:[#allocation16 + $0x1ab8] sm:$0xff]  ;;  %v1669_v62 = vld [vmem:[#allocation16 + $0x1d60] sm:$0xff] }
 0x53d   :  { %5274 = vmatpush1.bf16.msra.mxu0 %v5273_v29  ;;  %v1474_v29 = vld [vmem:[#allocation16 + $0x1748] sm:$0xff] }
 0x53e   :  { %5402 = vmatpush1.bf16.msra.mxu1 %v5401_v32  ;;  %5276 = vmatprep.subr.bf16.mxu0 %v5275_v33  ;;  %v5289_v32 = vpack.c.bf16 %v1427_v18, %v1405_v23  ;;  %v5417_v33 = vpack.c.bf16 %v1429_v30, %v1407_v24  ;;  %v5419_v36 = vpack.c.bf16 %v1474_v29, %v1452_v28  ;;  %v1581_v18 = vld [vmem:[#allocation16 + $0x1aa0] sm:$0xff]  ;;  %v1603_v24 = vld [vmem:[#allocation16 + $0x1b50] sm:$0xff]  ;;  %v1648_v28 = vld [vmem:[#allocation16 + $0x1cb8] sm:$0xff] }
 0x53f   :  { %5404 = vmatprep.subr.bf16.mxu1 %v5403_v38  ;;  %v1471_v38 = vld [vmem:[#allocation16 + $0x1730] sm:$0xff]  ;;  %v5303_v23 = vpack.c.bf16 %v1604_v20, %v1582_v17  ;;  %v1628_v29 = vld [vmem:[#allocation16 + $0x1c18] sm:$0xff]  ;;  %v1738_v20 = vld [vmem:[#allocation16 + $0x1f88] sm:$0xff] }
 0x540   :  { %v1716_v17 = vld [vmem:[#allocation16 + $0x1ed8] sm:$0xff] }
 0x541   :  { %5278 = vmatpush1.bf16.msra.mxu0 %v5277_v44  ;;  %v1518_v44 = vld [vmem:[#allocation16 + $0x18a8] sm:$0xff] }
 0x542   :  { %5406 = vmatpush1.bf16.msra.mxu1 %v5405_v45  ;;  %5280 = vmatprep.subr.bf16.mxu0 %v5279_v47  ;;  %v5293_v45 = vpack.c.bf16 %v1471_v38, %v1449_v37  ;;  %v5421_v47 = vpack.c.bf16 %v1473_v46, %v1451_v39  ;;  %v5423_v54 = vpack.c.bf16 %v1518_v44, %v1496_v42  ;;  %v1625_v38 = vld [vmem:[#allocation16 + $0x1c00] sm:$0xff]  ;;  %v1647_v39 = vld [vmem:[#allocation16 + $0x1cb0] sm:$0xff]  ;;  %v1670_v42 = vld [vmem:[#allocation16 + $0x1d68] sm:$0xff] }
 0x543   :  { %5408 = vmatprep.subr.bf16.mxu1 %v5407_v53  ;;  %v1495_v53 = vld [vmem:[#allocation16 + $0x17f0] sm:$0xff]  ;;  %v5307_v37 = vpack.c.bf16 %v1648_v28, %v1626_v27  ;;  %v1692_v44 = vld [vmem:[#allocation16 + $0x1e18] sm:$0xff]  ;;  %v5443_v28 = vpack.c.bf16 %v1738_v20, %v1716_v17  ;;  %v1846_v17 = vld [vmem:[#allocation16 + $0x22e8] sm:$0xff] }
 0x544   :  { %v1627_v46 = vld [vmem:[#allocation16 + $0x1c10] sm:$0xff]  ;;  %v5311_v61 = vpack.c.bf16 %v1692_v44, %v1670_v42  ;;  %v1868_v20 = vld [vmem:[#allocation16 + $0x2398] sm:$0xff] }
 0x545   :  { %5282 = vmatpush1.bf16.msra.mxu0 %v5281_v2  ;;  %v1562_v2 = vld [vmem:[#allocation16 + $0x1a08] sm:$0xff] }
 0x546   :  { %5410 = vmatpush1.bf16.msra.mxu1 %v5409_v3  ;;  %5284 = vmatprep.subr.bf16.mxu0 %v5283_v5  ;;  %v5297_v3 = vpack.c.bf16 %v1515_v52, %v1493_v49  ;;  %v5425_v5 = vpack.c.bf16 %v1517_v57, %v1495_v53  ;;  %v5427_v14 = vpack.c.bf16 %v1562_v2, %v1540_v63  ;;  %v1691_v63 = vld [vmem:[#allocation16 + $0x1e10] sm:$0xff] }
 0x547   :  { %5412 = vmatprep.subr.bf16.mxu1 %v5411_v11  ;;  %v1539_v11 = vld [vmem:[#allocation16 + $0x1950] sm:$0xff]  ;;  %v5309_v49 = vpack.c.bf16 %v1647_v39, %v1625_v38  ;;  %v1760_v39 = vld [vmem:[#allocation16 + $0x2038] sm:$0xff] }
 0x548   :  { %v1671_v2 = vld [vmem:[#allocation16 + $0x1d70] sm:$0xff] }
 0x549   :  { %5286 = vmatpush1.bf16.msra.mxu0 %v5285_v12  ;;  %v1606_v12 = vld [vmem:[#allocation16 + $0x1b68] sm:$0xff] }
 0x54a   :  { %5414 = vmatpush1.bf16.msra.mxu1 %v5413_v21  ;;  %5288 = vmatprep.subr.bf16.mxu0 %v5287_v22  ;;  %v5301_v21 = vpack.c.bf16 %v1559_v10, %v1537_v8  ;;  %v5429_v22 = vpack.c.bf16 %v1561_v15, %v1539_v11  ;;  %v5431_v30 = vpack.c.bf16 %v1606_v12, %v1584_v19  ;;  %v1714_v8 = vld [vmem:[#allocation16 + $0x1ec8] sm:$0xff]  ;;  %v1736_v10 = vld [vmem:[#allocation16 + $0x1f78] sm:$0xff] }
 0x54b   :  { %5416 = vmatprep.subr.bf16.mxu1 %v5415_v34  ;;  %v1583_v34 = vld [vmem:[#allocation16 + $0x1ab0] sm:$0xff] }
 0x54d   :  { %5290 = vmatpush1.bf16.msra.mxu0 %v5289_v32  ;;  %v1650_v32 = vld [vmem:[#allocation16 + $0x1cc8] sm:$0xff] }
 0x54e   :  { %5418 = vmatpush1.bf16.msra.mxu1 %v5417_v33  ;;  %5292 = vmatprep.subr.bf16.mxu0 %v5291_v35  ;;  %v5305_v33 = vpack.c.bf16 %v1603_v24, %v1581_v18  ;;  %v6337_v35 = vld [vmem:[#allocation18 + $0x8] sm:$0xff]  ;;  %v5435_v40 = vpack.c.bf16 %v1650_v32, %v1628_v29  ;;  %v5315_v24 = vpack.c.bf16 %v1736_v10, %v1714_v8  ;;  %v1737_v29 = vld [vmem:[#allocation16 + $0x1f80] sm:$0xff]  ;;  %v1823_v10 = vld [vmem:[#allocation16 + $0x2230] sm:$0xff] }
 0x54f   :  { %5420 = vmatprep.subr.bf16.mxu1 %v5419_v36  ;;  %v5433_v36 = vpack.c.bf16 %v1605_v26, %v1583_v34  ;;  %v2186_v52 = vrot.slane %v6337_v35, %v6230_v1  ;;  %v2182_v53 = vrot.slane %v6337_v35, %v6183_v55  ;;  %v2190_v57 = vrot.slane %v6337_v35, %v6233_v6  ;;  %v1713_v34 = vld [vmem:[#allocation16 + $0x1ec0] sm:$0xff]  ;;  %v1715_v26 = vld [vmem:[#allocation16 + $0x1ed0] sm:$0xff]  ;;  %v1758_v32 = vld [vmem:[#allocation16 + $0x2028] sm:$0xff] }
 0x550   :  { %3550 = vmatmul.mubr.f32.vlgmr.msra.gmra.mrb[18].mxu0 %v6212_v16  ;;  %v1801_v8 = vld [vmem:[#allocation16 + $0x2180] sm:$0xff] }
 0x551   :  { %3704 = vmatmul.mubr.f32.vlgmr.msra.gmra.mrb[28].mxu1 %v6212_v16  ;;  %3555 = vmatprep.mubr.f32.mxu0 %v6220_v25 }
 0x552   :  { %5294 = vmatpush1.bf16.msra.mxu0 %v5293_v45  ;;  %3709 = vmatprep.mubr.f32.mxu1 %v6220_v25  ;;  %v2178_v45 = vrot.slane %v6337_v35, %v6180_v50 }
 0x553   :  { %5422 = vmatpush1.bf16.msra.mxu1 %v5421_v47  ;;  %5296 = vmatprep.subr.bf16.mxu0 %v5295_v48  ;;  %v1672_v47 = vld [vmem:[#allocation16 + $0x1d78] sm:$0xff]  ;;  %v1694_v48 = vld [vmem:[#allocation16 + $0x1e28] sm:$0xff] }
 0x554   :  { %3556 = vmatmul.mubr.f32.gmra.mrb[20].mxu0 %v6223_v31  ;;  %5424 = vmatprep.subr.bf16.mxu1 %v5423_v54  ;;  %v5437_v54 = vpack.c.bf16 %v1649_v41, %v1627_v46  ;;  %v1782_v46 = vld [vmem:[#allocation16 + $0x20e8] sm:$0xff] }
 0x555   :  { %3710 = vmatmul.mubr.f32.gmra.mrb[30].mxu1 %v6223_v31  ;;  %3626 = vmatprep.mubr.f32.mxu0 %v6241_v59 }
 0x556   :  { %5298 = vmatpush1.bf16.msra.mxu0 %v5297_v3  ;;  %3780 = vmatprep.mubr.f32.mxu1 %v6241_v59 }
 0x557   :  { %5426 = vmatpush1.bf16.msra.mxu1 %v5425_v5  ;;  %5300 = vmatprep.subr.bf16.mxu0 %v5299_v7  ;;  %v5439_v5 = vpack.c.bf16 %v1694_v48, %v1672_v47  ;;  %v1693_v7 = vld [vmem:[#allocation16 + $0x1e20] sm:$0xff]  ;;  %v5445_v48 = vpack.c.bf16 %v1737_v29, %v1715_v26  ;;  %v1892_v29 = vld [vmem:[#allocation16 + $0x2458] sm:$0xff] }
 0x558   :  { %5428 = vmatprep.subr.bf16.mxu1 %v5427_v14  ;;  %v5441_v18 = vpack.c.bf16 %v1693_v7, %v1671_v2  ;;  %v1802_v2 = vld [vmem:[#allocation16 + $0x2188] sm:$0xff]  ;;  %v1869_v26 = vld [vmem:[#allocation16 + $0x23a0] sm:$0xff] }
 0x55a   :  { %5302 = vmatpush1.bf16.msra.mxu0 %v5301_v21 }
 0x55b   :  { %5430 = vmatpush1.bf16.msra.mxu1 %v5429_v22  ;;  %5304 = vmatprep.subr.bf16.mxu0 %v5303_v23  ;;  %v5313_v22 = vpack.c.bf16 %v1691_v63, %v1669_v62  ;;  %v1759_v62 = vld [vmem:[#allocation16 + $0x2030] sm:$0xff]  ;;  %v1781_v63 = vld [vmem:[#allocation16 + $0x20e0] sm:$0xff] }
 0x55c   :  { %5432 = vmatprep.subr.bf16.mxu1 %v5431_v30  ;;  %v1735_v30 = vld [vmem:[#allocation16 + $0x1f70] sm:$0xff] }
 0x55d   :  { %v5317_v44 = vpack.c.bf16 %v1735_v30, %v1713_v34  ;;  %v1847_v34 = vld [vmem:[#allocation16 + $0x22f0] sm:$0xff] }
 0x55e   :  { %5306 = vmatpush1.bf16.msra.mxu0 %v5305_v33  ;;  %v1780_v33 = vld [vmem:[#allocation16 + $0x20d8] sm:$0xff] }
 0x55f   :  { %5434 = vmatpush1.bf16.msra.mxu1 %v5433_v36  ;;  %5308 = vmatprep.subr.bf16.mxu0 %v5307_v37 }
 0x560   :  { %5436 = vmatprep.subr.bf16.mxu1 %v5435_v40  ;;  %v3012_v3 = vpop.f32.mrb[10].mxu0 }
 0x561   :  { %v5627_v11 = vadd.f32 %v3012_v3, %v2178_v45  ;;  %v3166_v14 = vpop.f32.mrb[20].mxu1  ;;  %v3014_v15 = vpop.f32.mrb[11].mxu0  ;;  %v1824_v3 = vld [vmem:[#allocation16 + $0x2238] sm:$0xff] }
 0x562   :  { %5310 = vmatpush1.bf16.msra.mxu0 %v5309_v49  ;;  %v5631_v19 = vadd.f32 %v3166_v14, %v2186_v52  ;;  %v5628_v12 = vadd.f32 %v3014_v15, %v2182_v53  ;;  %v3168_v21 = vpop.f32.mrb[21].mxu1  ;;  %v5319_v49 = vpack.c.bf16 %v1780_v33, %v1758_v32  ;;  %v5323_v7 = vpack.c.bf16 %v1824_v3, %v1802_v2  ;;  %v1825_v15 = vld [vmem:[#allocation16 + $0x2240] sm:$0xff]  ;;  %v1914_v32 = vld [vmem:[#allocation16 + $0x2508] sm:$0xff] }
 0x563   :  { %5438 = vmatpush1.bf16.msra.mxu1 %v5437_v54  ;;  %3955 = vst [vmem:[#allocation19 + $0x40] sm:$0xff] %v5627_v11  ;;  %v5632_v23 = vadd.f32 %v3168_v21, %v2190_v57  ;;  %5312 = vmatprep.subr.bf16.mxu0 %v5311_v61  ;;  %v1757_v54 = vld [vmem:[#allocation16 + $0x2020] sm:$0xff]  ;;  %v1779_v61 = vld [vmem:[#allocation16 + $0x20d0] sm:$0xff]  ;;  %v5325_v21 = vpack.c.bf16 %v1823_v10, %v1801_v8 }
 0x564   :  { %3957 = vst [vmem:[#allocation19 + $0x50] sm:$0xff] %v5631_v19  ;;  %3956 = vst [vmem:[#allocation19 + $0x48] sm:$0xff] %v5628_v12  ;;  %5440 = vmatprep.subr.bf16.mxu1 %v5439_v5  ;;  %v3018_v27 = vpop.f32.mrb[12].mxu0  ;;  %v5321_v5 = vpack.c.bf16 %v1779_v61, %v1757_v54  ;;  %v1803_v11 = vld [vmem:[#allocation16 + $0x2190] sm:$0xff]  ;;  %v1848_v19 = vld [vmem:[#allocation16 + $0x22f8] sm:$0xff] }
 0x565   :  { %3958 = vst [vmem:[#allocation19 + $0x58] sm:$0xff] %v5632_v23  ;;  %v5629_v36 = vadd.f32 %v3018_v27, %v2178_v45  ;;  %v3172_v37 = vpop.f32.mrb[22].mxu1  ;;  %v3020_v38 = vpop.f32.mrb[13].mxu0  ;;  %v5447_v45 = vpack.c.bf16 %v1782_v46, %v1760_v39  ;;  %v1870_v12 = vld [vmem:[#allocation16 + $0x23a8] sm:$0xff]  ;;  %v5327_v23 = vpack.c.bf16 %v1868_v20, %v1846_v17  ;;  %v1911_v39 = vld [vmem:[#allocation16 + $0x24f0] sm:$0xff]  ;;  %v1957_v3 = vld [vmem:[#allocation16 + $0x2660] sm:$0xff] }
 0x566   :  { %5314 = vmatpush1.bf16.msra.mxu0 %v5313_v22  ;;  %v5633_v40 = vadd.f32 %v3172_v37, %v2186_v52  ;;  %v5630_v41 = vadd.f32 %v3020_v38, %v2182_v53  ;;  %v3174_v42 = vpop.f32.mrb[23].mxu1  ;;  %v1804_v52 = vld [vmem:[#allocation16 + $0x2198] sm:$0xff]  ;;  %v1826_v53 = vld [vmem:[#allocation16 + $0x2248] sm:$0xff]  ;;  %v5453_v22 = vpack.c.bf16 %v1825_v15, %v1803_v11  ;;  %v5455_v30 = vpack.c.bf16 %v1870_v12, %v1848_v19  ;;  %v1889_v38 = vld [vmem:[#allocation16 + $0x2440] sm:$0xff] }
 0x567   :  { %5442 = vmatpush1.bf16.msra.mxu1 %v5441_v18  ;;  %3977 = vst [vmem:[#allocation19 + $0xf0] sm:$0xff] %v5629_v36  ;;  %v5634_v47 = vadd.f32 %v3174_v42, %v2190_v57  ;;  %5316 = vmatprep.subr.bf16.mxu0 %v5315_v24  ;;  %v5449_v57 = vpack.c.bf16 %v1781_v63, %v1759_v62  ;;  %v1845_v18 = vld [vmem:[#allocation16 + $0x22e0] sm:$0xff]  ;;  %v1867_v24 = vld [vmem:[#allocation16 + $0x2390] sm:$0xff]  ;;  %v1890_v27 = vld [vmem:[#allocation16 + $0x2448] sm:$0xff] }
 0x568   :  { %3979 = vst [vmem:[#allocation19 + $0x100] sm:$0xff] %v5633_v40  ;;  %3978 = vst [vmem:[#allocation19 + $0xf8] sm:$0xff] %v5630_v41  ;;  %5444 = vmatprep.subr.bf16.mxu1 %v5443_v28  ;;  %v5451_v14 = vpack.c.bf16 %v1826_v53, %v1804_v52  ;;  %v1912_v28 = vld [vmem:[#allocation16 + $0x24f8] sm:$0xff]  ;;  %v5329_v33 = vpack.c.bf16 %v1867_v24, %v1845_v18  ;;  %v5457_v36 = vpack.c.bf16 %v1869_v26, %v1847_v34  ;;  %v1891_v46 = vld [vmem:[#allocation16 + $0x2450] sm:$0xff] }
 0x569   :  { %3980 = vst [vmem:[#allocation19 + $0x108] sm:$0xff] %v5634_v47  ;;  %v5331_v37 = vpack.c.bf16 %v1912_v28, %v1890_v27  ;;  %v5459_v40 = vpack.c.bf16 %v1914_v32, %v1892_v29  ;;  %v1913_v41 = vld [vmem:[#allocation16 + $0x2500] sm:$0xff]  ;;  %v1934_v42 = vld [vmem:[#allocation16 + $0x25a8] sm:$0xff]  ;;  %v1936_v47 = vld [vmem:[#allocation16 + $0x25b8] sm:$0xff] }
 0x56a   :  { %5318 = vmatpush1.bf16.msra.mxu0 %v5317_v44  ;;  %v1956_v44 = vld [vmem:[#allocation16 + $0x2658] sm:$0xff]  ;;  %v5461_v54 = vpack.c.bf16 %v1913_v41, %v1891_v46  ;;  %v1933_v62 = vld [vmem:[#allocation16 + $0x25a0] sm:$0xff]  ;;  %v1935_v63 = vld [vmem:[#allocation16 + $0x25b0] sm:$0xff] }
 0x56b   :  { %5446 = vmatpush1.bf16.msra.mxu1 %v5445_v48  ;;  %5320 = vmatprep.subr.bf16.mxu0 %v5319_v49  ;;  %v1958_v48 = vld [vmem:[#allocation16 + $0x2668] sm:$0xff]  ;;  %v5333_v49 = vpack.c.bf16 %v1911_v39, %v1889_v38  ;;  %v5335_v61 = vpack.c.bf16 %v1956_v44, %v1934_v42  ;;  %v2000_v53 = vld [vmem:[#allocation16 + $0x27b8] sm:$0xff]  ;;  %v5465_v8 = vpack.c.bf16 %v1957_v3, %v1935_v63  ;;  %v1977_v11 = vld [vmem:[#allocation16 + $0x2700] sm:$0xff] }
 0x56c   :  { %5448 = vmatprep.subr.bf16.mxu1 %v5447_v45  ;;  %v1955_v45 = vld [vmem:[#allocation16 + $0x2650] sm:$0xff]  ;;  %v5463_v2 = vpack.c.bf16 %v1958_v48, %v1936_v47  ;;  %v1978_v52 = vld [vmem:[#allocation16 + $0x2708] sm:$0xff]  ;;  %v2001_v20 = vld [vmem:[#allocation16 + $0x27c0] sm:$0xff] }
 0x56d   :  { %v5339_v10 = vpack.c.bf16 %v2000_v53, %v1978_v52  ;;  %v1979_v15 = vld [vmem:[#allocation16 + $0x2710] sm:$0xff]  ;;  %v2022_v19 = vld [vmem:[#allocation16 + $0x2868] sm:$0xff]  ;;  %v2044_v12 = vld [vmem:[#allocation16 + $0x2918] sm:$0xff] }
 0x56e   :  { %5322 = vmatpush1.bf16.msra.mxu0 %v5321_v5  ;;  %v1980_v5 = vld [vmem:[#allocation16 + $0x2718] sm:$0xff]  ;;  %v5469_v18 = vpack.c.bf16 %v2001_v20, %v1979_v15  ;;  %v5343_v24 = vpack.c.bf16 %v2044_v12, %v2022_v19  ;;  %v2021_v34 = vld [vmem:[#allocation16 + $0x2860] sm:$0xff]  ;;  %v2023_v26 = vld [vmem:[#allocation16 + $0x2870] sm:$0xff] }
 0x56f   :  { %5450 = vmatpush1.bf16.msra.mxu1 %v5449_v57  ;;  %5324 = vmatprep.subr.bf16.mxu0 %v5323_v7  ;;  %v2002_v57 = vld [vmem:[#allocation16 + $0x27c8] sm:$0xff]  ;;  %v5337_v7 = vpack.c.bf16 %v1955_v45, %v1933_v62  ;;  %v2045_v28 = vld [vmem:[#allocation16 + $0x2920] sm:$0xff]  ;;  %v2088_v32 = vld [vmem:[#allocation16 + $0x2a78] sm:$0xff] }
 0x570   :  { %5452 = vmatprep.subr.bf16.mxu1 %v5451_v14  ;;  %v1999_v14 = vld [vmem:[#allocation16 + $0x27b0] sm:$0xff]  ;;  %v5467_v17 = vpack.c.bf16 %v2002_v57, %v1980_v5  ;;  %v2066_v29 = vld [vmem:[#allocation16 + $0x29c8] sm:$0xff]  ;;  %v5473_v38 = vpack.c.bf16 %v2045_v28, %v2023_v26  ;;  %v2065_v46 = vld [vmem:[#allocation16 + $0x29c0] sm:$0xff] }
 0x571   :  { %v5347_v39 = vpack.c.bf16 %v2088_v32, %v2066_v29  ;;  %v2067_v41 = vld [vmem:[#allocation16 + $0x29d0] sm:$0xff]  ;;  %v2089_v44 = vld [vmem:[#allocation16 + $0x2a80] sm:$0xff]  ;;  %v2110_v47 = vld [vmem:[#allocation16 + $0x2b28] sm:$0xff] }
 0x572   :  { %5326 = vmatpush1.bf16.msra.mxu0 %v5325_v21  ;;  %v2024_v21 = vld [vmem:[#allocation16 + $0x2878] sm:$0xff]  ;;  %v5477_v62 = vpack.c.bf16 %v2089_v44, %v2067_v41  ;;  %v2109_v63 = vld [vmem:[#allocation16 + $0x2b20] sm:$0xff]  ;;  %v2111_v3 = vld [vmem:[#allocation16 + $0x2b30] sm:$0xff] }
 0x573   :  { %5454 = vmatpush1.bf16.msra.mxu1 %v5453_v22  ;;  %5328 = vmatprep.subr.bf16.mxu0 %v5327_v23  ;;  %v2046_v22 = vld [vmem:[#allocation16 + $0x2928] sm:$0xff]  ;;  %v5341_v23 = vpack.c.bf16 %v1999_v14, %v1977_v11  ;;  %v2132_v48 = vld [vmem:[#allocation16 + $0x2bd8] sm:$0xff]  ;;  %v2133_v53 = vld [vmem:[#allocation16 + $0x2be0] sm:$0xff] }
 0x574   :  { %5456 = vmatprep.subr.bf16.mxu1 %v5455_v30  ;;  %v2043_v30 = vld [vmem:[#allocation16 + $0x2910] sm:$0xff]  ;;  %v5471_v27 = vpack.c.bf16 %v2046_v22, %v2024_v21  ;;  %v5351_v45 = vpack.c.bf16 %v2132_v48, %v2110_v47  ;;  %v750_v5 = vld [vmem:[#allocation16 + $0xa8] sm:$0xff]  ;;  %v772_v57 = vld [vmem:[#allocation16 + $0x158] sm:$0xff] }
 0x575   :  { %v749_v11 = vld [vmem:[#allocation16 + $0xa0] sm:$0xff]  ;;  %v771_v14 = vld [vmem:[#allocation16 + $0x150] sm:$0xff]  ;;  %v794_v15 = vld [vmem:[#allocation16 + $0x208] sm:$0xff] }
 0x576   :  { %5330 = vmatpush1.bf16.msra.mxu0 %v5329_v33  ;;  %v2068_v33 = vld [vmem:[#allocation16 + $0x29d8] sm:$0xff]  ;;  %v5485_v20 = vpack.c.bf16 %v771_v14, %v749_v11  ;;  %v793_v12 = vld [vmem:[#allocation16 + $0x200] sm:$0xff]  ;;  %v815_v21 = vld [vmem:[#allocation16 + $0x2b0] sm:$0xff] }
 0x577   :  { %5458 = vmatpush1.bf16.msra.mxu1 %v5457_v36  ;;  %5332 = vmatprep.subr.bf16.mxu0 %v5331_v37  ;;  %v2090_v36 = vld [vmem:[#allocation16 + $0x2a88] sm:$0xff]  ;;  %v5345_v37 = vpack.c.bf16 %v2043_v30, %v2021_v34  ;;  %v837_v34 = vld [vmem:[#allocation16 + $0x360] sm:$0xff]  ;;  %v859_v30 = vld [vmem:[#allocation16 + $0x410] sm:$0xff] }
 0x578   :  { %5460 = vmatprep.subr.bf16.mxu1 %v5459_v40  ;;  %v2087_v40 = vld [vmem:[#allocation16 + $0x2a70] sm:$0xff]  ;;  %v5475_v42 = vpack.c.bf16 %v2090_v36, %v2068_v33  ;;  %v838_v22 = vld [vmem:[#allocation16 + $0x368] sm:$0xff]  ;;  %v5493_v28 = vpack.c.bf16 %v859_v30, %v837_v34  ;;  %v881_v32 = vld [vmem:[#allocation16 + $0x4c0] sm:$0xff] }
 0x579   :  { %v882_v26 = vld [vmem:[#allocation16 + $0x4c8] sm:$0xff]  ;;  %v903_v33 = vld [vmem:[#allocation16 + $0x570] sm:$0xff]  ;;  %v969_v47 = vld [vmem:[#allocation16 + $0x780] sm:$0xff] }
 0x57a   :  { %5334 = vmatpush1.bf16.msra.mxu0 %v5333_v49  ;;  %v2112_v49 = vld [vmem:[#allocation16 + $0x2b38] sm:$0xff]  ;;  %v926_v36 = vld [vmem:[#allocation16 + $0x628] sm:$0xff]  ;;  %v991_v48 = vld [vmem:[#allocation16 + $0x830] sm:$0xff] }
 0x57b   :  { %5462 = vmatpush1.bf16.msra.mxu1 %v5461_v54  ;;  %5336 = vmatprep.subr.bf16.mxu0 %v5335_v61  ;;  %v2134_v54 = vld [vmem:[#allocation16 + $0x2be8] sm:$0xff]  ;;  %v5349_v61 = vpack.c.bf16 %v2087_v40, %v2065_v46  ;;  %v925_v46 = vld [vmem:[#allocation16 + $0x620] sm:$0xff]  ;;  %v947_v40 = vld [vmem:[#allocation16 + $0x6d0] sm:$0xff] }
 0x57c   :  { %5464 = vmatprep.subr.bf16.mxu1 %v5463_v2  ;;  %v2131_v2 = vld [vmem:[#allocation16 + $0x2bd0] sm:$0xff]  ;;  %v5479_v52 = vpack.c.bf16 %v2134_v54, %v2112_v49  ;;  %v970_v41 = vld [vmem:[#allocation16 + $0x788] sm:$0xff]  ;;  %v5501_v44 = vpack.c.bf16 %v947_v40, %v925_v46  ;;  %v1036_v54 = vld [vmem:[#allocation16 + $0x998] sm:$0xff] }
 0x57d   :  { %v1014_v49 = vld [vmem:[#allocation16 + $0x8e8] sm:$0xff]  ;;  %v1101_v14 = vld [vmem:[#allocation16 + $0xba0] sm:$0xff] }
 0x57e   :  { %5338 = vmatpush1.bf16.msra.mxu0 %v5337_v7  ;;  %v5353_v7 = vpack.c.bf16 %v2131_v2, %v2109_v63  ;;  %v1035_v63 = vld [vmem:[#allocation16 + $0x990] sm:$0xff]  ;;  %v1058_v2 = vld [vmem:[#allocation16 + $0xa48] sm:$0xff]  ;;  %v1189_v30 = vld [vmem:[#allocation16 + $0xe60] sm:$0xff] }
 0x57f   :  { %5466 = vmatpush1.bf16.msra.mxu1 %v5465_v8  ;;  %5340 = vmatprep.subr.bf16.mxu0 %v5339_v10  ;;  %v5481_v8 = vpack.c.bf16 %v2133_v53, %v2111_v3  ;;  %v5483_v10 = vpack.c.bf16 %v772_v57, %v750_v5  ;;  %v1080_v3 = vld [vmem:[#allocation16 + $0xaf8] sm:$0xff]  ;;  %v1057_v5 = vld [vmem:[#allocation16 + $0xa40] sm:$0xff]  ;;  %v1079_v57 = vld [vmem:[#allocation16 + $0xaf0] sm:$0xff] }
 0x580   :  { %5468 = vmatprep.subr.bf16.mxu1 %v5467_v17  ;;  %v816_v17 = vld [vmem:[#allocation16 + $0x2b8] sm:$0xff]  ;;  %v5511_v53 = vpack.c.bf16 %v1080_v3, %v1058_v2  ;;  %v1277_v40 = vld [vmem:[#allocation16 + $0x1120] sm:$0xff]  ;;  %v1387_v2 = vld [vmem:[#allocation16 + $0x1490] sm:$0xff] }
 0x581   :  { %v5487_v19 = vpack.c.bf16 %v816_v17, %v794_v15  ;;  %v1123_v15 = vld [vmem:[#allocation16 + $0xc50] sm:$0xff]  ;;  %v1146_v17 = vld [vmem:[#allocation16 + $0xd08] sm:$0xff] }
 0x582   :  { %5342 = vmatpush1.bf16.msra.mxu0 %v5341_v23  ;;  %v860_v23 = vld [vmem:[#allocation16 + $0x418] sm:$0xff]  ;;  %v1410_v3 = vld [vmem:[#allocation16 + $0x1548] sm:$0xff] }
 0x583   :  { %5470 = vmatpush1.bf16.msra.mxu1 %v5469_v18  ;;  %5344 = vmatprep.subr.bf16.mxu0 %v5343_v24  ;;  %v5489_v18 = vpack.c.bf16 %v815_v21, %v793_v12  ;;  %v5491_v24 = vpack.c.bf16 %v860_v23, %v838_v22  ;;  %v1145_v21 = vld [vmem:[#allocation16 + $0xd00] sm:$0xff]  ;;  %v1167_v22 = vld [vmem:[#allocation16 + $0xdb0] sm:$0xff]  ;;  %v1190_v23 = vld [vmem:[#allocation16 + $0xe68] sm:$0xff] }
 0x584   :  { %5472 = vmatprep.subr.bf16.mxu1 %v5471_v27  ;;  %v904_v27 = vld [vmem:[#allocation16 + $0x578] sm:$0xff] }
 0x585   :  { %v5495_v29 = vpack.c.bf16 %v904_v27, %v882_v26  ;;  %v1211_v26 = vld [vmem:[#allocation16 + $0xf10] sm:$0xff]  ;;  %v1234_v27 = vld [vmem:[#allocation16 + $0xfc8] sm:$0xff] }
 0x586   :  { %5346 = vmatpush1.bf16.msra.mxu0 %v5345_v37  ;;  %v948_v37 = vld [vmem:[#allocation16 + $0x6d8] sm:$0xff] }
 0x587   :  { %5474 = vmatpush1.bf16.msra.mxu1 %v5473_v38  ;;  %5348 = vmatprep.subr.bf16.mxu0 %v5347_v39  ;;  %v5497_v38 = vpack.c.bf16 %v903_v33, %v881_v32  ;;  %v5499_v39 = vpack.c.bf16 %v948_v37, %v926_v36  ;;  %v1233_v33 = vld [vmem:[#allocation16 + $0xfc0] sm:$0xff]  ;;  %v1255_v36 = vld [vmem:[#allocation16 + $0x1070] sm:$0xff]  ;;  %v1278_v37 = vld [vmem:[#allocation16 + $0x1128] sm:$0xff] }
 0x588   :  { %5476 = vmatprep.subr.bf16.mxu1 %v5475_v42  ;;  %v992_v42 = vld [vmem:[#allocation16 + $0x838] sm:$0xff] }
 0x58a   :  { %5350 = vmatpush1.bf16.msra.mxu0 %v5349_v61  ;;  %v5505_v61 = vpack.c.bf16 %v991_v48, %v969_v47  ;;  %v1321_v48 = vld [vmem:[#allocation16 + $0x1280] sm:$0xff] }
 0x58b   :  { %5478 = vmatpush1.bf16.msra.mxu1 %v5477_v62  ;;  %5352 = vmatprep.subr.bf16.mxu0 %v5351_v45  ;;  %v5507_v62 = vpack.c.bf16 %v1036_v54, %v1014_v49  ;;  %v1013_v45 = vld [vmem:[#allocation16 + $0x8e0] sm:$0xff]  ;;  %v1343_v49 = vld [vmem:[#allocation16 + $0x1330] sm:$0xff]  ;;  %v1366_v54 = vld [vmem:[#allocation16 + $0x13e8] sm:$0xff] }
 0x58c   :  { %5480 = vmatprep.subr.bf16.mxu1 %v5479_v52  ;;  %v5509_v52 = vpack.c.bf16 %v1035_v63, %v1013_v45  ;;  %v1365_v63 = vld [vmem:[#allocation16 + $0x13e0] sm:$0xff] }
 0x58e   :  { %5354 = vmatpush1.bf16.msra.mxu0 %v5353_v7  ;;  %v1102_v7 = vld [vmem:[#allocation16 + $0xba8] sm:$0xff] }
 0x58f   :  { %5482 = vmatpush1.bf16.msra.mxu1 %v5481_v8  ;;  %5484 = vmatprep.subr.bf16.mxu0 %v5483_v10  ;;  %v1124_v8 = vld [vmem:[#allocation16 + $0xc58] sm:$0xff]  ;;  %v5513_v10 = vpack.c.bf16 %v1079_v57, %v1057_v5  ;;  %v1409_v57 = vld [vmem:[#allocation16 + $0x1540] sm:$0xff] }
 0x590   :  { %v5515_v11 = vpack.c.bf16 %v1124_v8, %v1102_v7  ;;  %v1431_v7 = vld [vmem:[#allocation16 + $0x15f0] sm:$0xff]  ;;  %v1454_v8 = vld [vmem:[#allocation16 + $0x16a8] sm:$0xff] }
 0x591   :  { %3627 = vmatmul.mubr.f32.vlgmr.msra.gmra.mrb[18].mxu0 %v6244_v0 }
 0x592   :  { %3781 = vmatmul.mubr.f32.vlgmr.msra.gmra.mrb[28].mxu1 %v6244_v0  ;;  %3632 = vmatprep.mubr.f32.mxu0 %v6252_v13 }
 0x593   :  { %3786 = vmatprep.mubr.f32.mxu1 %v6252_v13  ;;  %5486 = vmatpush1.bf16.msra.mxu0 %v5485_v20  ;;  %v1168_v20 = vld [vmem:[#allocation16 + $0xdb8] sm:$0xff] }
 0x594   :  { %5488 = vmatprep.subr.bf16.mxu0 %v5487_v19  ;;  %v5517_v19 = vpack.c.bf16 %v1123_v15, %v1101_v14  ;;  %v5519_v12 = vpack.c.bf16 %v1168_v20, %v1146_v17  ;;  %v1453_v15 = vld [vmem:[#allocation16 + $0x16a0] sm:$0xff]  ;;  %v1475_v17 = vld [vmem:[#allocation16 + $0x1750] sm:$0xff]  ;;  %v1498_v20 = vld [vmem:[#allocation16 + $0x1808] sm:$0xff] }
 0x595   :  { %3633 = vmatmul.mubr.f32.gmra.mrb[20].mxu0 %v6255_v51 }
 0x596   :  { %3787 = vmatmul.mubr.f32.gmra.mrb[30].mxu1 %v6255_v51  ;;  %3857 = vmatprep.mubr.f32.mxu0 %v6209_v9  ;;  %v5503_v9 = vpack.c.bf16 %v992_v42, %v970_v41  ;;  %v1299_v41 = vld [vmem:[#allocation16 + $0x11d0] sm:$0xff]  ;;  %v1322_v42 = vld [vmem:[#allocation16 + $0x1288] sm:$0xff] }
 0x597   :  { %5490 = vmatpush1.bf16.msra.mxu0 %v5489_v18  ;;  %v1212_v18 = vld [vmem:[#allocation16 + $0xf18] sm:$0xff] }
 0x598   :  { %5492 = vmatprep.subr.bf16.mxu0 %v5491_v24  ;;  %v5521_v24 = vpack.c.bf16 %v1167_v22, %v1145_v21  ;;  %v5523_v34 = vpack.c.bf16 %v1212_v18, %v1190_v23  ;;  %v1497_v22 = vld [vmem:[#allocation16 + $0x1800] sm:$0xff]  ;;  %v1519_v23 = vld [vmem:[#allocation16 + $0x18b0] sm:$0xff]  ;;  %v1542_v18 = vld [vmem:[#allocation16 + $0x1968] sm:$0xff] }
 0x59b   :  { %5494 = vmatpush1.bf16.msra.mxu0 %v5493_v28  ;;  %v1256_v28 = vld [vmem:[#allocation16 + $0x1078] sm:$0xff] }
 0x59c   :  { %5496 = vmatprep.subr.bf16.mxu0 %v5495_v29  ;;  %v5525_v29 = vpack.c.bf16 %v1211_v26, %v1189_v30  ;;  %v5527_v32 = vpack.c.bf16 %v1256_v28, %v1234_v27  ;;  %v1541_v26 = vld [vmem:[#allocation16 + $0x1960] sm:$0xff]  ;;  %v1563_v27 = vld [vmem:[#allocation16 + $0x1a10] sm:$0xff]  ;;  %v1586_v28 = vld [vmem:[#allocation16 + $0x1ac8] sm:$0xff] }
 0x59f   :  { %5498 = vmatpush1.bf16.msra.mxu0 %v5497_v38  ;;  %v1300_v38 = vld [vmem:[#allocation16 + $0x11d8] sm:$0xff] }
 0x5a0   :  { %5500 = vmatprep.subr.bf16.mxu0 %v5499_v39  ;;  %v5529_v39 = vpack.c.bf16 %v1255_v36, %v1233_v33  ;;  %v5531_v46 = vpack.c.bf16 %v1300_v38, %v1278_v37  ;;  %v1585_v36 = vld [vmem:[#allocation16 + $0x1ac0] sm:$0xff]  ;;  %v1630_v37 = vld [vmem:[#allocation16 + $0x1c28] sm:$0xff] }
 0x5a3   :  { %5502 = vmatpush1.bf16.msra.mxu0 %v5501_v44  ;;  %v1344_v44 = vld [vmem:[#allocation16 + $0x1338] sm:$0xff] }
 0x5a4   :  { %5504 = vmatprep.subr.bf16.mxu0 %v5503_v9  ;;  %v5533_v9 = vpack.c.bf16 %v1299_v41, %v1277_v40  ;;  %v5535_v47 = vpack.c.bf16 %v1344_v44, %v1322_v42  ;;  %v1651_v40 = vld [vmem:[#allocation16 + $0x1cd0] sm:$0xff]  ;;  %v1674_v41 = vld [vmem:[#allocation16 + $0x1d88] sm:$0xff]  ;;  %v1696_v42 = vld [vmem:[#allocation16 + $0x1e38] sm:$0xff]  ;;  %v2202_v44 = vrot.slane %v6337_v35, %v2169_v58 }
 0x5a7   :  { %5506 = vmatpush1.bf16.msra.mxu0 %v5505_v61  ;;  %v1388_v61 = vld [vmem:[#allocation16 + $0x1498] sm:$0xff] }
 0x5a8   :  { %5508 = vmatprep.subr.bf16.mxu0 %v5507_v62  ;;  %v5537_v62 = vpack.c.bf16 %v1343_v49, %v1321_v48  ;;  %v5539_v45 = vpack.c.bf16 %v1388_v61, %v1366_v54  ;;  %v1673_v48 = vld [vmem:[#allocation16 + $0x1d80] sm:$0xff]  ;;  %v1695_v49 = vld [vmem:[#allocation16 + $0x1e30] sm:$0xff]  ;;  %v2206_v54 = vrot.slane %v6337_v35, %v2173_v4  ;;  %v1718_v61 = vld [vmem:[#allocation16 + $0x1ee8] sm:$0xff] }
 0x5ab   :  { %5510 = vmatpush1.bf16.msra.mxu0 %v5509_v52  ;;  %v1432_v52 = vld [vmem:[#allocation16 + $0x15f8] sm:$0xff] }
 0x5ac   :  { %5512 = vmatprep.subr.bf16.mxu0 %v5511_v53  ;;  %v5541_v53 = vpack.c.bf16 %v1387_v2, %v1365_v63  ;;  %v5543_v5 = vpack.c.bf16 %v1432_v52, %v1410_v3  ;;  %v5569_v52 = vpack.c.bf16 %v1695_v49, %v1673_v48  ;;  %v1982_v48 = vld [vmem:[#allocation16 + $0x2728] sm:$0xff]  ;;  %v2004_v49 = vld [vmem:[#allocation16 + $0x27d8] sm:$0xff] }
 0x5af   :  { %5514 = vmatpush1.bf16.msra.mxu0 %v5513_v10  ;;  %v1476_v10 = vld [vmem:[#allocation16 + $0x1758] sm:$0xff] }
 0x5b0   :  { %5516 = vmatprep.subr.bf16.mxu0 %v5515_v11  ;;  %v5545_v11 = vpack.c.bf16 %v1431_v7, %v1409_v57  ;;  %v5547_v14 = vpack.c.bf16 %v1476_v10, %v1454_v8  ;;  %v1717_v7 = vld [vmem:[#allocation16 + $0x1ee0] sm:$0xff]  ;;  %v1739_v8 = vld [vmem:[#allocation16 + $0x1f90] sm:$0xff] }
 0x5b3   :  { %5518 = vmatpush1.bf16.msra.mxu0 %v5517_v19  ;;  %v1520_v19 = vld [vmem:[#allocation16 + $0x18b8] sm:$0xff] }
 0x5b4   :  { %5520 = vmatprep.subr.bf16.mxu0 %v5519_v12  ;;  %v5549_v12 = vpack.c.bf16 %v1475_v17, %v1453_v15  ;;  %v5551_v21 = vpack.c.bf16 %v1520_v19, %v1498_v20  ;;  %v5573_v17 = vpack.c.bf16 %v1739_v8, %v1717_v7 }
 0x5b7   :  { %5522 = vmatpush1.bf16.msra.mxu0 %v5521_v24  ;;  %v1564_v24 = vld [vmem:[#allocation16 + $0x1a18] sm:$0xff] }
 0x5b8   :  { %5524 = vmatprep.subr.bf16.mxu0 %v5523_v34  ;;  %v5553_v34 = vpack.c.bf16 %v1519_v23, %v1497_v22  ;;  %v5555_v30 = vpack.c.bf16 %v1564_v24, %v1542_v18  ;;  %v1761_v22 = vld [vmem:[#allocation16 + $0x2040] sm:$0xff]  ;;  %v1783_v23 = vld [vmem:[#allocation16 + $0x20f0] sm:$0xff]  ;;  %v1806_v24 = vld [vmem:[#allocation16 + $0x21a8] sm:$0xff] }
 0x5bb   :  { %5526 = vmatpush1.bf16.msra.mxu0 %v5525_v29  ;;  %v1608_v29 = vld [vmem:[#allocation16 + $0x1b78] sm:$0xff] }
 0x5bc   :  { %5528 = vmatprep.subr.bf16.mxu0 %v5527_v32  ;;  %v5557_v32 = vpack.c.bf16 %v1563_v27, %v1541_v26  ;;  %v5559_v33 = vpack.c.bf16 %v1608_v29, %v1586_v28  ;;  %v1805_v27 = vld [vmem:[#allocation16 + $0x21a0] sm:$0xff]  ;;  %v1827_v28 = vld [vmem:[#allocation16 + $0x2250] sm:$0xff]  ;;  %v1850_v29 = vld [vmem:[#allocation16 + $0x2308] sm:$0xff] }
 0x5bf   :  { %5530 = vmatpush1.bf16.msra.mxu0 %v5529_v39 }
 0x5c0   :  { %5532 = vmatprep.subr.bf16.mxu0 %v5531_v46  ;;  %v1629_v46 = vld [vmem:[#allocation16 + $0x1c20] sm:$0xff] }
 0x5c3   :  { %5534 = vmatpush1.bf16.msra.mxu0 %v5533_v9  ;;  %v2198_v9 = vrot.slane %v6337_v35, %v6312_v60 }
 0x5c4   :  { %5536 = vmatprep.subr.bf16.mxu0 %v5535_v47  ;;  %v5567_v47 = vpack.c.bf16 %v1696_v42, %v1674_v41  ;;  %v1915_v41 = vld [vmem:[#allocation16 + $0x2510] sm:$0xff]  ;;  %v1938_v42 = vld [vmem:[#allocation16 + $0x25c8] sm:$0xff] }
 0x5c7   :  { %5538 = vmatpush1.bf16.msra.mxu0 %v5537_v62  ;;  %v1740_v62 = vld [vmem:[#allocation16 + $0x1f98] sm:$0xff] }
 0x5c8   :  { %5540 = vmatprep.subr.bf16.mxu0 %v5539_v45  ;;  %v5571_v57 = vpack.c.bf16 %v1740_v62, %v1718_v61  ;;  %v5595_v61 = vpack.c.bf16 %v2004_v49, %v1982_v48  ;;  %v1981_v62 = vld [vmem:[#allocation16 + $0x2720] sm:$0xff] }
 0x5cb   :  { %5542 = vmatpush1.bf16.msra.mxu0 %v5541_v53 }
 0x5cc   :  { %5544 = vmatprep.subr.bf16.mxu0 %v5543_v5 }
 0x5cf   :  { %5546 = vmatpush1.bf16.msra.mxu0 %v5545_v11  ;;  %v1784_v11 = vld [vmem:[#allocation16 + $0x20f8] sm:$0xff] }
 0x5d0   :  { %5548 = vmatprep.subr.bf16.mxu0 %v5547_v14 }
 0x5d2   :  { %3858 = vmatmul.mubr.f32.vlgmr.msra.gmra.mrb[22].mxu0 %v6212_v16  ;;  %v1607_v16 = vld [vmem:[#allocation16 + $0x1b70] sm:$0xff] }
 0x5d3   :  { %3863 = vmatprep.mubr.f32.mxu0 %v6220_v25  ;;  %5550 = vmatpush1.bf16.msra.mxu0 %v5549_v12  ;;  %v1652_v25 = vld [vmem:[#allocation16 + $0x1cd8] sm:$0xff]  ;;  %v5561_v38 = vpack.c.bf16 %v1607_v16, %v1585_v36  ;;  %v1849_v16 = vld [vmem:[#allocation16 + $0x2300] sm:$0xff] }
 0x5d4   :  { %5552 = vmatprep.subr.bf16.mxu0 %v5551_v21  ;;  %v5563_v39 = vpack.c.bf16 %v1652_v25, %v1630_v37  ;;  %v5575_v21 = vpack.c.bf16 %v1784_v11, %v1762_v43  ;;  %v1871_v37 = vld [vmem:[#allocation16 + $0x23b0] sm:$0xff]  ;;  %v1894_v25 = vld [vmem:[#allocation16 + $0x2468] sm:$0xff] }
 0x5d5   :  { %v2091_v43 = vld [vmem:[#allocation16 + $0x2a90] sm:$0xff]  ;;  %v2114_v11 = vld [vmem:[#allocation16 + $0x2b48] sm:$0xff] }
 0x5d6   :  { %3864 = vmatmul.mubr.f32.gmra.mrb[24].mxu0 %v6223_v31  ;;  %v5565_v31 = vpack.c.bf16 %v1651_v40, %v1629_v46  ;;  %v1893_v40 = vld [vmem:[#allocation16 + $0x2460] sm:$0xff] }
 0x5d7   :  { %5554 = vmatpush1.bf16.msra.mxu0 %v5553_v34  ;;  %3934 = vmatprep.mubr.f32.mxu0 %v6241_v59  ;;  %v2194_v59 = vrot.slane %v6337_v35, %v6308_v56  ;;  %v1828_v34 = vld [vmem:[#allocation16 + $0x2258] sm:$0xff] }
 0x5d8   :  { %5556 = vmatprep.subr.bf16.mxu0 %v5555_v30  ;;  %v5577_v30 = vpack.c.bf16 %v1783_v23, %v1761_v22  ;;  %v5579_v26 = vpack.c.bf16 %v1828_v34, %v1806_v24 }
 0x5db   :  { %5558 = vmatpush1.bf16.msra.mxu0 %v5557_v32  ;;  %v1872_v32 = vld [vmem:[#allocation16 + $0x23b8] sm:$0xff] }
 0x5dc   :  { %5560 = vmatprep.subr.bf16.mxu0 %v5559_v33  ;;  %v5581_v33 = vpack.c.bf16 %v1827_v28, %v1805_v27  ;;  %v5583_v36 = vpack.c.bf16 %v1872_v32, %v1850_v29 }
 0x5df   :  { %5562 = vmatpush1.bf16.msra.mxu0 %v5561_v38  ;;  %v1916_v38 = vld [vmem:[#allocation16 + $0x2518] sm:$0xff] }
 0x5e0   :  { %5564 = vmatprep.subr.bf16.mxu0 %v5563_v39  ;;  %v5585_v39 = vpack.c.bf16 %v1871_v37, %v1849_v16  ;;  %v5587_v46 = vpack.c.bf16 %v1916_v38, %v1894_v25 }
 0x5e2   :  { %v3320_v45 = vpop.f32.mrb[14].mxu0 }
 0x5e3   :  { %5566 = vmatpush1.bf16.msra.mxu0 %v5565_v31  ;;  %v5635_v63 = vadd.f32 %v3320_v45, %v2194_v59  ;;  %v3474_v2 = vpop.f32.mrb[24].mxu1  ;;  %v3322_v3 = vpop.f32.mrb[15].mxu0  ;;  %v1960_v31 = vld [vmem:[#allocation16 + $0x2678] sm:$0xff]  ;;  %v2003_v45 = vld [vmem:[#allocation16 + $0x27d0] sm:$0xff] }
 0x5e4   :  { %v5639_v53 = vadd.f32 %v3474_v2, %v2202_v44  ;;  %v5636_v58 = vadd.f32 %v3322_v3, %v2198_v9  ;;  %v3476_v5 = vpop.f32.mrb[25].mxu1  ;;  %5568 = vmatprep.subr.bf16.mxu0 %v5567_v47  ;;  %v1959_v47 = vld [vmem:[#allocation16 + $0x2670] sm:$0xff]  ;;  %v2048_v2 = vld [vmem:[#allocation16 + $0x2938] sm:$0xff]  ;;  %v5597_v3 = vpack.c.bf16 %v2003_v45, %v1981_v62 }
 0x5e5   :  { %3959 = vst [vmem:[#allocation19 + $0x60] sm:$0xff] %v5635_v63  ;;  %v5640_v10 = vadd.f32 %v3476_v5, %v2206_v54  ;;  %v2026_v63 = vld [vmem:[#allocation16 + $0x2888] sm:$0xff] }
 0x5e6   :  { %3961 = vst [vmem:[#allocation19 + $0x70] sm:$0xff] %v5639_v53  ;;  %3960 = vst [vmem:[#allocation19 + $0x68] sm:$0xff] %v5636_v58  ;;  %v3326_v4 = vpop.f32.mrb[16].mxu0  ;;  %v2025_v53 = vld [vmem:[#allocation16 + $0x2880] sm:$0xff]  ;;  %v2047_v58 = vld [vmem:[#allocation16 + $0x2930] sm:$0xff] }
 0x5e7   :  { %3962 = vst [vmem:[#allocation19 + $0x78] sm:$0xff] %v5640_v10  ;;  %5570 = vmatpush1.bf16.msra.mxu0 %v5569_v52  ;;  %v5637_v35 = vadd.f32 %v3326_v4, %v2194_v59  ;;  %v3480_v14 = vpop.f32.mrb[26].mxu1  ;;  %v3328_v15 = vpop.f32.mrb[17].mxu0  ;;  %v5589_v59 = vpack.c.bf16 %v1915_v41, %v1893_v40  ;;  %v5599_v52 = vpack.c.bf16 %v2048_v2, %v2026_v63  ;;  %v2070_v5 = vld [vmem:[#allocation16 + $0x29e8] sm:$0xff]  ;;  %v2069_v10 = vld [vmem:[#allocation16 + $0x29e0] sm:$0xff]  ;;  %v2136_v4 = vld [vmem:[#allocation16 + $0x2bf8] sm:$0xff] }
 0x5e8   :  { %v5641_v20 = vadd.f32 %v3480_v14, %v2202_v44  ;;  %v5638_v19 = vadd.f32 %v3328_v15, %v2198_v9  ;;  %v3482_v12 = vpop.f32.mrb[27].mxu1  ;;  %5572 = vmatprep.subr.bf16.mxu0 %v5571_v57  ;;  %v5591_v44 = vpack.c.bf16 %v1960_v31, %v1938_v42  ;;  %v1937_v9 = vld [vmem:[#allocation16 + $0x25c0] sm:$0xff]  ;;  %v2092_v57 = vld [vmem:[#allocation16 + $0x2a98] sm:$0xff]  ;;  %v5601_v7 = vpack.c.bf16 %v2047_v58, %v2025_v53 }
 0x5e9   :  { %3981 = vst [vmem:[#allocation19 + $0x110] sm:$0xff] %v5637_v35  ;;  %v5642_v18 = vadd.f32 %v3482_v12, %v2206_v54  ;;  %v5593_v54 = vpack.c.bf16 %v1959_v47, %v1937_v9  ;;  %v5603_v8 = vpack.c.bf16 %v2092_v57, %v2070_v5  ;;  %v5605_v35 = vpack.c.bf16 %v2091_v43, %v2069_v10  ;;  %v2113_v15 = vld [vmem:[#allocation16 + $0x2b40] sm:$0xff] }
 0x5ea   :  { %3983 = vst [vmem:[#allocation19 + $0x120] sm:$0xff] %v5641_v20  ;;  %3982 = vst [vmem:[#allocation19 + $0x118] sm:$0xff] %v5638_v19  ;;  %v5607_v14 = vpack.c.bf16 %v2136_v4, %v2114_v11  ;;  %v2139_v19 = vld [vmem:[#allocation18 + $0x10] sm:$0x3f] }
 0x5eb   :  { %3984 = vst [vmem:[#allocation19 + $0x128] sm:$0xff] %v5642_v18  ;;  %5574 = vmatpush1.bf16.msra.mxu0 %v5573_v17  ;;  %v2135_v17 = vld [vmem:[#allocation16 + $0x2bf0] sm:$0xff]  ;;  %v2210_v12 = vrot.slane %v2139_v19, %v6180_v50  ;;  %v2214_v22 = vrot.slane %v2139_v19, %v6183_v55  ;;  %v2222_v23 = vrot.slane %v2139_v19, %v6233_v6 }
 0x5ec   :  { %5576 = vmatprep.subr.bf16.mxu0 %v5575_v21  ;;  %v5609_v20 = vpack.c.bf16 %v2135_v17, %v2113_v15  ;;  %v2218_v21 = vrot.slane %v2139_v19, %v6230_v1 }
 0x5ef   :  { %5578 = vmatpush1.bf16.msra.mxu0 %v5577_v30 }
 0x5f0   :  { %5580 = vmatprep.subr.bf16.mxu0 %v5579_v26 }
 0x5f3   :  { %5582 = vmatpush1.bf16.msra.mxu0 %v5581_v33  ;;  %v2226_v33 = vrot.slane %v2139_v19, %v6308_v56 }
 0x5f4   :  { %5584 = vmatprep.subr.bf16.mxu0 %v5583_v36  ;;  %v2230_v36 = vrot.slane %v2139_v19, %v6312_v60 }
 0x5f7   :  { %5586 = vmatpush1.bf16.msra.mxu0 %v5585_v39 }
 0x5f8   :  { %5588 = vmatprep.subr.bf16.mxu0 %v5587_v46 }
 0x5fb   :  { %5590 = vmatpush1.bf16.msra.mxu0 %v5589_v59 }
 0x5fc   :  { %5592 = vmatprep.subr.bf16.mxu0 %v5591_v44 }
 0x5ff   :  { %5594 = vmatpush1.bf16.msra.mxu0 %v5593_v54 }
 0x600   :  { %5596 = vmatprep.subr.bf16.mxu0 %v5595_v61 }
 0x603   :  { %5598 = vmatpush1.bf16.msra.mxu0 %v5597_v3 }
 0x604   :  { %5600 = vmatprep.subr.bf16.mxu0 %v5599_v52 }
 0x607   :  { %5602 = vmatpush1.bf16.msra.mxu0 %v5601_v7 }
 0x608   :  { %5604 = vmatprep.subr.bf16.mxu0 %v5603_v8 }
 0x60b   :  { %5606 = vmatpush1.bf16.msra.mxu0 %v5605_v35 }
 0x60c   :  { %5608 = vmatprep.subr.bf16.mxu0 %v5607_v14 }
 0x60f   :  { %5610 = vmatpush1.bf16.msra.mxu0 %v5609_v20 }
 0x612   :  { %3935 = vmatmul.mubr.f32.vlgmr.msra.gmra.mrb[22].mxu0 %v6244_v0 }
 0x613   :  { %3940 = vmatprep.mubr.f32.mxu0 %v6252_v13 }
 0x616   :  { %3941 = vmatmul.mubr.f32.gmra.mrb[24].mxu0 %v6255_v51 }
 0x664   :  { %v3628_v18 = vpop.f32.mrb[18].mxu0 }
 0x665   :  { %v5643_v24 = vadd.f32 %v3628_v18, %v2210_v12  ;;  %v3782_v34 = vpop.f32.mrb[28].mxu1  ;;  %v3630_v30 = vpop.f32.mrb[19].mxu0 }
 0x666   :  { %v5647_v26 = vadd.f32 %v3782_v34, %v2218_v21  ;;  %v5644_v27 = vadd.f32 %v3630_v30, %v2214_v22  ;;  %v3784_v0 = vpop.f32.mrb[29].mxu1 }
 0x667   :  { %3963 = vst [vmem:[#allocation19 + $0x80] sm:$0xff] %v5643_v24  ;;  %v5648_v13 = vadd.f32 %v3784_v0, %v2222_v23 }
 0x668   :  { %3965 = vst [vmem:[#allocation19 + $0x90] sm:$0xff] %v5647_v26  ;;  %3964 = vst [vmem:[#allocation19 + $0x88] sm:$0xff] %v5644_v27  ;;  %v3634_v51 = vpop.f32.mrb[20].mxu0 }
 0x669   :  { %3966 = vst [vmem:[#allocation19 + $0x98] sm:$0xff] %v5648_v13  ;;  %v5645_v50 = vadd.f32 %v3634_v51, %v2210_v12  ;;  %v3788_v28 = vpop.f32.mrb[30].mxu1  ;;  %v3636_v1 = vpop.f32.mrb[21].mxu0 }
 0x66a   :  { %v5649_v29 = vadd.f32 %v3788_v28, %v2218_v21  ;;  %v5646_v55 = vadd.f32 %v3636_v1, %v2214_v22  ;;  %v3790_v32 = vpop.f32.mrb[31].mxu1 }
 0x66b   :  { %3985 = vst [vmem:[#allocation19 + $0x130] sm:$0xff] %v5645_v50  ;;  %v5650_v6 = vadd.f32 %v3790_v32, %v2222_v23 }
 0x66c   :  { %3987 = vst [vmem:[#allocation19 + $0x140] sm:$0xff] %v5649_v29  ;;  %3986 = vst [vmem:[#allocation19 + $0x138] sm:$0xff] %v5646_v55 }
 0x66d   :  { %3988 = vst [vmem:[#allocation19 + $0x148] sm:$0xff] %v5650_v6 }
 0x6e5   :  { %v3936_v16 = vpop.f32.mrb[22].mxu0 }
 0x6e6   :  { %v5651_v37 = vadd.f32 %v3936_v16, %v2226_v33  ;;  %v3938_v25 = vpop.f32.mrb[23].mxu0 }
 0x6e7   :  { %v5652_v38 = vadd.f32 %v3938_v25, %v2230_v36 }
 0x6e8   :  { %3967 = vst [vmem:[#allocation19 + $0xa0] sm:$0xff] %v5651_v37 }
 0x6e9   :  { %3968 = vst [vmem:[#allocation19 + $0xa8] sm:$0xff] %v5652_v38  ;;  %v3942_v39 = vpop.f32.mrb[24].mxu0 }
 0x6ea   :  { %v5653_v46 = vadd.f32 %v3942_v39, %v2226_v33  ;;  %v3944_v40 = vpop.f32.mrb[25].mxu0 }
 0x6eb   :  { %v5654_v41 = vadd.f32 %v3944_v40, %v2230_v36 }
 0x6ec   :  { %3989 = vst [vmem:[#allocation19 + $0x150] sm:$0xff] %v5653_v46 }
 0x6ed   :  { %3990 = vst [vmem:[#allocation19 + $0x158] sm:$0xff] %v5654_v41 }
 0x6ee   :  { %5939 = shalt.err (!%p5936_p9)
}
 0x6ef   :  { %s5940_s13 = scalar_lea.hbm %s6402_s10, 5632 }
 0x6f0   :  { %p5941_p10 = scmp.ne.s32.totalorder %s6402_s10, %s5940_s13  ;;  %p5944_p11 = scmp.lt.u32.totalorder %s5940_s13, %s6402_s10 }
 0x6f2   :  { %p5946_p12 = pnand %p5944_p11, %p5941_p10 }
 0x6f4   :  { %5949 = shalt.err (!%p5946_p12)
}
 0x6f5   :  { %4002 = dma.vmem_to_hbm [thread:$0]  %s3997_s20, 5632, %s6402_s10, [#allocation4], %s5974_s6, %s5974_s6, %s5975_s22  }
 0x6f6   :  { %5962 = dma.done.wait [#allocation4], 5632  }
 0x6f7   :  { %5963 = vsyncadd [#allocation4], 4294961664 }
 0x6f8   :  { %4006 = vsyncpa [#allocation3], 1 }
 0x6f9   :  { %4007 = vsyncpa [#allocation8], 1 }
 0x6fa   :  { %4008 = vsyncpa [#allocation11], 1 }
 0x6fb   :  { %4009 = vsyncpa [#allocation14], 1 }
 0x6fc   :  { %4010 = vsyncpa [#allocation17], 1 }
 0x6fd   :  { %4011 = vsyncpa [#allocation4], 1 }
 0x6fe   :  { %4012 = vsyncpa [#allocation5], 1 }

</bundles_post_ra>
